<compile_context>
chip_gen: v5e
topology: v5e:2x2
jax: 0.10.0
libtpu: 0.0.40
codegen_flags: <defaults>
</compile_context>

<pallas_src>
import numpy as np
import jax
import jax.numpy as jnp
from jax.experimental import pallas as pl
from jax.experimental.pallas import tpu as pltpu


LANE = 128
BN_EPS = 1e-5


# ---------------------------------------------------------------------------
# Layer configuration (MNIST branch of the PyTorch Generator)
# ---------------------------------------------------------------------------
def _layer_cfgs(z_dim, im_channel, hidden_dim):
    return [
        dict(cin=z_dim,          cout=hidden_dim * 4, k=3, s=2, final=False),
        dict(cin=hidden_dim * 4, cout=hidden_dim * 2, k=4, s=1, final=False),
        dict(cin=hidden_dim * 2, cout=hidden_dim,     k=3, s=2, final=False),
        dict(cin=hidden_dim,     cout=im_channel,     k=4, s=2, final=True),
    ]


# ---------------------------------------------------------------------------
# Fused generator kernel (factory closes over static per-layer shapes)
# ---------------------------------------------------------------------------
def _make_kernel(cfgs):
    """Activations are 2-D row-packed tiles: rows = (n, h), lanes = (w, c).

    Per-layer operands (in order):
      BN layers:    D (k, N*Hout, N*H) bf16, band (k, W*Cin, Wout*Cout) bf16,
                    fold (Wout*Cout, Cout) f32, bcast (Cout, Wout*Cout) f32,
                    gamma (1, Cout) f32, beta (1, Cout) f32
      final layer:  D, band (lanes padded to 128), bias_row (1, lanes) f32
    """

    def kernel(*refs):
        z_ref = refs[0]
        out_ref = refs[-1]
        idx = 1
        x = z_ref[...]                                   # (N*H, W*Cin) f32
        for cfg in cfgs:
            k = cfg["k"]
            d_ref = refs[idx]                            # 0/1 row scatter per tap
            w_ref = refs[idx + 1]                        # banded weights per tap
            idx += 2

            xb = x.astype(jnp.bfloat16)                  # bf16 MXU operands
            acc = None
            for kh in range(k):
                # Row dilation + vertical-tap shift as one 0/1 selection matmul
                # (exact: selects already-bf16 values).
                lhs = jnp.dot(d_ref[kh], xb,
                              preferred_element_type=jnp.float32
                              ).astype(jnp.bfloat16)     # (N*Hout, W*Cin)
                # Horizontal taps + width dilation folded into the banded weight.
                part = jnp.dot(lhs, w_ref[kh],
                               preferred_element_type=jnp.float32)
                acc = part if acc is None else acc + part

            if cfg["final"]:
                b_ref = refs[idx]; idx += 1              # (1, lanes) f32
                out_ref[...] = jnp.tanh(acc + b_ref[...])
            else:
                f_ref = refs[idx]                        # (WC, Cout) 0/1 fold
                bc_ref = refs[idx + 1]                   # (Cout, WC) 0/1 bcast
                g_ref = refs[idx + 2]                    # (1, Cout) gamma
                be_ref = refs[idx + 3]                   # (1, Cout) beta
                idx += 4
                # Training-mode BatchNorm2d, biased stats over N*Hout*Wout.
                # Sums / sums-of-squares stay in f32 (review correctness note).
                inv_m = 1.0 / float(acc.shape[0] * cfg["wout"])
                s1 = jnp.sum(acc, axis=0, keepdims=True)            # (1, WC)
                s2 = jnp.sum(acc * acc, axis=0, keepdims=True)       # (1, WC)
                cs1 = jnp.dot(s1, f_ref[...],
                              preferred_element_type=jnp.float32)    # (1, Cout)
                cs2 = jnp.dot(s2, f_ref[...],
                              preferred_element_type=jnp.float32)
                mean = cs1 * inv_m
                var = cs2 * inv_m - mean * mean                      # biased
                scale = g_ref[...] * jax.lax.rsqrt(var + BN_EPS)
                shift = be_ref[...] - mean * scale
                scale_row = jnp.dot(scale, bc_ref[...],
                                    preferred_element_type=jnp.float32)
                shift_row = jnp.dot(shift, bc_ref[...],
                                    preferred_element_type=jnp.float32)
                x = jnp.maximum(acc * scale_row + shift_row, 0.0)    # ReLU

    return kernel


# ---------------------------------------------------------------------------
# Host-side parameter preparation (one-time, outside the hot path)
# ---------------------------------------------------------------------------
def init_params(key, z_dim=10, im_channel=1, hidden_dim=16):
    """Deterministic synthetic parameters (PyTorch-like uniform fan-in init)."""
    params = []
    for cfg in _layer_cfgs(z_dim, im_channel, hidden_dim):
        cin, cout, k = cfg["cin"], cfg["cout"], cfg["k"]
        key, kw, kb = jax.random.split(key, 3)
        bound = 1.0 / float(np.sqrt(cin * k * k))
        w = jax.random.uniform(kw, (cin, cout, k, k), jnp.float32, -bound, bound)
        b = jax.random.uniform(kb, (cout,), jnp.float32, -bound, bound)
        params.append(dict(cfg, w=w, b=b,
                           gamma=jnp.ones((cout,), jnp.float32),   # BN defaults
                           beta=jnp.zeros((cout,), jnp.float32)))
    return params
# TODO(synk): BatchNorm running_mean/running_var momentum updates (training-side
# state) are not tracked; only the normalized forward value is reproduced.


def prepare_operands(params, batch):
    """Build per-layer kernel operands:
       * D[kh]   : 0/1 row dilation + vertical-tap shift matrices (bf16)
       * band[kh]: banded weights with width dilation/taps folded in  (bf16)
       * fold / bcast 0/1 matrices + gamma/beta for BN layers          (f32)
       * lane-padded bias row for the final Tanh layer                 (f32)
    """
    operands = []
    kcfgs = []
    h = 1
    n = batch
    for p in params:
        cin, cout, k, s, final = p["cin"], p["cout"], p["k"], p["s"], p["final"]
        hout = (h - 1) * s + k
        wout = hout                                      # square activations
        wc = wout * cout
        wc_pad = ((wc + LANE - 1) // LANE) * LANE if final else wc

        # 0/1 row scatter per vertical tap: places input row (n, ih) at output
        # row (n, ih*s + kh).  Replaces in-kernel row dilation + tap slicing.
        d = np.zeros((k, n * hout, n * h), np.float32)
        for kh in range(k):
            for nn in range(n):
                for ih in range(h):
                    d[kh, nn * hout + ih * s + kh, nn * h + ih] = 1.0

        # Banded weight per vertical tap, acting on UNdilated input columns:
        # band[kh][iw*cin + ci, ow*cout + co] = w[ci, co, kh, ow - iw*s].
        w = np.asarray(p["w"], np.float32)               # (Cin, Cout, K, K)
        band = np.zeros((k, h * cin, wc_pad), np.float32)
        for kh in range(k):
            for iw in range(h):                          # input width == h
                for kw in range(k):
                    ow = iw * s + kw
                    band[kh,
                         iw * cin:(iw + 1) * cin,
                         ow * cout:(ow + 1) * cout] = w[:, :, kh, kw]

        operands.append(jnp.asarray(d, jnp.bfloat16))
        operands.append(jnp.asarray(band, jnp.bfloat16))

        if final:
            # ConvTranspose bias, pre-broadcast over (w, c) lanes, zero-padded
            # to a full 128-lane store width.
            brow = np.zeros((1, wc_pad), np.float32)
            b = np.asarray(p["b"], np.float32)
            for ow in range(wout):
                brow[0, ow * cout:(ow + 1) * cout] = b
            operands.append(jnp.asarray(brow))
        else:
            # Bias dropped: exactly cancelled by the BN mean subtraction.
            fold = np.zeros((wc, cout), np.float32)      # per-channel fold
            for ow in range(wout):
                fold[ow * cout:(ow + 1) * cout, :] = np.eye(cout, dtype=np.float32)
            operands.append(jnp.asarray(fold))                   # (WC, Cout)
            operands.append(jnp.asarray(np.ascontiguousarray(fold.T)))  # (Cout, WC)
            operands.append(jnp.asarray(p["gamma"], jnp.float32).reshape(1, cout))
            operands.append(jnp.asarray(p["beta"], jnp.float32).reshape(1, cout))

        kcfgs.append(dict(k=k, wout=wout, cout=cout, wc=wc, wc_pad=wc_pad,
                          final=final))
        h = hout
    return operands, kcfgs, h                            # h == final spatial (28)


# ---------------------------------------------------------------------------
# pallas_call wrapper
# ---------------------------------------------------------------------------
def _full_spec(shape):
    nd = len(shape)
    return pl.BlockSpec(shape, lambda *_: (0,) * nd)


def generator_forward(noise, operands, kcfgs, out_hw, im_channel):
    n = noise.shape[0]
    last = kcfgs[-1]
    kernel = _make_kernel(kcfgs)
    inputs = [noise] + list(operands)
    out_rows = n * out_hw
    out_shape = jax.ShapeDtypeStruct((out_rows, last["wc_pad"]), jnp.float32)
    out = pl.pallas_call(
        kernel,
        out_shape=out_shape,
        grid=(1,),
        in_specs=[_full_spec(a.shape) for a in inputs],
        out_specs=_full_spec(out_shape.shape),
        compiler_params=pltpu.CompilerParams(
            dimension_semantics=("arbitrary",)),
    )(*inputs)
    # rows = (n, oh), lanes = (ow, co) with co fastest -> NCHW
    img = out[:, :last["wc"]].reshape(n, out_hw, out_hw, im_channel)
    return img.transpose(0, 3, 1, 2)


# ---------------------------------------------------------------------------
# Pure-JAX reference (mirrors the kernel's bf16 operand rounding policy)
# ---------------------------------------------------------------------------
def reference_forward(noise, params):
    x = noise.reshape(noise.shape[0], noise.shape[1], 1, 1)      # (N, z, 1, 1)
    for p in params:
        k, s = p["k"], p["s"]
        xb = x.astype(jnp.bfloat16).astype(jnp.float32)
        wb = jnp.asarray(p["w"]).astype(jnp.bfloat16).astype(jnp.float32)
        wf = jnp.flip(wb, axis=(2, 3))                           # (Cin,Cout,k,k)
        y = jax.lax.conv_general_dilated(
            xb, wf, window_strides=(1, 1),
            padding=((k - 1, k - 1), (k - 1, k - 1)),
            lhs_dilation=(s, s),
            dimension_numbers=("NCHW", "IOHW", "NCHW"))
        y = y + jnp.asarray(p["b"]).reshape(1, -1, 1, 1)
        if p["final"]:
            x = jnp.tanh(y)
        else:
            mean = jnp.mean(y, axis=(0, 2, 3), keepdims=True)
            var = jnp.mean(jnp.square(y - mean), axis=(0, 2, 3), keepdims=True)
            g = jnp.asarray(p["gamma"]).reshape(1, -1, 1, 1)
            b = jnp.asarray(p["beta"]).reshape(1, -1, 1, 1)
            x = jnp.maximum((y - mean) * jax.lax.rsqrt(var + BN_EPS) * g + b, 0.0)
    return x


if __name__ == "__main__":
    z_dim, im_channel, hidden_dim, batch = 10, 1, 16, 2
    key = jax.random.PRNGKey(0)
    kp, kz = jax.random.split(key)
    params = init_params(kp, z_dim, im_channel, hidden_dim)
    noise = jax.random.normal(kz, (batch, z_dim), jnp.float32)

    operands, kcfgs, out_hw = prepare_operands(params, batch)
    out = generator_forward(noise, operands, kcfgs, out_hw, im_channel)
    out = jax.block_until_ready(out)
    assert out.shape == (batch, im_channel, 28, 28), out.shape
    assert bool(jnp.all(jnp.isfinite(out)))

    ref = jax.block_until_ready(reference_forward(noise, params))
    max_err = float(jnp.max(jnp.abs(out - ref)))
    # Generous bound: covers bf16/EUP approximation noise (~1e-2) while still
    # catching any structural error (which would be O(0.1..1)).
    assert max_err < 5e-2, f"max |kernel - reference| = {max_err}"
    print("KERNEL_OK")
</pallas_src>

<mosaic_0001>
module attributes {stable_mosaic.version = 11 : i64} {
  func.func @kernel(%arg0: i32, %arg1: memref<2x10xf32, #tpu.memory_space<vmem>>, %arg2: memref<3x6x2xbf16, #tpu.memory_space<vmem>>, %arg3: memref<3x10x192xbf16, #tpu.memory_space<vmem>>, %arg4: memref<192x64xf32, #tpu.memory_space<vmem>>, %arg5: memref<64x192xf32, #tpu.memory_space<vmem>>, %arg6: memref<1x64xf32, #tpu.memory_space<vmem>>, %arg7: memref<1x64xf32, #tpu.memory_space<vmem>>, %arg8: memref<4x12x6xbf16, #tpu.memory_space<vmem>>, %arg9: memref<4x192x192xbf16, #tpu.memory_space<vmem>>, %arg10: memref<192x32xf32, #tpu.memory_space<vmem>>, %arg11: memref<32x192xf32, #tpu.memory_space<vmem>>, %arg12: memref<1x32xf32, #tpu.memory_space<vmem>>, %arg13: memref<1x32xf32, #tpu.memory_space<vmem>>, %arg14: memref<3x26x12xbf16, #tpu.memory_space<vmem>>, %arg15: memref<3x192x208xbf16, #tpu.memory_space<vmem>>, %arg16: memref<208x16xf32, #tpu.memory_space<vmem>>, %arg17: memref<16x208xf32, #tpu.memory_space<vmem>>, %arg18: memref<1x16xf32, #tpu.memory_space<vmem>>, %arg19: memref<1x16xf32, #tpu.memory_space<vmem>>, %arg20: memref<4x56x26xbf16, #tpu.memory_space<vmem>>, %arg21: memref<4x208x128xbf16, #tpu.memory_space<vmem>>, %arg22: memref<1x128xf32, #tpu.memory_space<vmem>>, %arg23: memref<56x128xf32, #tpu.memory_space<vmem>>) attributes {dimension_semantics = [#tpu.dimension_semantics<arbitrary>], iteration_bounds = array<i64: 1>, scalar_prefetch = 0 : i64, scratch_operands = 0 : i64, tpu.core_type = #tpu.core_type<tc>, window_params = [{pipeline_mode = #tpu.pipeline_mode<synchronous>, transform_indices = @transform_0, window_bounds = array<i64: 2, 10>}, {pipeline_mode = #tpu.pipeline_mode<synchronous>, transform_indices = @transform_1, window_bounds = array<i64: 3, 6, 2>}, {pipeline_mode = #tpu.pipeline_mode<synchronous>, transform_indices = @transform_2, window_bounds = array<i64: 3, 10, 192>}, {pipeline_mode = #tpu.pipeline_mode<synchronous>, transform_indices = @transform_3, window_bounds = array<i64: 192, 64>}, {pipeline_mode = #tpu.pipeline_mode<synchronous>, transform_indices = @transform_4, window_bounds = array<i64: 64, 192>}, {pipeline_mode = #tpu.pipeline_mode<synchronous>, transform_indices = @transform_5, window_bounds = array<i64: 1, 64>}, {pipeline_mode = #tpu.pipeline_mode<synchronous>, transform_indices = @transform_6, window_bounds = array<i64: 1, 64>}, {pipeline_mode = #tpu.pipeline_mode<synchronous>, transform_indices = @transform_7, window_bounds = array<i64: 4, 12, 6>}, {pipeline_mode = #tpu.pipeline_mode<synchronous>, transform_indices = @transform_8, window_bounds = array<i64: 4, 192, 192>}, {pipeline_mode = #tpu.pipeline_mode<synchronous>, transform_indices = @transform_9, window_bounds = array<i64: 192, 32>}, {pipeline_mode = #tpu.pipeline_mode<synchronous>, transform_indices = @transform_10, window_bounds = array<i64: 32, 192>}, {pipeline_mode = #tpu.pipeline_mode<synchronous>, transform_indices = @transform_11, window_bounds = array<i64: 1, 32>}, {pipeline_mode = #tpu.pipeline_mode<synchronous>, transform_indices = @transform_12, window_bounds = array<i64: 1, 32>}, {pipeline_mode = #tpu.pipeline_mode<synchronous>, transform_indices = @transform_13, window_bounds = array<i64: 3, 26, 12>}, {pipeline_mode = #tpu.pipeline_mode<synchronous>, transform_indices = @transform_14, window_bounds = array<i64: 3, 192, 208>}, {pipeline_mode = #tpu.pipeline_mode<synchronous>, transform_indices = @transform_15, window_bounds = array<i64: 208, 16>}, {pipeline_mode = #tpu.pipeline_mode<synchronous>, transform_indices = @transform_16, window_bounds = array<i64: 16, 208>}, {pipeline_mode = #tpu.pipeline_mode<synchronous>, transform_indices = @transform_17, window_bounds = array<i64: 1, 16>}, {pipeline_mode = #tpu.pipeline_mode<synchronous>, transform_indices = @transform_18, window_bounds = array<i64: 1, 16>}, {pipeline_mode = #tpu.pipeline_mode<synchronous>, transform_indices = @transform_19, window_bounds = array<i64: 4, 56, 26>}, {pipeline_mode = #tpu.pipeline_mode<synchronous>, transform_indices = @transform_20, window_bounds = array<i64: 4, 208, 128>}, {pipeline_mode = #tpu.pipeline_mode<synchronous>, transform_indices = @transform_21, window_bounds = array<i64: 1, 128>}, {pipeline_mode = #tpu.pipeline_mode<synchronous>, transform_indices = @transform_22, window_bounds = array<i64: 56, 128>}]} {
    %c0 = arith.constant 0 : index
    %c0_0 = arith.constant 0 : index
    %0 = vector.load %arg1[%c0, %c0_0] : memref<2x10xf32, #tpu.memory_space<vmem>>, vector<2x10xf32>
    %1 = arith.truncf %0 : vector<2x10xf32> to vector<2x10xbf16>
    %c0_1 = arith.constant 0 : index
    %c0_2 = arith.constant 0 : index
    %c0_3 = arith.constant 0 : index
    %2 = vector.load %arg2[%c0_1, %c0_2, %c0_3] : memref<3x6x2xbf16, #tpu.memory_space<vmem>>, vector<1x6x2xbf16>
    %3 = vector.shape_cast %2 : vector<1x6x2xbf16> to vector<6x2xbf16>
    %cst = arith.constant dense<0.000000e+00> : vector<6x10xf32>
    %4 = tpu.matmul %3, %1, %cst {dimension_numbers = #tpu.dot_dimension_numbers<[1], [0], [0], [1], [0, 0, 1, 1], [], []>} : vector<6x2xbf16>, vector<2x10xbf16>, vector<6x10xf32> -> vector<6x10xf32>
    %5 = arith.truncf %4 : vector<6x10xf32> to vector<6x10xbf16>
    %c0_4 = arith.constant 0 : index
    %c0_5 = arith.constant 0 : index
    %c0_6 = arith.constant 0 : index
    %6 = vector.load %arg3[%c0_4, %c0_5, %c0_6] : memref<3x10x192xbf16, #tpu.memory_space<vmem>>, vector<1x10x192xbf16>
    %7 = vector.shape_cast %6 : vector<1x10x192xbf16> to vector<10x192xbf16>
    %cst_7 = arith.constant dense<0.000000e+00> : vector<6x192xf32>
    %8 = tpu.matmul %5, %7, %cst_7 {dimension_numbers = #tpu.dot_dimension_numbers<[1], [0], [0], [1], [0, 0, 1, 1], [], []>} : vector<6x10xbf16>, vector<10x192xbf16>, vector<6x192xf32> -> vector<6x192xf32>
    %c1 = arith.constant 1 : index
    %c0_8 = arith.constant 0 : index
    %c0_9 = arith.constant 0 : index
    %9 = vector.load %arg2[%c1, %c0_8, %c0_9] : memref<3x6x2xbf16, #tpu.memory_space<vmem>>, vector<1x6x2xbf16>
    %10 = vector.shape_cast %9 : vector<1x6x2xbf16> to vector<6x2xbf16>
    %cst_10 = arith.constant dense<0.000000e+00> : vector<6x10xf32>
    %11 = tpu.matmul %10, %1, %cst_10 {dimension_numbers = #tpu.dot_dimension_numbers<[1], [0], [0], [1], [0, 0, 1, 1], [], []>} : vector<6x2xbf16>, vector<2x10xbf16>, vector<6x10xf32> -> vector<6x10xf32>
    %12 = arith.truncf %11 : vector<6x10xf32> to vector<6x10xbf16>
    %c1_11 = arith.constant 1 : index
    %c0_12 = arith.constant 0 : index
    %c0_13 = arith.constant 0 : index
    %13 = vector.load %arg3[%c1_11, %c0_12, %c0_13] : memref<3x10x192xbf16, #tpu.memory_space<vmem>>, vector<1x10x192xbf16>
    %14 = vector.shape_cast %13 : vector<1x10x192xbf16> to vector<10x192xbf16>
    %cst_14 = arith.constant dense<0.000000e+00> : vector<6x192xf32>
    %15 = tpu.matmul %12, %14, %cst_14 {dimension_numbers = #tpu.dot_dimension_numbers<[1], [0], [0], [1], [0, 0, 1, 1], [], []>} : vector<6x10xbf16>, vector<10x192xbf16>, vector<6x192xf32> -> vector<6x192xf32>
    %16 = arith.addf %8, %15 : vector<6x192xf32>
    %c2 = arith.constant 2 : index
    %c0_15 = arith.constant 0 : index
    %c0_16 = arith.constant 0 : index
    %17 = vector.load %arg2[%c2, %c0_15, %c0_16] : memref<3x6x2xbf16, #tpu.memory_space<vmem>>, vector<1x6x2xbf16>
    %18 = vector.shape_cast %17 : vector<1x6x2xbf16> to vector<6x2xbf16>
    %cst_17 = arith.constant dense<0.000000e+00> : vector<6x10xf32>
    %19 = tpu.matmul %18, %1, %cst_17 {dimension_numbers = #tpu.dot_dimension_numbers<[1], [0], [0], [1], [0, 0, 1, 1], [], []>} : vector<6x2xbf16>, vector<2x10xbf16>, vector<6x10xf32> -> vector<6x10xf32>
    %20 = arith.truncf %19 : vector<6x10xf32> to vector<6x10xbf16>
    %c2_18 = arith.constant 2 : index
    %c0_19 = arith.constant 0 : index
    %c0_20 = arith.constant 0 : index
    %21 = vector.load %arg3[%c2_18, %c0_19, %c0_20] : memref<3x10x192xbf16, #tpu.memory_space<vmem>>, vector<1x10x192xbf16>
    %22 = vector.shape_cast %21 : vector<1x10x192xbf16> to vector<10x192xbf16>
    %cst_21 = arith.constant dense<0.000000e+00> : vector<6x192xf32>
    %23 = tpu.matmul %20, %22, %cst_21 {dimension_numbers = #tpu.dot_dimension_numbers<[1], [0], [0], [1], [0, 0, 1, 1], [], []>} : vector<6x10xbf16>, vector<10x192xbf16>, vector<6x192xf32> -> vector<6x192xf32>
    %24 = arith.addf %16, %23 : vector<6x192xf32>
    %cst_22 = arith.constant dense<0.000000e+00> : vector<192xf32>
    %25 = vector.multi_reduction <add>, %24, %cst_22 [0] : vector<6x192xf32> to vector<192xf32>
    %26 = vector.shape_cast %25 : vector<192xf32> to vector<1x192xf32>
    %27 = arith.mulf %24, %24 : vector<6x192xf32>
    %cst_23 = arith.constant dense<0.000000e+00> : vector<192xf32>
    %28 = vector.multi_reduction <add>, %27, %cst_23 [0] : vector<6x192xf32> to vector<192xf32>
    %29 = vector.shape_cast %28 : vector<192xf32> to vector<1x192xf32>
    %c0_24 = arith.constant 0 : index
    %c0_25 = arith.constant 0 : index
    %30 = vector.load %arg4[%c0_24, %c0_25] : memref<192x64xf32, #tpu.memory_space<vmem>>, vector<192x64xf32>
    %cst_26 = arith.constant dense<0.000000e+00> : vector<1x64xf32>
    %31 = tpu.matmul %26, %30, %cst_26 {dimension_numbers = #tpu.dot_dimension_numbers<[1], [0], [0], [1], [0, 0, 1, 1], [], []>} : vector<1x192xf32>, vector<192x64xf32>, vector<1x64xf32> -> vector<1x64xf32>
    %c0_27 = arith.constant 0 : index
    %c0_28 = arith.constant 0 : index
    %32 = vector.load %arg4[%c0_27, %c0_28] : memref<192x64xf32, #tpu.memory_space<vmem>>, vector<192x64xf32>
    %cst_29 = arith.constant dense<0.000000e+00> : vector<1x64xf32>
    %33 = tpu.matmul %29, %32, %cst_29 {dimension_numbers = #tpu.dot_dimension_numbers<[1], [0], [0], [1], [0, 0, 1, 1], [], []>} : vector<1x192xf32>, vector<192x64xf32>, vector<1x64xf32> -> vector<1x64xf32>
    %cst_30 = arith.constant 0.055555556 : f32
    %34 = vector.broadcast %cst_30 : f32 to vector<1x64xf32>
    %35 = arith.mulf %31, %34 : vector<1x64xf32>
    %cst_31 = arith.constant 0.055555556 : f32
    %36 = vector.broadcast %cst_31 : f32 to vector<1x64xf32>
    %37 = arith.mulf %33, %36 : vector<1x64xf32>
    %38 = arith.mulf %35, %35 : vector<1x64xf32>
    %39 = arith.subf %37, %38 : vector<1x64xf32>
    %c0_32 = arith.constant 0 : index
    %c0_33 = arith.constant 0 : index
    %40 = vector.load %arg6[%c0_32, %c0_33] : memref<1x64xf32, #tpu.memory_space<vmem>>, vector<1x64xf32>
    %cst_34 = arith.constant 9.99999974E-6 : f32
    %41 = vector.broadcast %cst_34 : f32 to vector<1x64xf32>
    %42 = arith.addf %39, %41 : vector<1x64xf32>
    %43 = math.rsqrt %42 : vector<1x64xf32>
    %44 = arith.mulf %40, %43 : vector<1x64xf32>
    %c0_35 = arith.constant 0 : index
    %c0_36 = arith.constant 0 : index
    %45 = vector.load %arg7[%c0_35, %c0_36] : memref<1x64xf32, #tpu.memory_space<vmem>>, vector<1x64xf32>
    %46 = arith.mulf %35, %44 : vector<1x64xf32>
    %47 = arith.subf %45, %46 : vector<1x64xf32>
    %c0_37 = arith.constant 0 : index
    %c0_38 = arith.constant 0 : index
    %48 = vector.load %arg5[%c0_37, %c0_38] : memref<64x192xf32, #tpu.memory_space<vmem>>, vector<64x192xf32>
    %cst_39 = arith.constant dense<0.000000e+00> : vector<1x192xf32>
    %49 = tpu.matmul %44, %48, %cst_39 {dimension_numbers = #tpu.dot_dimension_numbers<[1], [0], [0], [1], [0, 0, 1, 1], [], []>} : vector<1x64xf32>, vector<64x192xf32>, vector<1x192xf32> -> vector<1x192xf32>
    %c0_40 = arith.constant 0 : index
    %c0_41 = arith.constant 0 : index
    %50 = vector.load %arg5[%c0_40, %c0_41] : memref<64x192xf32, #tpu.memory_space<vmem>>, vector<64x192xf32>
    %cst_42 = arith.constant dense<0.000000e+00> : vector<1x192xf32>
    %51 = tpu.matmul %47, %50, %cst_42 {dimension_numbers = #tpu.dot_dimension_numbers<[1], [0], [0], [1], [0, 0, 1, 1], [], []>} : vector<1x64xf32>, vector<64x192xf32>, vector<1x192xf32> -> vector<1x192xf32>
    %52 = vector.broadcast %49 : vector<1x192xf32> to vector<6x192xf32>
    %53 = arith.mulf %24, %52 : vector<6x192xf32>
    %54 = vector.broadcast %51 : vector<1x192xf32> to vector<6x192xf32>
    %55 = arith.addf %53, %54 : vector<6x192xf32>
    %cst_43 = arith.constant 0.000000e+00 : f32
    %56 = vector.broadcast %cst_43 : f32 to vector<6x192xf32>
    %57 = arith.maximumf %55, %56 : vector<6x192xf32>
    %58 = arith.truncf %57 : vector<6x192xf32> to vector<6x192xbf16>
    %c0_44 = arith.constant 0 : index
    %c0_45 = arith.constant 0 : index
    %c0_46 = arith.constant 0 : index
    %59 = vector.load %arg8[%c0_44, %c0_45, %c0_46] : memref<4x12x6xbf16, #tpu.memory_space<vmem>>, vector<1x12x6xbf16>
    %60 = vector.shape_cast %59 : vector<1x12x6xbf16> to vector<12x6xbf16>
    %cst_47 = arith.constant dense<0.000000e+00> : vector<12x192xf32>
    %61 = tpu.matmul %60, %58, %cst_47 {dimension_numbers = #tpu.dot_dimension_numbers<[1], [0], [0], [1], [0, 0, 1, 1], [], []>} : vector<12x6xbf16>, vector<6x192xbf16>, vector<12x192xf32> -> vector<12x192xf32>
    %62 = arith.truncf %61 : vector<12x192xf32> to vector<12x192xbf16>
    %c0_48 = arith.constant 0 : index
    %c0_49 = arith.constant 0 : index
    %c0_50 = arith.constant 0 : index
    %63 = vector.load %arg9[%c0_48, %c0_49, %c0_50] : memref<4x192x192xbf16, #tpu.memory_space<vmem>>, vector<1x192x192xbf16>
    %64 = vector.shape_cast %63 : vector<1x192x192xbf16> to vector<192x192xbf16>
    %cst_51 = arith.constant dense<0.000000e+00> : vector<12x192xf32>
    %65 = tpu.matmul %62, %64, %cst_51 {dimension_numbers = #tpu.dot_dimension_numbers<[1], [0], [0], [1], [0, 0, 1, 1], [], []>} : vector<12x192xbf16>, vector<192x192xbf16>, vector<12x192xf32> -> vector<12x192xf32>
    %c1_52 = arith.constant 1 : index
    %c0_53 = arith.constant 0 : index
    %c0_54 = arith.constant 0 : index
    %66 = vector.load %arg8[%c1_52, %c0_53, %c0_54] : memref<4x12x6xbf16, #tpu.memory_space<vmem>>, vector<1x12x6xbf16>
    %67 = vector.shape_cast %66 : vector<1x12x6xbf16> to vector<12x6xbf16>
    %cst_55 = arith.constant dense<0.000000e+00> : vector<12x192xf32>
    %68 = tpu.matmul %67, %58, %cst_55 {dimension_numbers = #tpu.dot_dimension_numbers<[1], [0], [0], [1], [0, 0, 1, 1], [], []>} : vector<12x6xbf16>, vector<6x192xbf16>, vector<12x192xf32> -> vector<12x192xf32>
    %69 = arith.truncf %68 : vector<12x192xf32> to vector<12x192xbf16>
    %c1_56 = arith.constant 1 : index
    %c0_57 = arith.constant 0 : index
    %c0_58 = arith.constant 0 : index
    %70 = vector.load %arg9[%c1_56, %c0_57, %c0_58] : memref<4x192x192xbf16, #tpu.memory_space<vmem>>, vector<1x192x192xbf16>
    %71 = vector.shape_cast %70 : vector<1x192x192xbf16> to vector<192x192xbf16>
    %cst_59 = arith.constant dense<0.000000e+00> : vector<12x192xf32>
    %72 = tpu.matmul %69, %71, %cst_59 {dimension_numbers = #tpu.dot_dimension_numbers<[1], [0], [0], [1], [0, 0, 1, 1], [], []>} : vector<12x192xbf16>, vector<192x192xbf16>, vector<12x192xf32> -> vector<12x192xf32>
    %73 = arith.addf %65, %72 : vector<12x192xf32>
    %c2_60 = arith.constant 2 : index
    %c0_61 = arith.constant 0 : index
    %c0_62 = arith.constant 0 : index
    %74 = vector.load %arg8[%c2_60, %c0_61, %c0_62] : memref<4x12x6xbf16, #tpu.memory_space<vmem>>, vector<1x12x6xbf16>
    %75 = vector.shape_cast %74 : vector<1x12x6xbf16> to vector<12x6xbf16>
    %cst_63 = arith.constant dense<0.000000e+00> : vector<12x192xf32>
    %76 = tpu.matmul %75, %58, %cst_63 {dimension_numbers = #tpu.dot_dimension_numbers<[1], [0], [0], [1], [0, 0, 1, 1], [], []>} : vector<12x6xbf16>, vector<6x192xbf16>, vector<12x192xf32> -> vector<12x192xf32>
    %77 = arith.truncf %76 : vector<12x192xf32> to vector<12x192xbf16>
    %c2_64 = arith.constant 2 : index
    %c0_65 = arith.constant 0 : index
    %c0_66 = arith.constant 0 : index
    %78 = vector.load %arg9[%c2_64, %c0_65, %c0_66] : memref<4x192x192xbf16, #tpu.memory_space<vmem>>, vector<1x192x192xbf16>
    %79 = vector.shape_cast %78 : vector<1x192x192xbf16> to vector<192x192xbf16>
    %cst_67 = arith.constant dense<0.000000e+00> : vector<12x192xf32>
    %80 = tpu.matmul %77, %79, %cst_67 {dimension_numbers = #tpu.dot_dimension_numbers<[1], [0], [0], [1], [0, 0, 1, 1], [], []>} : vector<12x192xbf16>, vector<192x192xbf16>, vector<12x192xf32> -> vector<12x192xf32>
    %81 = arith.addf %73, %80 : vector<12x192xf32>
    %c3 = arith.constant 3 : index
    %c0_68 = arith.constant 0 : index
    %c0_69 = arith.constant 0 : index
    %82 = vector.load %arg8[%c3, %c0_68, %c0_69] : memref<4x12x6xbf16, #tpu.memory_space<vmem>>, vector<1x12x6xbf16>
    %83 = vector.shape_cast %82 : vector<1x12x6xbf16> to vector<12x6xbf16>
    %cst_70 = arith.constant dense<0.000000e+00> : vector<12x192xf32>
    %84 = tpu.matmul %83, %58, %cst_70 {dimension_numbers = #tpu.dot_dimension_numbers<[1], [0], [0], [1], [0, 0, 1, 1], [], []>} : vector<12x6xbf16>, vector<6x192xbf16>, vector<12x192xf32> -> vector<12x192xf32>
    %85 = arith.truncf %84 : vector<12x192xf32> to vector<12x192xbf16>
    %c3_71 = arith.constant 3 : index
    %c0_72 = arith.constant 0 : index
    %c0_73 = arith.constant 0 : index
    %86 = vector.load %arg9[%c3_71, %c0_72, %c0_73] : memref<4x192x192xbf16, #tpu.memory_space<vmem>>, vector<1x192x192xbf16>
    %87 = vector.shape_cast %86 : vector<1x192x192xbf16> to vector<192x192xbf16>
    %cst_74 = arith.constant dense<0.000000e+00> : vector<12x192xf32>
    %88 = tpu.matmul %85, %87, %cst_74 {dimension_numbers = #tpu.dot_dimension_numbers<[1], [0], [0], [1], [0, 0, 1, 1], [], []>} : vector<12x192xbf16>, vector<192x192xbf16>, vector<12x192xf32> -> vector<12x192xf32>
    %89 = arith.addf %81, %88 : vector<12x192xf32>
    %cst_75 = arith.constant dense<0.000000e+00> : vector<192xf32>
    %90 = vector.multi_reduction <add>, %89, %cst_75 [0] : vector<12x192xf32> to vector<192xf32>
    %91 = vector.shape_cast %90 : vector<192xf32> to vector<1x192xf32>
    %92 = arith.mulf %89, %89 : vector<12x192xf32>
    %cst_76 = arith.constant dense<0.000000e+00> : vector<192xf32>
    %93 = vector.multi_reduction <add>, %92, %cst_76 [0] : vector<12x192xf32> to vector<192xf32>
    %94 = vector.shape_cast %93 : vector<192xf32> to vector<1x192xf32>
    %c0_77 = arith.constant 0 : index
    %c0_78 = arith.constant 0 : index
    %95 = vector.load %arg10[%c0_77, %c0_78] : memref<192x32xf32, #tpu.memory_space<vmem>>, vector<192x32xf32>
    %cst_79 = arith.constant dense<0.000000e+00> : vector<1x32xf32>
    %96 = tpu.matmul %91, %95, %cst_79 {dimension_numbers = #tpu.dot_dimension_numbers<[1], [0], [0], [1], [0, 0, 1, 1], [], []>} : vector<1x192xf32>, vector<192x32xf32>, vector<1x32xf32> -> vector<1x32xf32>
    %c0_80 = arith.constant 0 : index
    %c0_81 = arith.constant 0 : index
    %97 = vector.load %arg10[%c0_80, %c0_81] : memref<192x32xf32, #tpu.memory_space<vmem>>, vector<192x32xf32>
    %cst_82 = arith.constant dense<0.000000e+00> : vector<1x32xf32>
    %98 = tpu.matmul %94, %97, %cst_82 {dimension_numbers = #tpu.dot_dimension_numbers<[1], [0], [0], [1], [0, 0, 1, 1], [], []>} : vector<1x192xf32>, vector<192x32xf32>, vector<1x32xf32> -> vector<1x32xf32>
    %cst_83 = arith.constant 0.013888889 : f32
    %99 = vector.broadcast %cst_83 : f32 to vector<1x32xf32>
    %100 = arith.mulf %96, %99 : vector<1x32xf32>
    %cst_84 = arith.constant 0.013888889 : f32
    %101 = vector.broadcast %cst_84 : f32 to vector<1x32xf32>
    %102 = arith.mulf %98, %101 : vector<1x32xf32>
    %103 = arith.mulf %100, %100 : vector<1x32xf32>
    %104 = arith.subf %102, %103 : vector<1x32xf32>
    %c0_85 = arith.constant 0 : index
    %c0_86 = arith.constant 0 : index
    %105 = vector.load %arg12[%c0_85, %c0_86] : memref<1x32xf32, #tpu.memory_space<vmem>>, vector<1x32xf32>
    %cst_87 = arith.constant 9.99999974E-6 : f32
    %106 = vector.broadcast %cst_87 : f32 to vector<1x32xf32>
    %107 = arith.addf %104, %106 : vector<1x32xf32>
    %108 = math.rsqrt %107 : vector<1x32xf32>
    %109 = arith.mulf %105, %108 : vector<1x32xf32>
    %c0_88 = arith.constant 0 : index
    %c0_89 = arith.constant 0 : index
    %110 = vector.load %arg13[%c0_88, %c0_89] : memref<1x32xf32, #tpu.memory_space<vmem>>, vector<1x32xf32>
    %111 = arith.mulf %100, %109 : vector<1x32xf32>
    %112 = arith.subf %110, %111 : vector<1x32xf32>
    %c0_90 = arith.constant 0 : index
    %c0_91 = arith.constant 0 : index
    %113 = vector.load %arg11[%c0_90, %c0_91] : memref<32x192xf32, #tpu.memory_space<vmem>>, vector<32x192xf32>
    %cst_92 = arith.constant dense<0.000000e+00> : vector<1x192xf32>
    %114 = tpu.matmul %109, %113, %cst_92 {dimension_numbers = #tpu.dot_dimension_numbers<[1], [0], [0], [1], [0, 0, 1, 1], [], []>} : vector<1x32xf32>, vector<32x192xf32>, vector<1x192xf32> -> vector<1x192xf32>
    %c0_93 = arith.constant 0 : index
    %c0_94 = arith.constant 0 : index
    %115 = vector.load %arg11[%c0_93, %c0_94] : memref<32x192xf32, #tpu.memory_space<vmem>>, vector<32x192xf32>
    %cst_95 = arith.constant dense<0.000000e+00> : vector<1x192xf32>
    %116 = tpu.matmul %112, %115, %cst_95 {dimension_numbers = #tpu.dot_dimension_numbers<[1], [0], [0], [1], [0, 0, 1, 1], [], []>} : vector<1x32xf32>, vector<32x192xf32>, vector<1x192xf32> -> vector<1x192xf32>
    %117 = vector.broadcast %114 : vector<1x192xf32> to vector<12x192xf32>
    %118 = arith.mulf %89, %117 : vector<12x192xf32>
    %119 = vector.broadcast %116 : vector<1x192xf32> to vector<12x192xf32>
    %120 = arith.addf %118, %119 : vector<12x192xf32>
    %cst_96 = arith.constant 0.000000e+00 : f32
    %121 = vector.broadcast %cst_96 : f32 to vector<12x192xf32>
    %122 = arith.maximumf %120, %121 : vector<12x192xf32>
    %123 = arith.truncf %122 : vector<12x192xf32> to vector<12x192xbf16>
    %c0_97 = arith.constant 0 : index
    %c0_98 = arith.constant 0 : index
    %c0_99 = arith.constant 0 : index
    %124 = vector.load %arg14[%c0_97, %c0_98, %c0_99] : memref<3x26x12xbf16, #tpu.memory_space<vmem>>, vector<1x26x12xbf16>
    %125 = vector.shape_cast %124 : vector<1x26x12xbf16> to vector<26x12xbf16>
    %cst_100 = arith.constant dense<0.000000e+00> : vector<26x192xf32>
    %126 = tpu.matmul %125, %123, %cst_100 {dimension_numbers = #tpu.dot_dimension_numbers<[1], [0], [0], [1], [0, 0, 1, 1], [], []>} : vector<26x12xbf16>, vector<12x192xbf16>, vector<26x192xf32> -> vector<26x192xf32>
    %127 = arith.truncf %126 : vector<26x192xf32> to vector<26x192xbf16>
    %c0_101 = arith.constant 0 : index
    %c0_102 = arith.constant 0 : index
    %c0_103 = arith.constant 0 : index
    %128 = vector.load %arg15[%c0_101, %c0_102, %c0_103] : memref<3x192x208xbf16, #tpu.memory_space<vmem>>, vector<1x192x208xbf16>
    %129 = vector.shape_cast %128 : vector<1x192x208xbf16> to vector<192x208xbf16>
    %cst_104 = arith.constant dense<0.000000e+00> : vector<26x208xf32>
    %130 = tpu.matmul %127, %129, %cst_104 {dimension_numbers = #tpu.dot_dimension_numbers<[1], [0], [0], [1], [0, 0, 1, 1], [], []>} : vector<26x192xbf16>, vector<192x208xbf16>, vector<26x208xf32> -> vector<26x208xf32>
    %c1_105 = arith.constant 1 : index
    %c0_106 = arith.constant 0 : index
    %c0_107 = arith.constant 0 : index
    %131 = vector.load %arg14[%c1_105, %c0_106, %c0_107] : memref<3x26x12xbf16, #tpu.memory_space<vmem>>, vector<1x26x12xbf16>
    %132 = vector.shape_cast %131 : vector<1x26x12xbf16> to vector<26x12xbf16>
    %cst_108 = arith.constant dense<0.000000e+00> : vector<26x192xf32>
    %133 = tpu.matmul %132, %123, %cst_108 {dimension_numbers = #tpu.dot_dimension_numbers<[1], [0], [0], [1], [0, 0, 1, 1], [], []>} : vector<26x12xbf16>, vector<12x192xbf16>, vector<26x192xf32> -> vector<26x192xf32>
    %134 = arith.truncf %133 : vector<26x192xf32> to vector<26x192xbf16>
    %c1_109 = arith.constant 1 : index
    %c0_110 = arith.constant 0 : index
    %c0_111 = arith.constant 0 : index
    %135 = vector.load %arg15[%c1_109, %c0_110, %c0_111] : memref<3x192x208xbf16, #tpu.memory_space<vmem>>, vector<1x192x208xbf16>
    %136 = vector.shape_cast %135 : vector<1x192x208xbf16> to vector<192x208xbf16>
    %cst_112 = arith.constant dense<0.000000e+00> : vector<26x208xf32>
    %137 = tpu.matmul %134, %136, %cst_112 {dimension_numbers = #tpu.dot_dimension_numbers<[1], [0], [0], [1], [0, 0, 1, 1], [], []>} : vector<26x192xbf16>, vector<192x208xbf16>, vector<26x208xf32> -> vector<26x208xf32>
    %138 = arith.addf %130, %137 : vector<26x208xf32>
    %c2_113 = arith.constant 2 : index
    %c0_114 = arith.constant 0 : index
    %c0_115 = arith.constant 0 : index
    %139 = vector.load %arg14[%c2_113, %c0_114, %c0_115] : memref<3x26x12xbf16, #tpu.memory_space<vmem>>, vector<1x26x12xbf16>
    %140 = vector.shape_cast %139 : vector<1x26x12xbf16> to vector<26x12xbf16>
    %cst_116 = arith.constant dense<0.000000e+00> : vector<26x192xf32>
    %141 = tpu.matmul %140, %123, %cst_116 {dimension_numbers = #tpu.dot_dimension_numbers<[1], [0], [0], [1], [0, 0, 1, 1], [], []>} : vector<26x12xbf16>, vector<12x192xbf16>, vector<26x192xf32> -> vector<26x192xf32>
    %142 = arith.truncf %141 : vector<26x192xf32> to vector<26x192xbf16>
    %c2_117 = arith.constant 2 : index
    %c0_118 = arith.constant 0 : index
    %c0_119 = arith.constant 0 : index
    %143 = vector.load %arg15[%c2_117, %c0_118, %c0_119] : memref<3x192x208xbf16, #tpu.memory_space<vmem>>, vector<1x192x208xbf16>
    %144 = vector.shape_cast %143 : vector<1x192x208xbf16> to vector<192x208xbf16>
    %cst_120 = arith.constant dense<0.000000e+00> : vector<26x208xf32>
    %145 = tpu.matmul %142, %144, %cst_120 {dimension_numbers = #tpu.dot_dimension_numbers<[1], [0], [0], [1], [0, 0, 1, 1], [], []>} : vector<26x192xbf16>, vector<192x208xbf16>, vector<26x208xf32> -> vector<26x208xf32>
    %146 = arith.addf %138, %145 : vector<26x208xf32>
    %cst_121 = arith.constant dense<0.000000e+00> : vector<208xf32>
    %147 = vector.multi_reduction <add>, %146, %cst_121 [0] : vector<26x208xf32> to vector<208xf32>
    %148 = vector.shape_cast %147 : vector<208xf32> to vector<1x208xf32>
    %149 = arith.mulf %146, %146 : vector<26x208xf32>
    %cst_122 = arith.constant dense<0.000000e+00> : vector<208xf32>
    %150 = vector.multi_reduction <add>, %149, %cst_122 [0] : vector<26x208xf32> to vector<208xf32>
    %151 = vector.shape_cast %150 : vector<208xf32> to vector<1x208xf32>
    %c0_123 = arith.constant 0 : index
    %c0_124 = arith.constant 0 : index
    %152 = vector.load %arg16[%c0_123, %c0_124] : memref<208x16xf32, #tpu.memory_space<vmem>>, vector<208x16xf32>
    %cst_125 = arith.constant dense<0.000000e+00> : vector<1x16xf32>
    %153 = tpu.matmul %148, %152, %cst_125 {dimension_numbers = #tpu.dot_dimension_numbers<[1], [0], [0], [1], [0, 0, 1, 1], [], []>} : vector<1x208xf32>, vector<208x16xf32>, vector<1x16xf32> -> vector<1x16xf32>
    %c0_126 = arith.constant 0 : index
    %c0_127 = arith.constant 0 : index
    %154 = vector.load %arg16[%c0_126, %c0_127] : memref<208x16xf32, #tpu.memory_space<vmem>>, vector<208x16xf32>
    %cst_128 = arith.constant dense<0.000000e+00> : vector<1x16xf32>
    %155 = tpu.matmul %151, %154, %cst_128 {dimension_numbers = #tpu.dot_dimension_numbers<[1], [0], [0], [1], [0, 0, 1, 1], [], []>} : vector<1x208xf32>, vector<208x16xf32>, vector<1x16xf32> -> vector<1x16xf32>
    %cst_129 = arith.constant 2.958580e-03 : f32
    %156 = vector.broadcast %cst_129 : f32 to vector<1x16xf32>
    %157 = arith.mulf %153, %156 : vector<1x16xf32>
    %cst_130 = arith.constant 2.958580e-03 : f32
    %158 = vector.broadcast %cst_130 : f32 to vector<1x16xf32>
    %159 = arith.mulf %155, %158 : vector<1x16xf32>
    %160 = arith.mulf %157, %157 : vector<1x16xf32>
    %161 = arith.subf %159, %160 : vector<1x16xf32>
    %c0_131 = arith.constant 0 : index
    %c0_132 = arith.constant 0 : index
    %162 = vector.load %arg18[%c0_131, %c0_132] : memref<1x16xf32, #tpu.memory_space<vmem>>, vector<1x16xf32>
    %cst_133 = arith.constant 9.99999974E-6 : f32
    %163 = vector.broadcast %cst_133 : f32 to vector<1x16xf32>
    %164 = arith.addf %161, %163 : vector<1x16xf32>
    %165 = math.rsqrt %164 : vector<1x16xf32>
    %166 = arith.mulf %162, %165 : vector<1x16xf32>
    %c0_134 = arith.constant 0 : index
    %c0_135 = arith.constant 0 : index
    %167 = vector.load %arg19[%c0_134, %c0_135] : memref<1x16xf32, #tpu.memory_space<vmem>>, vector<1x16xf32>
    %168 = arith.mulf %157, %166 : vector<1x16xf32>
    %169 = arith.subf %167, %168 : vector<1x16xf32>
    %c0_136 = arith.constant 0 : index
    %c0_137 = arith.constant 0 : index
    %170 = vector.load %arg17[%c0_136, %c0_137] : memref<16x208xf32, #tpu.memory_space<vmem>>, vector<16x208xf32>
    %cst_138 = arith.constant dense<0.000000e+00> : vector<1x208xf32>
    %171 = tpu.matmul %166, %170, %cst_138 {dimension_numbers = #tpu.dot_dimension_numbers<[1], [0], [0], [1], [0, 0, 1, 1], [], []>} : vector<1x16xf32>, vector<16x208xf32>, vector<1x208xf32> -> vector<1x208xf32>
    %c0_139 = arith.constant 0 : index
    %c0_140 = arith.constant 0 : index
    %172 = vector.load %arg17[%c0_139, %c0_140] : memref<16x208xf32, #tpu.memory_space<vmem>>, vector<16x208xf32>
    %cst_141 = arith.constant dense<0.000000e+00> : vector<1x208xf32>
    %173 = tpu.matmul %169, %172, %cst_141 {dimension_numbers = #tpu.dot_dimension_numbers<[1], [0], [0], [1], [0, 0, 1, 1], [], []>} : vector<1x16xf32>, vector<16x208xf32>, vector<1x208xf32> -> vector<1x208xf32>
    %174 = vector.broadcast %171 : vector<1x208xf32> to vector<26x208xf32>
    %175 = arith.mulf %146, %174 : vector<26x208xf32>
    %176 = vector.broadcast %173 : vector<1x208xf32> to vector<26x208xf32>
    %177 = arith.addf %175, %176 : vector<26x208xf32>
    %cst_142 = arith.constant 0.000000e+00 : f32
    %178 = vector.broadcast %cst_142 : f32 to vector<26x208xf32>
    %179 = arith.maximumf %177, %178 : vector<26x208xf32>
    %180 = arith.truncf %179 : vector<26x208xf32> to vector<26x208xbf16>
    %c0_143 = arith.constant 0 : index
    %c0_144 = arith.constant 0 : index
    %c0_145 = arith.constant 0 : index
    %181 = vector.load %arg20[%c0_143, %c0_144, %c0_145] : memref<4x56x26xbf16, #tpu.memory_space<vmem>>, vector<1x56x26xbf16>
    %182 = vector.shape_cast %181 : vector<1x56x26xbf16> to vector<56x26xbf16>
    %cst_146 = arith.constant dense<0.000000e+00> : vector<56x208xf32>
    %183 = tpu.matmul %182, %180, %cst_146 {dimension_numbers = #tpu.dot_dimension_numbers<[1], [0], [0], [1], [0, 0, 1, 1], [], []>} : vector<56x26xbf16>, vector<26x208xbf16>, vector<56x208xf32> -> vector<56x208xf32>
    %184 = arith.truncf %183 : vector<56x208xf32> to vector<56x208xbf16>
    %c0_147 = arith.constant 0 : index
    %c0_148 = arith.constant 0 : index
    %c0_149 = arith.constant 0 : index
    %185 = vector.load %arg21[%c0_147, %c0_148, %c0_149] : memref<4x208x128xbf16, #tpu.memory_space<vmem>>, vector<1x208x128xbf16>
    %186 = vector.shape_cast %185 : vector<1x208x128xbf16> to vector<208x128xbf16>
    %cst_150 = arith.constant dense<0.000000e+00> : vector<56x128xf32>
    %187 = tpu.matmul %184, %186, %cst_150 {dimension_numbers = #tpu.dot_dimension_numbers<[1], [0], [0], [1], [0, 0, 1, 1], [], []>} : vector<56x208xbf16>, vector<208x128xbf16>, vector<56x128xf32> -> vector<56x128xf32>
    %c1_151 = arith.constant 1 : index
    %c0_152 = arith.constant 0 : index
    %c0_153 = arith.constant 0 : index
    %188 = vector.load %arg20[%c1_151, %c0_152, %c0_153] : memref<4x56x26xbf16, #tpu.memory_space<vmem>>, vector<1x56x26xbf16>
    %189 = vector.shape_cast %188 : vector<1x56x26xbf16> to vector<56x26xbf16>
    %cst_154 = arith.constant dense<0.000000e+00> : vector<56x208xf32>
    %190 = tpu.matmul %189, %180, %cst_154 {dimension_numbers = #tpu.dot_dimension_numbers<[1], [0], [0], [1], [0, 0, 1, 1], [], []>} : vector<56x26xbf16>, vector<26x208xbf16>, vector<56x208xf32> -> vector<56x208xf32>
    %191 = arith.truncf %190 : vector<56x208xf32> to vector<56x208xbf16>
    %c1_155 = arith.constant 1 : index
    %c0_156 = arith.constant 0 : index
    %c0_157 = arith.constant 0 : index
    %192 = vector.load %arg21[%c1_155, %c0_156, %c0_157] : memref<4x208x128xbf16, #tpu.memory_space<vmem>>, vector<1x208x128xbf16>
    %193 = vector.shape_cast %192 : vector<1x208x128xbf16> to vector<208x128xbf16>
    %cst_158 = arith.constant dense<0.000000e+00> : vector<56x128xf32>
    %194 = tpu.matmul %191, %193, %cst_158 {dimension_numbers = #tpu.dot_dimension_numbers<[1], [0], [0], [1], [0, 0, 1, 1], [], []>} : vector<56x208xbf16>, vector<208x128xbf16>, vector<56x128xf32> -> vector<56x128xf32>
    %195 = arith.addf %187, %194 : vector<56x128xf32>
    %c2_159 = arith.constant 2 : index
    %c0_160 = arith.constant 0 : index
    %c0_161 = arith.constant 0 : index
    %196 = vector.load %arg20[%c2_159, %c0_160, %c0_161] : memref<4x56x26xbf16, #tpu.memory_space<vmem>>, vector<1x56x26xbf16>
    %197 = vector.shape_cast %196 : vector<1x56x26xbf16> to vector<56x26xbf16>
    %cst_162 = arith.constant dense<0.000000e+00> : vector<56x208xf32>
    %198 = tpu.matmul %197, %180, %cst_162 {dimension_numbers = #tpu.dot_dimension_numbers<[1], [0], [0], [1], [0, 0, 1, 1], [], []>} : vector<56x26xbf16>, vector<26x208xbf16>, vector<56x208xf32> -> vector<56x208xf32>
    %199 = arith.truncf %198 : vector<56x208xf32> to vector<56x208xbf16>
    %c2_163 = arith.constant 2 : index
    %c0_164 = arith.constant 0 : index
    %c0_165 = arith.constant 0 : index
    %200 = vector.load %arg21[%c2_163, %c0_164, %c0_165] : memref<4x208x128xbf16, #tpu.memory_space<vmem>>, vector<1x208x128xbf16>
    %201 = vector.shape_cast %200 : vector<1x208x128xbf16> to vector<208x128xbf16>
    %cst_166 = arith.constant dense<0.000000e+00> : vector<56x128xf32>
    %202 = tpu.matmul %199, %201, %cst_166 {dimension_numbers = #tpu.dot_dimension_numbers<[1], [0], [0], [1], [0, 0, 1, 1], [], []>} : vector<56x208xbf16>, vector<208x128xbf16>, vector<56x128xf32> -> vector<56x128xf32>
    %203 = arith.addf %195, %202 : vector<56x128xf32>
    %c3_167 = arith.constant 3 : index
    %c0_168 = arith.constant 0 : index
    %c0_169 = arith.constant 0 : index
    %204 = vector.load %arg20[%c3_167, %c0_168, %c0_169] : memref<4x56x26xbf16, #tpu.memory_space<vmem>>, vector<1x56x26xbf16>
    %205 = vector.shape_cast %204 : vector<1x56x26xbf16> to vector<56x26xbf16>
    %cst_170 = arith.constant dense<0.000000e+00> : vector<56x208xf32>
    %206 = tpu.matmul %205, %180, %cst_170 {dimension_numbers = #tpu.dot_dimension_numbers<[1], [0], [0], [1], [0, 0, 1, 1], [], []>} : vector<56x26xbf16>, vector<26x208xbf16>, vector<56x208xf32> -> vector<56x208xf32>
    %207 = arith.truncf %206 : vector<56x208xf32> to vector<56x208xbf16>
    %c3_171 = arith.constant 3 : index
    %c0_172 = arith.constant 0 : index
    %c0_173 = arith.constant 0 : index
    %208 = vector.load %arg21[%c3_171, %c0_172, %c0_173] : memref<4x208x128xbf16, #tpu.memory_space<vmem>>, vector<1x208x128xbf16>
    %209 = vector.shape_cast %208 : vector<1x208x128xbf16> to vector<208x128xbf16>
    %cst_174 = arith.constant dense<0.000000e+00> : vector<56x128xf32>
    %210 = tpu.matmul %207, %209, %cst_174 {dimension_numbers = #tpu.dot_dimension_numbers<[1], [0], [0], [1], [0, 0, 1, 1], [], []>} : vector<56x208xbf16>, vector<208x128xbf16>, vector<56x128xf32> -> vector<56x128xf32>
    %211 = arith.addf %203, %210 : vector<56x128xf32>
    %c0_175 = arith.constant 0 : index
    %c0_176 = arith.constant 0 : index
    %212 = vector.load %arg22[%c0_175, %c0_176] : memref<1x128xf32, #tpu.memory_space<vmem>>, vector<1x128xf32>
    %213 = vector.broadcast %212 : vector<1x128xf32> to vector<56x128xf32>
    %214 = arith.addf %211, %213 : vector<56x128xf32>
    %215 = math.tanh %214 : vector<56x128xf32>
    %c0_177 = arith.constant 0 : index
    %c0_178 = arith.constant 0 : index
    %216 = vector.load %arg23[%c0_177, %c0_178] : memref<56x128xf32, #tpu.memory_space<vmem>>, vector<56x128xf32>
    tpu.vector_store %arg23[%c0_177, %c0_178], %215 {strides = array<i32>} : memref<56x128xf32, #tpu.memory_space<vmem>>, vector<56x128xf32>,
    return
  }
  func.func @transform_0(%arg0: i32) -> (i32, i32) {
    %c0_i32 = arith.constant 0 : i32
    %c0_i32_0 = arith.constant 0 : i32
    %c0_i32_1 = arith.constant 0 : i32
    return %c0_i32, %c0_i32_0 : i32, i32
  }
  func.func @transform_1(%arg0: i32) -> (i32, i32, i32) {
    %c0_i32 = arith.constant 0 : i32
    %c0_i32_0 = arith.constant 0 : i32
    %c0_i32_1 = arith.constant 0 : i32
    %c0_i32_2 = arith.constant 0 : i32
    return %c0_i32, %c0_i32_0, %c0_i32_1 : i32, i32, i32
  }
  func.func @transform_2(%arg0: i32) -> (i32, i32, i32) {
    %c0_i32 = arith.constant 0 : i32
    %c0_i32_0 = arith.constant 0 : i32
    %c0_i32_1 = arith.constant 0 : i32
    %c0_i32_2 = arith.constant 0 : i32
    return %c0_i32, %c0_i32_0, %c0_i32_1 : i32, i32, i32
  }
  func.func @transform_3(%arg0: i32) -> (i32, i32) {
    %c0_i32 = arith.constant 0 : i32
    %c0_i32_0 = arith.constant 0 : i32
    %c0_i32_1 = arith.constant 0 : i32
    return %c0_i32, %c0_i32_0 : i32, i32
  }
  func.func @transform_4(%arg0: i32) -> (i32, i32) {
    %c0_i32 = arith.constant 0 : i32
    %c0_i32_0 = arith.constant 0 : i32
    %c0_i32_1 = arith.constant 0 : i32
    return %c0_i32, %c0_i32_0 : i32, i32
  }
  func.func @transform_5(%arg0: i32) -> (i32, i32) {
    %c0_i32 = arith.constant 0 : i32
    %c0_i32_0 = arith.constant 0 : i32
    %c0_i32_1 = arith.constant 0 : i32
    return %c0_i32, %c0_i32_0 : i32, i32
  }
  func.func @transform_6(%arg0: i32) -> (i32, i32) {
    %c0_i32 = arith.constant 0 : i32
    %c0_i32_0 = arith.constant 0 : i32
    %c0_i32_1 = arith.constant 0 : i32
    return %c0_i32, %c0_i32_0 : i32, i32
  }
  func.func @transform_7(%arg0: i32) -> (i32, i32, i32) {
    %c0_i32 = arith.constant 0 : i32
    %c0_i32_0 = arith.constant 0 : i32
    %c0_i32_1 = arith.constant 0 : i32
    %c0_i32_2 = arith.constant 0 : i32
    return %c0_i32, %c0_i32_0, %c0_i32_1 : i32, i32, i32
  }
  func.func @transform_8(%arg0: i32) -> (i32, i32, i32) {
    %c0_i32 = arith.constant 0 : i32
    %c0_i32_0 = arith.constant 0 : i32
    %c0_i32_1 = arith.constant 0 : i32
    %c0_i32_2 = arith.constant 0 : i32
    return %c0_i32, %c0_i32_0, %c0_i32_1 : i32, i32, i32
  }
  func.func @transform_9(%arg0: i32) -> (i32, i32) {
    %c0_i32 = arith.constant 0 : i32
    %c0_i32_0 = arith.constant 0 : i32
    %c0_i32_1 = arith.constant 0 : i32
    return %c0_i32, %c0_i32_0 : i32, i32
  }
  func.func @transform_10(%arg0: i32) -> (i32, i32) {
    %c0_i32 = arith.constant 0 : i32
    %c0_i32_0 = arith.constant 0 : i32
    %c0_i32_1 = arith.constant 0 : i32
    return %c0_i32, %c0_i32_0 : i32, i32
  }
  func.func @transform_11(%arg0: i32) -> (i32, i32) {
    %c0_i32 = arith.constant 0 : i32
    %c0_i32_0 = arith.constant 0 : i32
    %c0_i32_1 = arith.constant 0 : i32
    return %c0_i32, %c0_i32_0 : i32, i32
  }
  func.func @transform_12(%arg0: i32) -> (i32, i32) {
    %c0_i32 = arith.constant 0 : i32
    %c0_i32_0 = arith.constant 0 : i32
    %c0_i32_1 = arith.constant 0 : i32
    return %c0_i32, %c0_i32_0 : i32, i32
  }
  func.func @transform_13(%arg0: i32) -> (i32, i32, i32) {
    %c0_i32 = arith.constant 0 : i32
    %c0_i32_0 = arith.constant 0 : i32
    %c0_i32_1 = arith.constant 0 : i32
    %c0_i32_2 = arith.constant 0 : i32
    return %c0_i32, %c0_i32_0, %c0_i32_1 : i32, i32, i32
  }
  func.func @transform_14(%arg0: i32) -> (i32, i32, i32) {
    %c0_i32 = arith.constant 0 : i32
    %c0_i32_0 = arith.constant 0 : i32
    %c0_i32_1 = arith.constant 0 : i32
    %c0_i32_2 = arith.constant 0 : i32
    return %c0_i32, %c0_i32_0, %c0_i32_1 : i32, i32, i32
  }
  func.func @transform_15(%arg0: i32) -> (i32, i32) {
    %c0_i32 = arith.constant 0 : i32
    %c0_i32_0 = arith.constant 0 : i32
    %c0_i32_1 = arith.constant 0 : i32
    return %c0_i32, %c0_i32_0 : i32, i32
  }
  func.func @transform_16(%arg0: i32) -> (i32, i32) {
    %c0_i32 = arith.constant 0 : i32
    %c0_i32_0 = arith.constant 0 : i32
    %c0_i32_1 = arith.constant 0 : i32
    return %c0_i32, %c0_i32_0 : i32, i32
  }
  func.func @transform_17(%arg0: i32) -> (i32, i32) {
    %c0_i32 = arith.constant 0 : i32
    %c0_i32_0 = arith.constant 0 : i32
    %c0_i32_1 = arith.constant 0 : i32
    return %c0_i32, %c0_i32_0 : i32, i32
  }
  func.func @transform_18(%arg0: i32) -> (i32, i32) {
    %c0_i32 = arith.constant 0 : i32
    %c0_i32_0 = arith.constant 0 : i32
    %c0_i32_1 = arith.constant 0 : i32
    return %c0_i32, %c0_i32_0 : i32, i32
  }
  func.func @transform_19(%arg0: i32) -> (i32, i32, i32) {
    %c0_i32 = arith.constant 0 : i32
    %c0_i32_0 = arith.constant 0 : i32
    %c0_i32_1 = arith.constant 0 : i32
    %c0_i32_2 = arith.constant 0 : i32
    return %c0_i32, %c0_i32_0, %c0_i32_1 : i32, i32, i32
  }
  func.func @transform_20(%arg0: i32) -> (i32, i32, i32) {
    %c0_i32 = arith.constant 0 : i32
    %c0_i32_0 = arith.constant 0 : i32
    %c0_i32_1 = arith.constant 0 : i32
    %c0_i32_2 = arith.constant 0 : i32
    return %c0_i32, %c0_i32_0, %c0_i32_1 : i32, i32, i32
  }
  func.func @transform_21(%arg0: i32) -> (i32, i32) {
    %c0_i32 = arith.constant 0 : i32
    %c0_i32_0 = arith.constant 0 : i32
    %c0_i32_1 = arith.constant 0 : i32
    return %c0_i32, %c0_i32_0 : i32, i32
  }
  func.func @transform_22(%arg0: i32) -> (i32, i32) {
    %c0_i32 = arith.constant 0 : i32
    %c0_i32_0 = arith.constant 0 : i32
    %c0_i32_1 = arith.constant 0 : i32
    return %c0_i32, %c0_i32_0 : i32, i32
  }
}

</mosaic_0001>

<bundles_post_ra>
// kernel: tpu_custom_call.1
= control target key start
LH: loop header
LB: loop body
LE: loop exit
PB: predicated region body
PF: predicated region fallthrough
CT: control target
= control target key end

     0   :  { %s6994_s0 = inlined_call_operand.vmem [shape: f32[2,10], index: 0, kind: input, shape index: {}]   ;;  %s6995_s1 = inlined_call_operand.vmem [shape: bf16[3,6,2], index: 1, kind: input, shape index: {}]   ;;  %s6996_s2 = inlined_call_operand.vmem [shape: bf16[3,10,192], index: 2, kind: input, shape index: {}]   ;;  %s6997_s3 = inlined_call_operand.vmem [shape: f32[192,64], index: 3, kind: input, shape index: {}]   ;;  %s6998_s4 = inlined_call_operand.vmem [shape: f32[64,192], index: 4, kind: input, shape index: {}]   ;;  %s6999_s5 = inlined_call_operand.vmem [shape: f32[1,64], index: 5, kind: input, shape index: {}]   ;;  %s7000_s6 = inlined_call_operand.vmem [shape: f32[1,64], index: 6, kind: input, shape index: {}]   ;;  %s7001_s7 = inlined_call_operand.vmem [shape: bf16[4,12,6], index: 7, kind: input, shape index: {}]   ;;  %s7002_s8 = inlined_call_operand.hbm [shape: bf16[4,192,192], index: 8, kind: input, shape index: {}]   ;;  %s7003_s9 = inlined_call_operand.vmem [shape: f32[192,32], index: 9, kind: input, shape index: {}]   ;;  %s7004_s10 = inlined_call_operand.vmem [shape: f32[32,192], index: 10, kind: input, shape index: {}]   ;;  %s7005_s11 = inlined_call_operand.vmem [shape: f32[1,32], index: 11, kind: input, shape index: {}]   ;;  %s7006_s12 = inlined_call_operand.vmem [shape: f32[1,32], index: 12, kind: input, shape index: {}]   ;;  %s7007_s13 = inlined_call_operand.vmem [shape: bf16[3,26,12], index: 13, kind: input, shape index: {}]   ;;  %s7008_s14 = inlined_call_operand.hbm [shape: bf16[3,192,208], index: 14, kind: input, shape index: {}]   ;;  %s7009_s15 = inlined_call_operand.vmem [shape: f32[208,16], index: 15, kind: input, shape index: {}]   ;;  %s7010_s16 = inlined_call_operand.vmem [shape: f32[16,208], index: 16, kind: input, shape index: {}]   ;;  %s7011_s17 = inlined_call_operand.vmem [shape: f32[1,16], index: 17, kind: input, shape index: {}]   ;;  %s7012_s18 = inlined_call_operand.vmem [shape: f32[1,16], index: 18, kind: input, shape index: {}]   ;;  %s7013_s19 = inlined_call_operand.vmem [shape: bf16[4,56,26], index: 19, kind: input, shape index: {}]   ;;  %s7014_s20 = inlined_call_operand.vmem [shape: bf16[4,208,128], index: 20, kind: input, shape index: {}]   ;;  %s7015_s21 = inlined_call_operand.vmem [shape: f32[1,128], index: 21, kind: input, shape index: {}]   ;;  %s7016_s22 = inlined_call_operand.hbm [shape: f32[56,128], index: 22, kind: output, shape index: {}]  }
   0x1   :  { %7021 = sst [smem:[#allocation11_spill]] %s6994_s0 }
   0x2   :  { %7022 = sst [smem:[#allocation12_spill]] %s6995_s1 }
   0x3   :  { %7023 = sst [smem:[#allocation13_spill]] %s6996_s2 }
   0x4   :  { %7024 = sst [smem:[#allocation14_spill]] %s6997_s3 }
   0x5   :  { %7025 = sst [smem:[#allocation15_spill]] %s6998_s4 }
   0x6   :  { %7026 = sst [smem:[#allocation16_spill]] %s6999_s5 }
   0x7   :  { %7027 = sst [smem:[#allocation17_spill]] %s7000_s6 }
   0x8   :  { %27 = vsyncpa [#allocation3], 0 }
   0x9   :  { %28 = vsyncpa [#allocation6], 0 }
   0xa   :  { %29 = vsyncpa [#allocation4], 0  ;;  %s50_s29 = sshll.u32 %s7002_s8, 4  ;;  %s5800_s30 = smov [#allocation2]   ;;  %s51_s29 = int_to_ptr.hbm [resolvable:$true] %s50_s29 }
   0xb   :  { %s52_s4 = sshll.u32 %s5800_s30, 4  ;;  %s73_s1 = sshll.u32 %s7008_s14, 4  ;;  %s53_s4 = int_to_ptr.vmem [resolvable:$true] %s52_s4  ;;  %s74_s1 = int_to_ptr.hbm [resolvable:$true] %s73_s1 }
   0xc   :  { %s5801_s5 = smov 128   ;;  %s5802_s24 = smov 8  }
   0xd   :  { %58 = dma.hbm_to_vmem [thread:$0]  %s51_s29, 12288, %s53_s4, [#allocation3], %s5801_s5, %s5801_s5, %s5802_s24  }
   0xe   :  { %s5803_s6 = smov [#allocation5]  }
   0xf   :  { %s75_s25 = sshll.u32 %s5803_s6, 4  ;;  %s76_s25 = int_to_ptr.vmem [resolvable:$true] %s75_s25 }
  0x10   :  { %81 = dma.hbm_to_vmem [thread:$0]  %s74_s1, 9216, %s76_s25, [#allocation6], %s5801_s5, %s5801_s5, %s5802_s24  }
  0x11   :  { %5794 = dma.done.wait [#allocation3], 12288  }
  0x12   :  { %5795 = vsyncadd [#allocation3], 4294955008 }
  0x13   :  { %5796 = dma.done.wait [#allocation6], 9216  }
  0x14   :  { %5797 = vsyncadd [#allocation6], 4294958080  ;;  %s7028_s26 = sld [smem:[#allocation11_spill]]  ;;  %vm112_vm0 = vcmask 1040384   ;;  %vm108_vm1 = vcmask 15360   ;;  %vm166_vm2 = vcmask 1044480  }
  0x15   :  { %s7029_s3 = sld [smem:[#allocation12_spill]]  ;;  %vm162_vm3 = vcmask 80896   ;;  %vm317_vm4 = vcmask 521216   ;;  %vm309_vm5 = vcmask 1045504   ;;  %vm365_vm6 = vcmask 523264  }
  0x16   :  { %s7030_s0 = sld [smem:[#allocation13_spill]]  ;;  %vm597_vm10 = vcmask 1042432   ;;  %vm593_vm11 = vcmask 48128   ;;  %vm1580_vm12 = vcmask 1043456   ;;  %vm1590_vm13 = vcmask 519168  }
  0x17   :  { %s7031_s4 = sld [smem:[#allocation14_spill]] }
  0x18   :  { %s7032_s8 = sld [smem:[#allocation15_spill]] }
  0x19   :  { %s7033_s27 = sld [smem:[#allocation16_spill]] }
  0x1a   :  { %v105_v0 = vld [vmem:[%s7028_s26] sm:$0x3] }
  0x1b   :  { %v106_v1 = vpack.c.bf16 %v105_v0, %v105_v0  ;;  %v4223_v3 = vld [vmem:[%s7029_s3 + $0x4] sm:$0x7]  ;;  %v107_v4 = vld [vmem:[%s7029_s3] sm:$0x7]  ;;  %v4247_v27 = vld [vmem:[%s7029_s3 + $0x8] sm:$0x7] }
  0x1c   :  { %v4229_v5 = vld [vmem:[%s7030_s0 + $0x10] sm:$0xf]  ;;  %v5451_v6 = vld [vmem:[%s7030_s0 + $0x14] sm:$0x10]  ;;  %v5450_v7 = vld [vmem:[%s7030_s0 + $0x14] sm:$0xf] }
  0x1d   :  { %v114_v2 = vsel %vm112_vm0, %v106_v1, 0  ;;  %v4230_v8 = vor.u32 %v5451_v6, %v4229_v5  ;;  %v4231_v9 = vld [vmem:[%s7030_s0 + $0x18] sm:$0x10]  ;;  %v4239_v13 = vld [vmem:[%s7030_s0] sm:$0xf]  ;;  %v355_v37 = vld [vmem:[%s7031_s4 + $0x70] sm:$0xff] }
  0x1e   :  { %144 = vmatpush.bf16.msra.mxu1 %v114_v2  ;;  %123 = vmatpush.bf16.msra.mxu0 %v114_v2  ;;  %v4234_v10 = vor.u32 %v5450_v7, %v4231_v9  ;;  %v5449_v14 = vld [vmem:[%s7030_s0 + $0x4] sm:$0x10]  ;;  %v5448_v15 = vld [vmem:[%s7030_s0 + $0x4] sm:$0xf]  ;;  %v4241_v17 = vld [vmem:[%s7030_s0 + $0x8] sm:$0x10] }
  0x1f   :  { %v168_v11 = vsel %vm166_vm2, %v4230_v8, 0  ;;  %v4240_v16 = vor.u32 %v5449_v14, %v4239_v13  ;;  %v4244_v18 = vor.u32 %v5448_v15, %v4241_v17  ;;  %v4253_v28 = vld [vmem:[%s7030_s0 + $0x20] sm:$0xf]  ;;  %v5453_v29 = vld [vmem:[%s7030_s0 + $0x24] sm:$0x10]  ;;  %v356_v36 = vld [vmem:[%s7031_s4 + $0x78] sm:$0xff] }
  0x20   :  { %180 = vmatpush.bf16.msra.mxu2 %v168_v11  ;;  %v171_v12 = vsel %vm166_vm2, %v4234_v10, 0  ;;  %v5452_v30 = vld [vmem:[%s7030_s0 + $0x24] sm:$0xf]  ;;  %v4254_v31 = vor.u32 %v5453_v29, %v4253_v28  ;;  %v4255_v32 = vld [vmem:[%s7030_s0 + $0x28] sm:$0x10]  ;;  %v352_v42 = vld [vmem:[%s7031_s4 + $0x58] sm:$0xff] }
  0x21   :  { %4224 = vmatmul.msk.bf16.vlgmr.msra.gmra.mxu1 %vm108_vm1, %v4223_v3  ;;  %4222 = vmatmul.msk.bf16.vlgmr.msra.gmra.mxu0 %vm108_vm1, %v107_v4  ;;  %v211_v19 = vsel %vm166_vm2, %v4240_v16, 0  ;;  %v214_v20 = vsel %vm166_vm2, %v4244_v18, 0  ;;  %v4258_v33 = vor.u32 %v5452_v30, %v4255_v32  ;;  %v354_v38 = vld [vmem:[%s7031_s4 + $0x68] sm:$0xff]  ;;  %v353_v41 = vld [vmem:[%s7031_s4 + $0x60] sm:$0xff]  ;;  %v351_v52 = vld [vmem:[%s7031_s4 + $0x50] sm:$0xff]  ;;  %s7034_s3 = sld [smem:[#allocation17_spill]] }
  0x22   :  { %193 = vmatpush.bf16.msra.mxu3 %v171_v12  ;;  %223 = vmatpush.bf16.msrb.mxu0 %v211_v19  ;;  %v276_v34 = vsel %vm166_vm2, %v4254_v31, 0  ;;  %v364_v53 = vld [vmem:[%s7031_s4 + $0xb8] sm:$0xff]  ;;  %v350_v54 = vld [vmem:[%s7031_s4 + $0x48] sm:$0xff]  ;;  %v363_v55 = vld [vmem:[%s7031_s4 + $0xb0] sm:$0xff] }
  0x23   :  { %236 = vmatpush.bf16.msrb.mxu1 %v214_v20  ;;  %v279_v35 = vsel %vm166_vm2, %v4258_v33, 0  ;;  %v349_v56 = vld [vmem:[%s7031_s4 + $0x40] sm:$0xff]  ;;  %v362_v57 = vld [vmem:[%s7031_s4 + $0xa8] sm:$0xff]  ;;  %v348_v58 = vld [vmem:[%s7031_s4 + $0x38] sm:$0xff] }
  0x24   :  { %254 = vmatpush.bf16.msrb.mxu2 %v114_v2  ;;  %v361_v59 = vld [vmem:[%s7031_s4 + $0xa0] sm:$0xff]  ;;  %v347_v60 = vld [vmem:[%s7031_s4 + $0x30] sm:$0xff]  ;;  %v360_v61 = vld [vmem:[%s7031_s4 + $0x98] sm:$0xff] }
  0x25   :  { %v346_v62 = vld [vmem:[%s7031_s4 + $0x28] sm:$0xff]  ;;  %v359_v63 = vld [vmem:[%s7031_s4 + $0x90] sm:$0xff]  ;;  %v345_v0 = vld [vmem:[%s7031_s4 + $0x20] sm:$0xff] }
  0x26   :  { %288 = vmatpush.bf16.msrb.mxu3 %v276_v34  ;;  %301 = vmatpush.bf16.msra.mxu0 %v279_v35  ;;  %v358_v1 = vld [vmem:[%s7031_s4 + $0x88] sm:$0xff]  ;;  %v344_v2 = vld [vmem:[%s7031_s4 + $0x18] sm:$0xff]  ;;  %v357_v3 = vld [vmem:[%s7031_s4 + $0x80] sm:$0xff] }
  0x27   :  { %369 = vmatpush.msra.mxu1 %v356_v36  ;;  %v343_v4 = vld [vmem:[%s7031_s4 + $0x10] sm:$0xff]  ;;  %v342_v5 = vld [vmem:[%s7031_s4 + $0x8] sm:$0xff]  ;;  %v341_v6 = vld [vmem:[%s7031_s4] sm:$0xff] }
  0x29   :  { %370 = vmatpush.msra.mxu1 %v355_v37 }
  0x2b   :  { %371 = vmatpush.msra.mxu1 %v354_v38 }
  0x2d   :  { %372 = vmatpush.msra.mxu1 %v353_v41 }
  0x2f   :  { %373 = vmatpush.msra.mxu1 %v352_v42 }
  0x31   :  { %374 = vmatpush.msra.mxu1 %v351_v52 }
  0x33   :  { %375 = vmatpush.msra.mxu1 %v350_v54 }
  0x35   :  { %376 = vmatpush.msra.mxu1 %v349_v56 }
  0x37   :  { %377 = vmatpush.msra.mxu1 %v348_v58 }
  0x39   :  { %378 = vmatpush.msra.mxu1 %v347_v60 }
  0x3b   :  { %379 = vmatpush.msra.mxu1 %v346_v62 }
  0x3d   :  { %380 = vmatpush.msra.mxu1 %v345_v0 }
  0x3f   :  { %381 = vmatpush.msra.mxu1 %v344_v2 }
  0x41   :  { %382 = vmatpush.msra.mxu1 %v343_v4 }
  0x43   :  { %383 = vmatpush.msra.mxu1 %v342_v5 }
  0x45   :  { %384 = vmatpush.msra.mxu1 %v341_v6 }
  0x9e   :  { %v146_v21 = vpop.f32.mrf.mxu1  ;;  %v125_v22 = vpop.f32.mrf.mxu0 }
  0x9f   :  { %v150_v23 = vpack.c.bf16 %v146_v21, %v146_v21  ;;  %v129_v24 = vpack.c.bf16 %v125_v22, %v125_v22 }
  0xa1   :  { %4235 = vmatmul.msk.bf16.vlgmr.msra.gmra.mxu2 %vm162_vm3, %v150_v23  ;;  %4236 = vmatmul.msk.bf16.vlgmr.msra.gmra.mxu3 %vm162_vm3, %v150_v23 }
  0xa2   :  { %4245 = vmatmul.msk.bf16.vlgmr.msrb.gmra.mxu0 %vm162_vm3, %v129_v24  ;;  %4246 = vmatmul.msk.bf16.vlgmr.msrb.gmra.mxu1 %vm162_vm3, %v129_v24 }
  0xa3   :  { %412 = vmatpush.msra.mxu3 %v356_v36  ;;  %397 = vmatpush.msra.mxu2 %v364_v53 }
  0xa4   :  { %440 = vmatpush.msrb.mxu0 %v364_v53  ;;  %v483_v53 = vld [vmem:[%s7032_s8 + $0x58] sm:$0xff] }
  0xa5   :  { %413 = vmatpush.msra.mxu3 %v355_v37  ;;  %398 = vmatpush.msra.mxu2 %v363_v55 }
  0xa6   :  { %v148_v25 = vpop.f32.mrf.mxu1  ;;  %v127_v26 = vpop.f32.mrf.mxu0  ;;  %441 = vmatpush.msrb.mxu0 %v363_v55  ;;  %v481_v55 = vld [vmem:[%s7032_s8 + $0x48] sm:$0xff] }
  0xa7   :  { %414 = vmatpush.msra.mxu3 %v354_v38  ;;  %399 = vmatpush.msra.mxu2 %v362_v57 }
  0xa8   :  { %442 = vmatpush.msrb.mxu0 %v362_v57  ;;  %v479_v57 = vld [vmem:[%s7032_s8 + $0x38] sm:$0xff] }
  0xa9   :  { %415 = vmatpush.msra.mxu3 %v353_v41  ;;  %400 = vmatpush.msra.mxu2 %v361_v59 }
  0xaa   :  { %443 = vmatpush.msrb.mxu0 %v361_v59 }
  0xab   :  { %416 = vmatpush.msra.mxu3 %v352_v42  ;;  %401 = vmatpush.msra.mxu2 %v360_v61 }
  0xac   :  { %444 = vmatpush.msrb.mxu0 %v360_v61  ;;  %v475_v61 = vld [vmem:[%s7032_s8 + $0x18] sm:$0xff] }
  0xad   :  { %417 = vmatpush.msra.mxu3 %v351_v52  ;;  %402 = vmatpush.msra.mxu2 %v359_v63  ;;  %v476_v52 = vld [vmem:[%s7032_s8 + $0x20] sm:$0xff] }
  0xae   :  { %445 = vmatpush.msrb.mxu0 %v359_v63 }
  0xaf   :  { %418 = vmatpush.msra.mxu3 %v350_v54  ;;  %403 = vmatpush.msra.mxu2 %v358_v1  ;;  %v474_v54 = vld [vmem:[%s7032_s8 + $0x10] sm:$0xff] }
  0xb0   :  { %446 = vmatpush.msrb.mxu0 %v358_v1 }
  0xb1   :  { %4248 = vmatmul.msk.bf16.vlgmr.msrb.gmra.mxu2 %vm108_vm1, %v4247_v27  ;;  %419 = vmatpush.msra.mxu3 %v349_v56  ;;  %v472_v56 = vld [vmem:[%s7032_s8] sm:$0xff]  ;;  %vm1758_vm1 = vcmask 261120  }
  0xb2   :  { %404 = vmatpush.msra.mxu2 %v357_v3  ;;  %447 = vmatpush.msrb.mxu0 %v357_v3 }
  0xb3   :  { %420 = vmatpush.msra.mxu3 %v348_v58  ;;  %v477_v58 = vld [vmem:[%s7032_s8 + $0x28] sm:$0xff] }
  0xb5   :  { %421 = vmatpush.msra.mxu3 %v347_v60 }
  0xb7   :  { %422 = vmatpush.msra.mxu3 %v346_v62  ;;  %v473_v62 = vld [vmem:[%s7032_s8 + $0x8] sm:$0xff] }
  0xb9   :  { %423 = vmatpush.msra.mxu3 %v345_v0 }
  0xbb   :  { %424 = vmatpush.msra.mxu3 %v344_v2 }
  0xbd   :  { %425 = vmatpush.msra.mxu3 %v343_v4 }
  0xbf   :  { %426 = vmatpush.msra.mxu3 %v342_v5 }
  0xc1   :  { %427 = vmatpush.msra.mxu3 %v341_v6 }
 0x11f   :  { %v6002_v39 = vpop.f32.mrf.mxu0  ;;  %v6004_v40 = vpop.f32.mrf.mxu1 }
 0x124   :  { %v6012_v43 = vpop.f32.mrf.mxu2  ;;  %v6014_v44 = vpop.f32.mrf.mxu3 }
 0x125   :  { %v239_v7 = vadd.f32 %v6004_v40, %v6014_v44  ;;  %v226_v13 = vadd.f32 %v6002_v39, %v6012_v43 }
 0x127   :  { %v227_v45 = vpop.f32.mrf.mxu0  ;;  %v240_v46 = vpop.f32.mrf.mxu1 }
 0x128   :  { %v486_v45 = vld [vmem:[%s7032_s8 + $0x70] sm:$0xff]  ;;  %v484_v46 = vld [vmem:[%s7032_s8 + $0x60] sm:$0xff] }
 0x129   :  { %499 = vmatpush.msrb.mxu2 %v486_v45  ;;  %542 = vmatpush.msrb.mxu1 %v486_v45 }
 0x12b   :  { %500 = vmatpush.msrb.mxu2 %v484_v46  ;;  %543 = vmatpush.msrb.mxu1 %v484_v46  ;;  %v5493_v46 = vld [vmem:[#allocation2 + $0x124] sm:$0xf0] }
 0x12c   :  { %v184_v47 = vpop.f32.mrf.mxu2  ;;  %v197_v48 = vpop.f32.mrf.mxu3 }
 0x12d   :  { %v482_v47 = vld [vmem:[%s7032_s8 + $0x50] sm:$0xff]  ;;  %v480_v48 = vld [vmem:[%s7032_s8 + $0x40] sm:$0xff] }
 0x12e   :  { %501 = vmatpush.msrb.mxu2 %v482_v47  ;;  %544 = vmatpush.msrb.mxu1 %v482_v47  ;;  %v5492_v47 = vld [vmem:[#allocation2 + $0x124] sm:$0xf] }
 0x130   :  { %502 = vmatpush.msrb.mxu2 %v480_v48  ;;  %545 = vmatpush.msrb.mxu1 %v480_v48  ;;  %v4333_v48 = vld [vmem:[#allocation2 + $0x128] sm:$0xf0] }
 0x134   :  { %v256_v49 = vpop.f32.mrf.mxu2 }
 0x135   :  { %v260_v50 = vpack.c.bf16 %v256_v49, %v256_v49  ;;  %v487_v49 = vld [vmem:[%s7032_s8 + $0x78] sm:$0xff] }
 0x137   :  { %4259 = vmatmul.msk.bf16.vlgmr.msrb.gmra.mxu3 %vm162_vm3, %v260_v50  ;;  %4260 = vmatmul.msk.bf16.vlgmr.msra.gmra.mxu0 %vm162_vm3, %v260_v50  ;;  %v478_v50 = vld [vmem:[%s7032_s8 + $0x30] sm:$0xff]  ;;  %vm1877_vm3 = vcmask 97280  }
 0x138   :  { %519 = vmatpush.msra.mxu0 %v487_v49  ;;  %503 = vmatpush.msrb.mxu2 %v478_v50 }
 0x139   :  { %546 = vmatpush.msrb.mxu1 %v478_v50 }
 0x13a   :  { %504 = vmatpush.msrb.mxu2 %v476_v52 }
 0x13b   :  { %547 = vmatpush.msrb.mxu1 %v476_v52  ;;  %v4371_v52 = vld [vmem:[#allocation2 + $0x170] sm:$0xf] }
 0x13c   :  { %v258_v51 = vpop.f32.mrf.mxu2  ;;  %505 = vmatpush.msrb.mxu2 %v474_v54 }
 0x13d   :  { %v485_v51 = vld [vmem:[%s7032_s8 + $0x68] sm:$0xff]  ;;  %548 = vmatpush.msrb.mxu1 %v474_v54  ;;  %v4373_v54 = vld [vmem:[#allocation2 + $0x178] sm:$0xf0] }
 0x13e   :  { %520 = vmatpush.msra.mxu0 %v485_v51  ;;  %506 = vmatpush.msrb.mxu2 %v472_v56 }
 0x13f   :  { %549 = vmatpush.msrb.mxu1 %v472_v56 }
 0x140   :  { %521 = vmatpush.msra.mxu0 %v483_v53 }
 0x142   :  { %522 = vmatpush.msra.mxu0 %v481_v55 }
 0x144   :  { %523 = vmatpush.msra.mxu0 %v479_v57 }
 0x146   :  { %524 = vmatpush.msra.mxu0 %v477_v58 }
 0x148   :  { %525 = vmatpush.msra.mxu0 %v475_v61 }
 0x14a   :  { %526 = vmatpush.msra.mxu0 %v473_v62 }
 0x1b4   :  { %v303_v8 = vpop.f32.mrf.mxu0 }
 0x1b5   :  { %v6077_v9 = vadd.f32 %v303_v8, %v239_v7 }
 0x1b7   :  { %v318_v10 = vsel %vm317_vm4, %v6077_v9, 0.0  ;;  %v326_v11 = vmul.f32 %v6077_v9, %v6077_v9 }
 0x1b8   :  { %v319_v12 = vrot.slane %v318_v10, 4 }
 0x1b9   :  { %v334_v14 = vsel %vm317_vm4, %v326_v11, 0.0  ;;  %vm2748_vm4 = vcmask 1041408  }
 0x1ba   :  { %v320_v15 = vadd.f32 %v319_v12, %v318_v10  ;;  %v335_v16 = vrot.slane %v334_v14, 4  ;;  %v290_v17 = vpop.f32.mrf.mxu3 }
 0x1bb   :  { %v6084_v18 = vadd.f32 %v290_v17, %v226_v13 }
 0x1bc   :  { %v321_v19 = vrot.slane %v320_v15, 2  ;;  %v336_v20 = vadd.f32 %v335_v16, %v334_v14  ;;  %v305_v21 = vpop.f32.mrf.mxu0 }
 0x1bd   :  { %v310_v22 = vsel %vm309_vm5, %v6084_v18, 0.0  ;;  %v325_v23 = vmul.f32 %v6084_v18, %v6084_v18 }
 0x1be   :  { %v322_v24 = vadd.f32 %v321_v19, %v320_v15  ;;  %v337_v25 = vrot.slane %v336_v20, 2  ;;  %v311_v26 = vrot.slane %v310_v22, 4  ;;  %v456_v15 = vld [vmem:[%s7033_s27] sm:$0x1] }
 0x1bf   :  { %v327_v27 = vsel %vm309_vm5, %v325_v23, 0.0  ;;  %v469_v19 = vld [vmem:[%s7034_s3] sm:$0x1] }
 0x1c0   :  { %v323_v28 = vrot.slane %v322_v24, 1  ;;  %v338_v29 = vadd.f32 %v337_v25, %v336_v20  ;;  %v312_v30 = vadd.f32 %v311_v26, %v310_v22  ;;  %v328_v31 = vrot.slane %v327_v27, 4 }
 0x1c2   :  { %v324_v32 = vadd.f32 %v323_v28, %v322_v24  ;;  %v339_v33 = vrot.slane %v338_v29, 1  ;;  %v313_v34 = vrot.slane %v312_v30, 2  ;;  %v329_v35 = vadd.f32 %v328_v31, %v327_v27  ;;  %v292_v36 = vpop.f32.mrf.mxu3  ;;  %v5495_v31 = vld [vmem:[#allocation2 + $0x134] sm:$0xf0] }
 0x1c3   :  { %v5479_v36 = vld [vmem:[%s7001_s7 + $0x8] sm:$0x30] }
 0x1c4   :  { %v314_v37 = vadd.f32 %v313_v34, %v312_v30  ;;  %v330_v38 = vrot.slane %v329_v35, 2  ;;  %4261 = vmatmul.msk.f32.vlgmr.msra.gmra.mxu2 %vm365_vm6, %v324_v32  ;;  %v340_v39 = vadd.f32 %v339_v33, %v338_v29  ;;  %v4339_v30 = vld [vmem:[#allocation2 + $0x130] sm:$0xf]  ;;  %v5494_v32 = vld [vmem:[#allocation2 + $0x134] sm:$0xf] }
 0x1c5   :  { %562 = vmatpush.msra.mxu2 %v487_v49  ;;  %v4341_v33 = vld [vmem:[#allocation2 + $0x138] sm:$0xf0] }
 0x1c6   :  { %4262 = vmatmul.msk.f32.vlgmr.msrb.gmra.mxu0 %vm365_vm6, %v340_v39  ;;  %v315_v40 = vrot.slane %v314_v37, 1  ;;  %v331_v41 = vadd.f32 %v330_v38, %v329_v35  ;;  %v4277_v35 = vld [vmem:[%s7001_s7 + $0x8] sm:$0xf]  ;;  %v5454_v38 = vld [vmem:[%s7001_s7] sm:$0x30]  ;;  %v4340_v39 = vor.u32 %v5495_v31, %v4339_v30 }
 0x1c7   :  { %563 = vmatpush.msra.mxu2 %v485_v51  ;;  %v4278_v45 = vor.u32 %v5479_v36, %v4277_v35  ;;  %v5483_v30 = vld [vmem:[#allocation2 + $0xd4] sm:$0xf0]  ;;  %v5469_v35 = vld [vmem:[#allocation2 + $0x74] sm:$0xf]  ;;  %v4439_v36 = vld [vmem:[#allocation2 + $0x78] sm:$0xf0] }
 0x1c8   :  { %v316_v42 = vadd.f32 %v315_v40, %v314_v37  ;;  %v332_v43 = vrot.slane %v331_v41, 1 }
 0x1c9   :  { %564 = vmatpush.msra.mxu2 %v483_v53  ;;  %v5502_v53 = vld [vmem:[#allocation2 + $0x174] sm:$0xf] }
 0x1ca   :  { %385 = vmatmul.f32.vlgmr.msra.gmra.mxu1 %v316_v42  ;;  %v333_v44 = vadd.f32 %v332_v43, %v331_v41  ;;  %v4331_v43 = vld [vmem:[#allocation2 + $0x120] sm:$0xf] }
 0x1cb   :  { %565 = vmatpush.msra.mxu2 %v481_v55  ;;  %v4332_v56 = vor.u32 %v5493_v46, %v4331_v43  ;;  %v5500_v43 = vld [vmem:[#allocation2 + $0x164] sm:$0xf] }
 0x1cc   :  { %428 = vmatmul.f32.vlgmr.msra.gmra.mxu3 %v333_v44  ;;  %v4344_v44 = vor.u32 %v5494_v32, %v4341_v33  ;;  %v4283_v33 = vld [vmem:[#allocation2 + $0xc0] sm:$0xf] }
 0x1cd   :  { %566 = vmatpush.msra.mxu2 %v479_v57  ;;  %v4336_v57 = vor.u32 %v5492_v47, %v4333_v48  ;;  %v4421_v47 = vld [vmem:[#allocation2 + $0x50] sm:$0xf]  ;;  %v5466_v48 = vld [vmem:[#allocation2 + $0x54] sm:$0xf0] }
 0x1cf   :  { %567 = vmatpush.msra.mxu2 %v477_v58  ;;  %v4323_v58 = vld [vmem:[#allocation2 + $0x110] sm:$0xf] }
 0x1d1   :  { %568 = vmatpush.msra.mxu2 %v475_v61 }
 0x1d3   :  { %569 = vmatpush.msra.mxu2 %v473_v62  ;;  %v5490_v62 = vld [vmem:[#allocation2 + $0x114] sm:$0xf] }
 0x243   :  { %v449_v1 = vpop.f32.mrf.mxu0 }
 0x247   :  { %v386_v59 = vpop.f32.mrf.mxu1  ;;  %v406_v60 = vpop.f32.mrf.mxu2 }
 0x248   :  { %v407_v63 = vadd.f32 %v406_v60, %v386_v59  ;;  %v5491_v60 = vld [vmem:[#allocation2 + $0x114] sm:$0xf0] }
 0x24a   :  { %v452_v0 = vmul.f32 0.055555556, %v407_v63  ;;  %v4325_v63 = vld [vmem:[#allocation2 + $0x118] sm:$0xf0] }
 0x24c   :  { %v454_v4 = vmul.f32 %v452_v0, %v452_v0 }
 0x24f   :  { %v429_v2 = vpop.f32.mrf.mxu3 }
 0x250   :  { %v450_v3 = vadd.f32 %v449_v1, %v429_v2  ;;  %v4363_v1 = vld [vmem:[#allocation2 + $0x160] sm:$0xf]  ;;  %v5501_v2 = vld [vmem:[#allocation2 + $0x164] sm:$0xf0] }
 0x252   :  { %v453_v5 = vmul.f32 0.055555556, %v450_v3 }
 0x254   :  { %v455_v6 = vsub.f32 %v453_v5, %v454_v4  ;;  %v4324_v4 = vor.u32 %v5491_v60, %v4323_v58  ;;  %v4328_v5 = vor.u32 %v5490_v62, %v4325_v63  ;;  %v5464_v60 = vld [vmem:[#allocation2 + $0x44] sm:$0xf0]  ;;  %v5484_v62 = vld [vmem:[#allocation2 + $0xe4] sm:$0xf]  ;;  %v4301_v63 = vld [vmem:[#allocation2 + $0xe8] sm:$0xf0] }
 0x256   :  { %v457_v7 = vadd.f32 1e-05, %v455_v6  ;;  %v4315_v6 = vld [vmem:[#allocation2 + $0x100] sm:$0xf] }
 0x258   :  { %5702 = vrsqrt.f32 %v457_v7  ;;  %vm464_vm8 = vweird.f32 %v457_v7 }
 0x25e   :  { %v5703_v8 = vpop.eup %5702 }
 0x25f   :  { %v459_v10 = vmul.f32 %v5703_v8, %v457_v7  ;;  %vm465_vm7 = vweird.f32 %v5703_v8  ;;  %v5489_v7 = vld [vmem:[#allocation2 + $0x104] sm:$0xf0] }
 0x260   :  { %vm466_vm9 = vmor %vm464_vm8, %vm465_vm7 }
 0x261   :  { %v460_v11 = vmul.f32 %v5703_v8, %v459_v10  ;;  %v4355_v10 = vld [vmem:[#allocation2 + $0x150] sm:$0xf] }
 0x263   :  { %v461_v12 = vmul.f32 0.5, %v460_v11  ;;  %v5499_v11 = vld [vmem:[#allocation2 + $0x154] sm:$0xf0] }
 0x265   :  { %v462_v13 = vsub.f32 1.5, %v461_v12  ;;  %v4316_v12 = vor.u32 %v5489_v7, %v4315_v6 }
 0x267   :  { %v463_v14 = vmul.f32 %v5703_v8, %v462_v13  ;;  %v4307_v13 = vld [vmem:[#allocation2 + $0xf0] sm:$0xf] }
 0x269   :  { %v467_v16 = vsel %vm466_vm9, %v5703_v8, %v463_v14  ;;  %v4364_v8 = vor.u32 %v5501_v2, %v4363_v1  ;;  %v5487_v14 = vld [vmem:[#allocation2 + $0xf4] sm:$0xf0]  ;;  %v4304_v1 = vor.u32 %v5484_v62, %v4301_v63  ;;  %v4415_v2 = vld [vmem:[#allocation2 + $0x48] sm:$0xf0] }
 0x26a   :  { %v468_v17 = vmul.f32 %v467_v16, %v456_v15  ;;  %v4356_v15 = vor.u32 %v5499_v11, %v4355_v10  ;;  %v4347_v16 = vld [vmem:[#allocation2 + $0x140] sm:$0xf]  ;;  %v5462_v10 = vld [vmem:[#allocation2 + $0x34] sm:$0xf0]  ;;  %v4469_v11 = vld [vmem:[#allocation2 + $0xb0] sm:$0xf] }
 0x26c   :  { %4263 = vmatmul.msk.f32.vlgmr.msrb.gmra.mxu2 %vm365_vm6, %v468_v17  ;;  %4264 = vmatmul.msk.f32.vlgmr.msra.gmra.mxu0 %vm365_vm6, %v468_v17  ;;  %v470_v20 = vmul.f32 %v468_v17, %v452_v0  ;;  %v4376_v0 = vor.u32 %v5502_v53, %v4373_v54  ;;  %v5497_v17 = vld [vmem:[#allocation2 + $0x144] sm:$0xf0]  ;;  %v4423_v54 = vld [vmem:[#allocation2 + $0x58] sm:$0xf0] }
 0x26e   :  { %v471_v21 = vsub.f32 %v469_v19, %v470_v20  ;;  %v4437_v19 = vld [vmem:[#allocation2 + $0x70] sm:$0xf]  ;;  %v5470_v20 = vld [vmem:[#allocation2 + $0x74] sm:$0xf0] }
 0x270   :  { %4265 = vmatmul.msk.f32.vlgmr.msrb.gmra.mxu1 %vm365_vm6, %v471_v21 }
 0x274   :  { %4266 = vmatmul.msk.f32.vlgmr.msra.gmra.mxu2 %vm365_vm6, %v471_v21  ;;  %v4308_v21 = vor.u32 %v5487_v14, %v4307_v13  ;;  %v5478_v13 = vld [vmem:[#allocation2 + $0xb4] sm:$0xf0] }
 0x275   :  { %v4470_v14 = vor.u32 %v5478_v13, %v4469_v11  ;;  %v4575_v13 = vld [vmem:[#allocation2 + $0x230] sm:$0xf] }
 0x2e9   :  { %v528_v25 = vpop.f32.mrf.mxu0 }
 0x2ea   :  { %v575_v28 = vperm.slane %v528_v25, 0  ;;  %v4438_v25 = vor.u32 %v5470_v20, %v4437_v19  ;;  %v4407_v20 = vld [vmem:[#allocation2 + $0x38] sm:$0xf0] }
 0x2ec   :  { %v577_v40 = vmul.f32 %v575_v28, %v6077_v9  ;;  %v5503_v9 = vld [vmem:[#allocation2 + $0x174] sm:$0xf0] }
 0x2ed   :  { %v551_v22 = vpop.f32.mrf.mxu1  ;;  %v4372_v61 = vor.u32 %v5503_v9, %v4371_v52  ;;  %v4309_v52 = vld [vmem:[#allocation2 + $0xf8] sm:$0xf0]  ;;  %v5465_v9 = vld [vmem:[#allocation2 + $0x54] sm:$0xf] }
 0x2ee   :  { %v578_v26 = vperm.slane %v551_v22, 0  ;;  %v4299_v22 = vld [vmem:[#allocation2 + $0xe0] sm:$0xf] }
 0x2ef   :  { %v508_v23 = vpop.f32.mrf.mxu2 }
 0x2f0   :  { %v574_v24 = vperm.slane %v508_v23, 0  ;;  %v5485_v23 = vld [vmem:[#allocation2 + $0xe4] sm:$0xf0] }
 0x2f1   :  { %v4300_v28 = vor.u32 %v5485_v23, %v4299_v22  ;;  %v4397_v22 = vld [vmem:[#allocation2 + $0x20] sm:$0xf]  ;;  %v5460_v23 = vld [vmem:[#allocation2 + $0x24] sm:$0xf0] }
 0x2f2   :  { %v576_v27 = vmul.f32 %v574_v24, %v6084_v18  ;;  %v4269_v18 = vld [vmem:[%s7001_s7] sm:$0xf]  ;;  %v4348_v24 = vor.u32 %v5497_v17, %v4347_v16  ;;  %v4293_v16 = vld [vmem:[#allocation2 + $0xd8] sm:$0xf0]  ;;  %v5461_v17 = vld [vmem:[#allocation2 + $0x34] sm:$0xf] }
 0x2f3   :  { %v4270_v51 = vor.u32 %v5454_v38, %v4269_v18  ;;  %v4442_v18 = vor.u32 %v5469_v35, %v4439_v36  ;;  %v5488_v38 = vld [vmem:[#allocation2 + $0x104] sm:$0xf]  ;;  %v5458_v35 = vld [vmem:[#allocation2 + $0x14] sm:$0xf0]  ;;  %v4453_v36 = vld [vmem:[#allocation2 + $0x90] sm:$0xf] }
 0x2f4   :  { %v580_v29 = vadd.f32 %v578_v26, %v576_v27  ;;  %v4429_v26 = vld [vmem:[#allocation2 + $0x60] sm:$0xf]  ;;  %v5468_v27 = vld [vmem:[#allocation2 + $0x64] sm:$0xf0] }
 0x2f5   :  { %v4430_v31 = vor.u32 %v5468_v27, %v4429_v26  ;;  %v5476_v26 = vld [vmem:[#allocation2 + $0xa4] sm:$0xf0]  ;;  %v5480_v27 = vld [vmem:[#allocation2 + $0xc4] sm:$0xf] }
 0x2f6   :  { %v582_v34 = vmax.f32 %v580_v29, 0.0  ;;  %v4291_v29 = vld [vmem:[#allocation2 + $0xd0] sm:$0xf] }
 0x2f7   :  { %v571_v37 = vpop.f32.mrf.mxu2  ;;  %v4292_v32 = vor.u32 %v5483_v30, %v4291_v29 }
 0x2f8   :  { %v579_v41 = vperm.slane %v571_v37, 0  ;;  %v584_v42 = vpack.c.bf16 %v582_v34, %v582_v34  ;;  %v5481_v34 = vld [vmem:[#allocation2 + $0xc4] sm:$0xf0] }
 0x2f9   :  { %v4284_v37 = vor.u32 %v5481_v34, %v4283_v33  ;;  %v4389_v33 = vld [vmem:[#allocation2 + $0x10] sm:$0xf] }
 0x2fa   :  { %v581_v49 = vadd.f32 %v579_v41, %v577_v40  ;;  %v6166_v50 = vsel %vm597_vm10, %v584_v42, 0  ;;  %v5467_v40 = vld [vmem:[#allocation2 + $0x64] sm:$0xf]  ;;  %v4431_v42 = vld [vmem:[#allocation2 + $0x68] sm:$0xf0] }
 0x2fb   :  { %611 = vmatpush.bf16.msrb.mxu3 %v6166_v50  ;;  %676 = vmatpush.bf16.msra.mxu1 %v6166_v50 }
 0x2fc   :  { %v583_v55 = vmax.f32 %v581_v49, 0.0  ;;  %v4422_v49 = vor.u32 %v5466_v48, %v4421_v47  ;;  %v4445_v47 = vld [vmem:[#allocation2 + $0x80] sm:$0xf] }
 0x2fe   :  { %v585_v59 = vpack.c.bf16 %v583_v55, %v583_v55  ;;  %4279 = vmatmul.msk.bf16.vlgmr.msra.gmra.mxu1 %vm593_vm11, %v4278_v45  ;;  %4271 = vmatmul.msk.bf16.vlgmr.msrb.gmra.mxu3 %vm593_vm11, %v4270_v51  ;;  %v5498_v55 = vld [vmem:[#allocation2 + $0x154] sm:$0xf] }
 0x2ff   :  { %847 = vmatpush.bf16.msra.mxu3 %v4340_v39  ;;  %875 = vmatpush.bf16.msrb.mxu1 %v4344_v44  ;;  %v4317_v39 = vld [vmem:[#allocation2 + $0x108] sm:$0xf0] }
 0x300   :  { %v6173_v3 = vsel %vm597_vm10, %v585_v59, 0  ;;  %v4320_v41 = vor.u32 %v5488_v38, %v4317_v39  ;;  %v4365_v44 = vld [vmem:[#allocation2 + $0x168] sm:$0xf0]  ;;  %v4413_v59 = vld [vmem:[#allocation2 + $0x40] sm:$0xf]  ;;  %vm2939_vm10 = vcmask 130048  }
 0x301   :  { %625 = vmatpush.bf16.msrb.mxu0 %v6173_v3  ;;  %690 = vmatpush.bf16.msrb.mxu2 %v6173_v3  ;;  %v4368_v46 = vor.u32 %v5500_v43, %v4365_v44  ;;  %v5457_v39 = vld [vmem:[#allocation2 + $0x14] sm:$0xf]  ;;  %v4471_v43 = vld [vmem:[#allocation2 + $0xb8] sm:$0xf0] }
 0x303   :  { %848 = vmatpush.bf16.msra.mxu3 %v4332_v56  ;;  %876 = vmatpush.bf16.msrb.mxu1 %v4336_v57  ;;  %v4357_v56 = vld [vmem:[#allocation2 + $0x158] sm:$0xf0]  ;;  %v4426_v57 = vor.u32 %v5465_v9, %v4423_v54  ;;  %v4383_v9 = vld [vmem:[#allocation2 + $0x8] sm:$0xf0] }
 0x304   :  { %4280 = vmatmul.msk.bf16.vlgmr.msrb.gmra.mxu2 %vm593_vm11, %v4278_v45  ;;  %4272 = vmatmul.msk.bf16.vlgmr.msrb.gmra.mxu0 %vm593_vm11, %v4270_v51  ;;  %v4434_v45 = vor.u32 %v5467_v40, %v4431_v42  ;;  %v5486_v51 = vld [vmem:[#allocation2 + $0xf4] sm:$0xf]  ;;  %v4360_v58 = vor.u32 %v5498_v55, %v4357_v56  ;;  %v4391_v40 = vld [vmem:[#allocation2 + $0x18] sm:$0xf0]  ;;  %v4463_v55 = vld [vmem:[#allocation2 + $0xa8] sm:$0xf0] }
 0x305   :  { %865 = vmatpush.bf16.msra.mxu0 %v4372_v61  ;;  %893 = vmatpush.bf16.msra.mxu2 %v4376_v0  ;;  %v4312_v53 = vor.u32 %v5486_v51, %v4309_v52  ;;  %v4414_v61 = vor.u32 %v5464_v60, %v4413_v59  ;;  %v5463_v0 = vld [vmem:[#allocation2 + $0x44] sm:$0xf]  ;;  %v4394_v42 = vor.u32 %v5457_v39, %v4391_v40  ;;  %v4543_v40 = vld [vmem:[#allocation2 + $0x1f0] sm:$0xf] }
 0x306   :  { %v4418_v6 = vor.u32 %v5463_v0, %v4415_v2  ;;  %v5455_v52 = vld [vmem:[#allocation2 + $0x4] sm:$0xf] }
 0x307   :  { %849 = vmatpush.bf16.msra.mxu3 %v4324_v4  ;;  %877 = vmatpush.bf16.msrb.mxu1 %v4328_v5  ;;  %v5496_v4 = vld [vmem:[#allocation2 + $0x144] sm:$0xf]  ;;  %v4349_v5 = vld [vmem:[#allocation2 + $0x148] sm:$0xf0]  ;;  %v4386_v54 = vor.u32 %v5455_v52, %v4383_v9  ;;  %v4527_v9 = vld [vmem:[#allocation2 + $0x1d0] sm:$0xf] }
 0x308   :  { %v4352_v7 = vor.u32 %v5496_v4, %v4349_v5  ;;  %v5471_v60 = vld [vmem:[#allocation2 + $0x84] sm:$0xf] }
 0x309   :  { %866 = vmatpush.bf16.msra.mxu0 %v4364_v8  ;;  %894 = vmatpush.bf16.msra.mxu2 %v4368_v46  ;;  %v4405_v8 = vld [vmem:[#allocation2 + $0x30] sm:$0xf]  ;;  %v5456_v46 = vld [vmem:[#allocation2 + $0x4] sm:$0xf0] }
 0x30b   :  { %850 = vmatpush.bf16.msra.mxu3 %v4316_v12  ;;  %878 = vmatpush.bf16.msrb.mxu1 %v4320_v41  ;;  %v4406_v12 = vor.u32 %v5462_v10, %v4405_v8  ;;  %v5477_v41 = vld [vmem:[#allocation2 + $0xb4] sm:$0xf] }
 0x30c   :  { %v4474_v44 = vor.u32 %v5477_v41, %v4471_v43  ;;  %v5520_v41 = vld [vmem:[#allocation2 + $0x1f4] sm:$0xf0] }
 0x30d   :  { %867 = vmatpush.bf16.msra.mxu0 %v4356_v15  ;;  %895 = vmatpush.bf16.msra.mxu2 %v4360_v58  ;;  %v5482_v15 = vld [vmem:[#allocation2 + $0xd4] sm:$0xf]  ;;  %v4455_v58 = vld [vmem:[#allocation2 + $0x98] sm:$0xf0]  ;;  %v4544_v43 = vor.u32 %v5520_v41, %v4543_v40 }
 0x30e   :  { %v4296_v19 = vor.u32 %v5482_v15, %v4293_v16  ;;  %v5527_v15 = vld [vmem:[#allocation2 + $0x234] sm:$0xf]  ;;  %v4577_v16 = vld [vmem:[#allocation2 + $0x238] sm:$0xf0] }
 0x30f   :  { %851 = vmatpush.bf16.msra.mxu3 %v4308_v21  ;;  %879 = vmatpush.bf16.msrb.mxu1 %v4312_v53  ;;  %v4410_v21 = vor.u32 %v5461_v17, %v4407_v20  ;;  %v5475_v53 = vld [vmem:[#allocation2 + $0xa4] sm:$0xf]  ;;  %v4567_v20 = vld [vmem:[#allocation2 + $0x220] sm:$0xf] }
 0x310   :  { %v4466_v56 = vor.u32 %v5475_v53, %v4463_v55  ;;  %v5515_v53 = vld [vmem:[#allocation2 + $0x1d4] sm:$0xf] }
 0x311   :  { %868 = vmatpush.bf16.msra.mxu0 %v4348_v24  ;;  %896 = vmatpush.bf16.msra.mxu2 %v4352_v7  ;;  %v4461_v24 = vld [vmem:[#allocation2 + $0xa0] sm:$0xf] }
 0x312   :  { %v4462_v29 = vor.u32 %v5476_v26, %v4461_v24  ;;  %v4559_v26 = vld [vmem:[#allocation2 + $0x210] sm:$0xf] }
 0x313   :  { %852 = vmatpush.bf16.msra.mxu3 %v4300_v28  ;;  %880 = vmatpush.bf16.msrb.mxu1 %v4304_v1  ;;  %v4285_v28 = vld [vmem:[#allocation2 + $0xc8] sm:$0xf0] }
 0x314   :  { %v4288_v30 = vor.u32 %v5480_v27, %v4285_v28  ;;  %v5524_v27 = vld [vmem:[#allocation2 + $0x214] sm:$0xf0]  ;;  %v5523_v28 = vld [vmem:[#allocation2 + $0x214] sm:$0xf] }
 0x315   :  { %1026 = vmatpush.bf16.msrb.mxu0 %v4438_v25  ;;  %1044 = vmatpush.bf16.msrb.mxu2 %v4470_v14  ;;  %v4398_v25 = vor.u32 %v5460_v23, %v4397_v22  ;;  %v5528_v14 = vld [vmem:[#allocation2 + $0x234] sm:$0xf0]  ;;  %v5525_v22 = vld [vmem:[#allocation2 + $0x224] sm:$0xf]  ;;  %v4569_v23 = vld [vmem:[#allocation2 + $0x228] sm:$0xf0] }
 0x316   :  { %v4576_v17 = vor.u32 %v5528_v14, %v4575_v13 }
 0x317   :  { %853 = vmatpush.bf16.msra.mxu3 %v4292_v32  ;;  %881 = vmatpush.bf16.msrb.mxu1 %v4296_v19  ;;  %v4399_v32 = vld [vmem:[#allocation2 + $0x28] sm:$0xf0]  ;;  %v4580_v19 = vor.u32 %v5527_v15, %v4577_v16  ;;  %v4495_v15 = vld [vmem:[#allocation2 + $0x190] sm:$0xf]  ;;  %v5508_v16 = vld [vmem:[#allocation2 + $0x194] sm:$0xf0] }
 0x319   :  { %1027 = vmatpush.bf16.msrb.mxu0 %v4430_v31  ;;  %v5459_v31 = vld [vmem:[#allocation2 + $0x24] sm:$0xf]  ;;  %1045 = vmatpush.bf16.msrb.mxu2 %v4462_v29  ;;  %v4561_v29 = vld [vmem:[#allocation2 + $0x218] sm:$0xf0] }
 0x31a   :  { %v4402_v34 = vor.u32 %v5459_v31, %v4399_v32  ;;  %v4564_v31 = vor.u32 %v5523_v28, %v4561_v29  ;;  %v4551_v32 = vld [vmem:[#allocation2 + $0x200] sm:$0xf] }
 0x31b   :  { %854 = vmatpush.bf16.msra.mxu3 %v4284_v37  ;;  %v5474_v37 = vld [vmem:[#allocation2 + $0x94] sm:$0xf0]  ;;  %882 = vmatpush.bf16.msrb.mxu1 %v4288_v30  ;;  %v4560_v30 = vor.u32 %v5524_v27, %v4559_v26  ;;  %v4489_v27 = vld [vmem:[#allocation2 + $0x188] sm:$0xf0] }
 0x31c   :  { %v4454_v38 = vor.u32 %v5474_v37, %v4453_v36 }
 0x31d   :  { %1028 = vmatpush.bf16.msrb.mxu0 %v4422_v49  ;;  %v5472_v49 = vld [vmem:[#allocation2 + $0x84] sm:$0xf0] }
 0x31e   :  { %1046 = vmatpush.bf16.msrb.mxu2 %v4454_v38  ;;  %v4446_v51 = vor.u32 %v5472_v49, %v4445_v47  ;;  %v5504_v38 = vld [vmem:[%s7001_s7 + $0x10] sm:$0x30]  ;;  %v5518_v47 = vld [vmem:[#allocation2 + $0x1e4] sm:$0xf0] }
 0x31f   :  { %1054 = vmatpush.bf16.msrb.mxu3 %v4442_v18  ;;  %v4390_v18 = vor.u32 %v5458_v35, %v4389_v33  ;;  %1072 = vmatpush.bf16.msra.mxu1 %v4474_v44  ;;  %v5522_v33 = vld [vmem:[#allocation2 + $0x204] sm:$0xf0]  ;;  %v4553_v35 = vld [vmem:[#allocation2 + $0x208] sm:$0xf0]  ;;  %v4545_v44 = vld [vmem:[#allocation2 + $0x1f8] sm:$0xf0] }
 0x320   :  { %v4552_v36 = vor.u32 %v5522_v33, %v4551_v32 }
 0x321   :  { %1029 = vmatpush.bf16.msrb.mxu0 %v4414_v61  ;;  %v4447_v61 = vld [vmem:[#allocation2 + $0x88] sm:$0xf0] }
 0x322   :  { %1047 = vmatpush.bf16.msrb.mxu2 %v4446_v51  ;;  %v4450_v62 = vor.u32 %v5471_v60, %v4447_v61  ;;  %v4537_v51 = vld [vmem:[#allocation2 + $0x1e8] sm:$0xf0] }
 0x323   :  { %1055 = vmatpush.bf16.msrb.mxu3 %v4434_v45  ;;  %v4381_v45 = vld [vmem:[#allocation2] sm:$0xf]  ;;  %1073 = vmatpush.bf16.msra.mxu1 %v4466_v56  ;;  %v4521_v60 = vld [vmem:[#allocation2 + $0x1c8] sm:$0xf0] }
 0x324   :  { %v4382_v48 = vor.u32 %v5456_v46, %v4381_v45  ;;  %v4535_v46 = vld [vmem:[#allocation2 + $0x1e0] sm:$0xf] }
 0x325   :  { %1030 = vmatpush.bf16.msrb.mxu0 %v4406_v12  ;;  %v4536_v49 = vor.u32 %v5518_v47, %v4535_v46  ;;  %v4519_v56 = vld [vmem:[#allocation2 + $0x1c0] sm:$0xf]  ;;  %v4649_v46 = vld [vmem:[#allocation2 + $0x2b0] sm:$0xf]  ;;  %v5545_v47 = vld [vmem:[#allocation2 + $0x2b4] sm:$0xf0] }
 0x327   :  { %1056 = vmatpush.bf16.msrb.mxu3 %v4426_v57  ;;  %v5473_v57 = vld [vmem:[#allocation2 + $0x94] sm:$0xf] }
 0x328   :  { %v4458_v59 = vor.u32 %v5473_v57, %v4455_v58  ;;  %v5514_v57 = vld [vmem:[#allocation2 + $0x1c4] sm:$0xf0]  ;;  %v5513_v58 = vld [vmem:[#allocation2 + $0x1c4] sm:$0xf] }
 0x329   :  { %1031 = vmatpush.bf16.msrb.mxu0 %v4398_v25  ;;  %v4572_v25 = vor.u32 %v5525_v22, %v4569_v23  ;;  %v4524_v61 = vor.u32 %v5513_v58, %v4521_v60  ;;  %v4487_v23 = vld [vmem:[#allocation2 + $0x180] sm:$0xf]  ;;  %v5540_v58 = vld [vmem:[#allocation2 + $0x294] sm:$0xf]  ;;  %v4635_v60 = vld [vmem:[#allocation2 + $0x298] sm:$0xf0] }
 0x32a   :  { %1074 = vmatpush.bf16.msra.mxu1 %v4458_v59  ;;  %v4520_v59 = vor.u32 %v5514_v57, %v4519_v56  ;;  %v4633_v56 = vld [vmem:[#allocation2 + $0x290] sm:$0xf]  ;;  %v5541_v57 = vld [vmem:[#allocation2 + $0x294] sm:$0xf0] }
 0x32b   :  { %1057 = vmatpush.bf16.msrb.mxu3 %v4418_v6 }
 0x32d   :  { %1032 = vmatpush.bf16.msrb.mxu0 %v4390_v18  ;;  %v4481_v18 = vld [vmem:[%s7001_s7 + $0x10] sm:$0xf] }
 0x32e   :  { %1075 = vmatpush.bf16.msra.mxu1 %v4450_v62  ;;  %v4482_v39 = vor.u32 %v5504_v38, %v4481_v18 }
 0x32f   :  { %1058 = vmatpush.bf16.msrb.mxu3 %v4410_v21  ;;  %v5526_v21 = vld [vmem:[#allocation2 + $0x224] sm:$0xf0] }
 0x330   :  { %v4568_v24 = vor.u32 %v5526_v21, %v4567_v20  ;;  %v4497_v20 = vld [vmem:[#allocation2 + $0x198] sm:$0xf0] }
 0x331   :  { %1033 = vmatpush.bf16.msrb.mxu0 %v4382_v48  ;;  %v5517_v48 = vld [vmem:[#allocation2 + $0x1e4] sm:$0xf] }
 0x332   :  { %v4540_v52 = vor.u32 %v5517_v48, %v4537_v51  ;;  %v5544_v48 = vld [vmem:[#allocation2 + $0x2b4] sm:$0xf]  ;;  %v4651_v51 = vld [vmem:[#allocation2 + $0x2b8] sm:$0xf0] }
 0x333   :  { %1059 = vmatpush.bf16.msrb.mxu3 %v4402_v34  ;;  %v5521_v34 = vld [vmem:[#allocation2 + $0x204] sm:$0xf] }
 0x334   :  { %v4556_v37 = vor.u32 %v5521_v34, %v4553_v35 }
 0x337   :  { %1060 = vmatpush.bf16.msrb.mxu3 %v4394_v42  ;;  %v5519_v42 = vld [vmem:[#allocation2 + $0x1f4] sm:$0xf] }
 0x338   :  { %v4548_v45 = vor.u32 %v5519_v42, %v4545_v44  ;;  %v4587_v42 = vld [vmem:[%s7001_s7 + $0x18] sm:$0xf] }
 0x33b   :  { %1061 = vmatpush.bf16.msrb.mxu3 %v4386_v54  ;;  %v4529_v54 = vld [vmem:[#allocation2 + $0x1d8] sm:$0xf0] }
 0x33c   :  { %v4532_v55 = vor.u32 %v5515_v53, %v4529_v54  ;;  %v5542_v53 = vld [vmem:[#allocation2 + $0x2a4] sm:$0xf]  ;;  %v4643_v54 = vld [vmem:[#allocation2 + $0x2a8] sm:$0xf0] }
 0x37b   :  { %v678_v63 = vpop.f32.mrf.mxu1 }
 0x381   :  { %v613_v2 = vpop.f32.mrf.mxu3  ;;  %v627_v4 = vpop.f32.mrf.mxu0 }
 0x383   :  { %v680_v0 = vpop.f32.mrf.mxu1 }
 0x384   :  { %v697_v1 = vpack.c.bf16 %v680_v0, %v678_v63  ;;  %v4511_v63 = vld [vmem:[#allocation2 + $0x1b0] sm:$0xf]  ;;  %v5512_v0 = vld [vmem:[#allocation2 + $0x1b4] sm:$0xf0] }
 0x386   :  { %855 = vmatmul.bf16.vlgmr.msra.gmra.mxu3 %v697_v1  ;;  %883 = vmatmul.bf16.vlgmr.msrb.gmra.mxu1 %v697_v1  ;;  %v5511_v1 = vld [vmem:[#allocation2 + $0x1b4] sm:$0xf] }
 0x387   :  { %v692_v5 = vpop.f32.mrf.mxu2  ;;  %1271 = vmatpush.bf16.msrb.mxu1 %v4544_v43  ;;  %1299 = vmatpush.bf16.msra.mxu3 %v4548_v45  ;;  %v5529_v43 = vld [vmem:[%s7001_s7 + $0x18] sm:$0x30] }
 0x388   :  { %v4588_v44 = vor.u32 %v5529_v43, %v4587_v42  ;;  %v5534_v42 = vld [vmem:[#allocation2 + $0x264] sm:$0xf] }
 0x389   :  { %v615_v6 = vpop.f32.mrf.mxu3  ;;  %v629_v8 = vpop.f32.mrf.mxu0 }
 0x38a   :  { %v632_v11 = vpack.c.bf16 %v615_v6, %v613_v2  ;;  %v633_v12 = vpack.c.bf16 %v629_v8, %v627_v4  ;;  %v4512_v2 = vor.u32 %v5512_v0, %v4511_v63  ;;  %v4513_v4 = vld [vmem:[#allocation2 + $0x1b8] sm:$0xf0]  ;;  %v4503_v6 = vld [vmem:[#allocation2 + $0x1a0] sm:$0xf]  ;;  %v5509_v8 = vld [vmem:[#allocation2 + $0x1a4] sm:$0xf]  ;;  %v4638_v63 = vor.u32 %v5540_v58, %v4635_v60 }
 0x38b   :  { %1272 = vmatpush.bf16.msrb.mxu1 %v4536_v49  ;;  %1300 = vmatpush.bf16.msra.mxu3 %v4540_v52  ;;  %v4650_v49 = vor.u32 %v5545_v47, %v4649_v46  ;;  %v4654_v52 = vor.u32 %v5544_v48, %v4651_v51  ;;  %v4681_v0 = vld [vmem:[#allocation2 + $0x2f0] sm:$0xf]  ;;  %v4657_v47 = vld [vmem:[#allocation2 + $0x2c0] sm:$0xf]  ;;  %v5547_v48 = vld [vmem:[#allocation2 + $0x2c4] sm:$0xf0] }
 0x38c   :  { %v4658_v51 = vor.u32 %v5547_v48, %v4657_v47  ;;  %v5531_v58 = vld [vmem:[#allocation2 + $0x244] sm:$0xf0]  ;;  %v1640_v47 = vld [vmem:[%s7003_s9 + $0xa0] sm:$0xff] }
 0x38d   :  { %v1620_v48 = vld [vmem:[%s7003_s9] sm:$0xff] }
 0x38f   :  { %v694_v7 = vpop.f32.mrf.mxu2  ;;  %1301 = vmatpush.bf16.msra.mxu3 %v4532_v55  ;;  %v4646_v55 = vor.u32 %v5542_v53, %v4643_v54  ;;  %v5533_v53 = vld [vmem:[#allocation2 + $0x254] sm:$0xf0] }
 0x390   :  { %v698_v10 = vpack.c.bf16 %v694_v7, %v692_v5  ;;  %v4516_v5 = vor.u32 %v5511_v1, %v4513_v4  ;;  %v5510_v7 = vld [vmem:[#allocation2 + $0x1a4] sm:$0xf0]  ;;  %v5553_v1 = vld [vmem:[#allocation2 + $0x2f4] sm:$0xf0] }
 0x391   :  { %v4682_v4 = vor.u32 %v5553_v1, %v4681_v0 }
 0x392   :  { %4377 = vmatmul.msk.bf16.vlgmr.msra.gmra.mxu0 %vm365_vm6, %v698_v10  ;;  %4378 = vmatmul.msk.bf16.vlgmr.msra.gmra.mxu2 %vm365_vm6, %v698_v10  ;;  %v4504_v10 = vor.u32 %v5510_v7, %v4503_v6  ;;  %v4625_v7 = vld [vmem:[#allocation2 + $0x280] sm:$0xf] }
 0x393   :  { %1100 = vmatpush.bf16.msra.mxu2 %v6166_v50  ;;  %1114 = vmatpush.bf16.msra.mxu0 %v6173_v3 }
 0x394   :  { %1302 = vmatpush.bf16.msra.mxu3 %v4524_v61 }
 0x396   :  { %1062 = vmatmul.bf16.vlgmr.msrb.gmra.mxu3 %v632_v11  ;;  %4476 = vmatmul.msk.bf16.vlgmr.msra.gmra.mxu1 %vm365_vm6, %v633_v12 }
 0x398   :  { %1303 = vmatpush.bf16.msra.mxu3 %v4516_v5  ;;  %v4683_v5 = vld [vmem:[#allocation2 + $0x2f8] sm:$0xf0] }
 0x3a2   :  { %1034 = vmatmul.bf16.vlgmr.msrb.gmra.mxu0 %v632_v11  ;;  %4475 = vmatmul.msk.bf16.vlgmr.msrb.gmra.mxu2 %vm365_vm6, %v633_v12  ;;  %v4505_v11 = vld [vmem:[#allocation2 + $0x1a8] sm:$0xf0] }
 0x3a3   :  { %1289 = vmatpush.bf16.msrb.mxu2 %v4576_v17  ;;  %1317 = vmatpush.bf16.msrb.mxu0 %v4580_v19  ;;  %v4508_v13 = vor.u32 %v5509_v8, %v4505_v11  ;;  %v5507_v17 = vld [vmem:[#allocation2 + $0x194] sm:$0xf]  ;;  %v4496_v19 = vor.u32 %v5508_v16, %v4495_v15  ;;  %v5539_v8 = vld [vmem:[#allocation2 + $0x284] sm:$0xf0]  ;;  %v4673_v15 = vld [vmem:[#allocation2 + $0x2e0] sm:$0xf] }
 0x3a4   :  { %v4500_v21 = vor.u32 %v5507_v17, %v4497_v20  ;;  %v4626_v11 = vor.u32 %v5539_v8, %v4625_v7  ;;  %v5551_v16 = vld [vmem:[#allocation2 + $0x2e4] sm:$0xf0]  ;;  %v5550_v17 = vld [vmem:[#allocation2 + $0x2e4] sm:$0xf]  ;;  %v4675_v20 = vld [vmem:[#allocation2 + $0x2e8] sm:$0xf0] }
 0x3a5   :  { %1304 = vmatpush.bf16.msra.mxu3 %v4508_v13  ;;  %v4627_v13 = vld [vmem:[#allocation2 + $0x288] sm:$0xf0] }
 0x3a7   :  { %1290 = vmatpush.bf16.msrb.mxu2 %v4568_v24  ;;  %1318 = vmatpush.bf16.msrb.mxu0 %v4572_v25  ;;  %v5506_v24 = vld [vmem:[#allocation2 + $0x184] sm:$0xf0]  ;;  %v5505_v25 = vld [vmem:[#allocation2 + $0x184] sm:$0xf] }
 0x3a8   :  { %v4488_v26 = vor.u32 %v5506_v24, %v4487_v23  ;;  %v4492_v29 = vor.u32 %v5505_v25, %v4489_v27  ;;  %v4617_v23 = vld [vmem:[#allocation2 + $0x270] sm:$0xf]  ;;  %v5537_v24 = vld [vmem:[#allocation2 + $0x274] sm:$0xf0]  ;;  %v5536_v25 = vld [vmem:[#allocation2 + $0x274] sm:$0xf] }
 0x3a9   :  { %1305 = vmatpush.bf16.msra.mxu3 %v4500_v21  ;;  %v4678_v21 = vor.u32 %v5550_v17, %v4675_v20  ;;  %v4619_v27 = vld [vmem:[#allocation2 + $0x278] sm:$0xf0]  ;;  %v1633_v20 = vld [vmem:[%s7003_s9 + $0x68] sm:$0xff] }
 0x3ab   :  { %1291 = vmatpush.bf16.msrb.mxu2 %v4560_v30  ;;  %1319 = vmatpush.bf16.msrb.mxu0 %v4564_v31 }
 0x3ad   :  { %1306 = vmatpush.bf16.msra.mxu3 %v4492_v29  ;;  %v4622_v29 = vor.u32 %v5536_v25, %v4619_v27  ;;  %v1630_v25 = vld [vmem:[%s7003_s9 + $0x50] sm:$0xff]  ;;  %v1628_v27 = vld [vmem:[%s7003_s9 + $0x40] sm:$0xff] }
 0x3af   :  { %1292 = vmatpush.bf16.msrb.mxu2 %v4552_v36  ;;  %1320 = vmatpush.bf16.msrb.mxu0 %v4556_v37 }
 0x3b1   :  { %1548 = vmatpush.bf16.msrb.mxu3 %v4654_v52  ;;  %v4659_v52 = vld [vmem:[#allocation2 + $0x2c8] sm:$0xf0] }
 0x3b2   :  { %4483 = vmatmul.msk.bf16.vlgmr.msra.gmra.mxu2 %vm593_vm11, %v4482_v39  ;;  %4484 = vmatmul.msk.bf16.vlgmr.msra.gmra.mxu0 %vm593_vm11, %v4482_v39 }
 0x3b3   :  { %1349 = vmatpush.bf16.msra.mxu2 %v6166_v50  ;;  %1363 = vmatpush.bf16.msra.mxu0 %v6173_v3  ;;  %v5516_v50 = vld [vmem:[#allocation2 + $0x1d4] sm:$0xf0] }
 0x3b4   :  { %v4528_v3 = vor.u32 %v5516_v50, %v4527_v9  ;;  %v4641_v9 = vld [vmem:[#allocation2 + $0x2a0] sm:$0xf]  ;;  %v5543_v50 = vld [vmem:[#allocation2 + $0x2a4] sm:$0xf0] }
 0x3b5   :  { %1549 = vmatpush.bf16.msrb.mxu3 %v4646_v55  ;;  %v4603_v55 = vld [vmem:[#allocation2 + $0x258] sm:$0xf0] }
 0x3b6   :  { %1273 = vmatpush.bf16.msrb.mxu1 %v4528_v3  ;;  %v4642_v3 = vor.u32 %v5543_v50, %v4641_v9  ;;  %v4601_v50 = vld [vmem:[#allocation2 + $0x250] sm:$0xf] }
 0x3b7   :  { %v4602_v54 = vor.u32 %v5533_v53, %v4601_v50  ;;  %v1636_v50 = vld [vmem:[%s7003_s9 + $0x80] sm:$0xff] }
 0x3b9   :  { %1550 = vmatpush.bf16.msrb.mxu3 %v4638_v63  ;;  %v4595_v63 = vld [vmem:[#allocation2 + $0x248] sm:$0xf0] }
 0x3ba   :  { %1274 = vmatpush.bf16.msrb.mxu1 %v4520_v59  ;;  %v4634_v59 = vor.u32 %v5541_v57, %v4633_v56  ;;  %v4593_v57 = vld [vmem:[#allocation2 + $0x240] sm:$0xf] }
 0x3bb   :  { %v4594_v60 = vor.u32 %v5531_v58, %v4593_v57 }
 0x3be   :  { %1275 = vmatpush.bf16.msrb.mxu1 %v4512_v2  ;;  %v5552_v2 = vld [vmem:[#allocation2 + $0x2f4] sm:$0xf] }
 0x3bf   :  { %v4686_v6 = vor.u32 %v5552_v2, %v4683_v5 }
 0x3c2   :  { %1276 = vmatpush.bf16.msrb.mxu1 %v4504_v10  ;;  %v5538_v10 = vld [vmem:[#allocation2 + $0x284] sm:$0xf] }
 0x3c6   :  { %1277 = vmatpush.bf16.msrb.mxu1 %v4496_v19  ;;  %v4674_v19 = vor.u32 %v5551_v16, %v4673_v15 }
 0x3ca   :  { %1278 = vmatpush.bf16.msrb.mxu1 %v4488_v26  ;;  %v4618_v26 = vor.u32 %v5537_v24, %v4617_v23  ;;  %v1632_v23 = vld [vmem:[%s7003_s9 + $0x60] sm:$0xff]  ;;  %v1631_v24 = vld [vmem:[%s7003_s9 + $0x58] sm:$0xff] }
 0x3ce   :  { %1520 = vmatpush.bf16.msra.mxu1 %v4650_v49  ;;  %v5546_v49 = vld [vmem:[#allocation2 + $0x2c4] sm:$0xf] }
 0x3cf   :  { %v4662_v9 = vor.u32 %v5546_v49, %v4659_v52  ;;  %v1639_v49 = vld [vmem:[%s7003_s9 + $0x98] sm:$0xff] }
 0x3d2   :  { %1521 = vmatpush.bf16.msra.mxu1 %v4642_v3  ;;  %v5532_v3 = vld [vmem:[#allocation2 + $0x254] sm:$0xf] }
 0x3d3   :  { %v4606_v56 = vor.u32 %v5532_v3, %v4603_v55 }
 0x3d6   :  { %1522 = vmatpush.bf16.msra.mxu1 %v4634_v59  ;;  %v5530_v59 = vld [vmem:[#allocation2 + $0x244] sm:$0xf] }
 0x3d7   :  { %v4598_v1 = vor.u32 %v5530_v59, %v4595_v63 }
 0x3da   :  { %1523 = vmatpush.bf16.msra.mxu1 %v4626_v11 }
 0x3de   :  { %1524 = vmatpush.bf16.msra.mxu1 %v4618_v26  ;;  %v1629_v26 = vld [vmem:[%s7003_s9 + $0x48] sm:$0xff] }
 0x403   :  { %v6221_v45 = vpop.f32.mrf.mxu1 }
 0x409   :  { %v6199_v22 = vpop.f32.mrf.mxu3 }
 0x40b   :  { %v6223_v61 = vpop.f32.mrf.mxu1 }
 0x40f   :  { %v6195_v62 = vpop.f32.mrf.mxu0 }
 0x411   :  { %v858_v31 = vpop.f32.mrf.mxu3 }
 0x415   :  { %v6197_v12 = vpop.f32.mrf.mxu2 }
 0x417   :  { %v872_v14 = vpop.f32.mrf.mxu0 }
 0x418   :  { %v873_v33 = vadd.f32 %v872_v14, %v858_v31  ;;  %v4630_v14 = vor.u32 %v5538_v10, %v4627_v13  ;;  %v4665_v31 = vld [vmem:[#allocation2 + $0x2d0] sm:$0xf] }
 0x41a   :  { %1551 = vmatpush.bf16.msrb.mxu3 %v4630_v14 }
 0x41d   :  { %v6201_v28 = vpop.f32.mrf.mxu2 }
 0x41e   :  { %1552 = vmatpush.bf16.msrb.mxu3 %v4622_v29 }
 0x41f   :  { %v6203_v30 = vpop.f32.mrf.mxu0 }
 0x425   :  { %v6205_v32 = vpop.f32.mrf.mxu2 }
 0x427   :  { %v1037_v34 = vpop.f32.mrf.mxu0 }
 0x428   :  { %v6207_v35 = vadd.f32 %v1037_v34, %v873_v33  ;;  %v5549_v33 = vld [vmem:[#allocation2 + $0x2d4] sm:$0xf0]  ;;  %v5548_v34 = vld [vmem:[#allocation2 + $0x2d4] sm:$0xf] }
 0x42d   :  { %v6209_v36 = vpop.f32.mrf.mxu2 }
 0x42e   :  { %v1052_v63 = vadd.f32 %v6209_v36, %v6207_v35 }
 0x42f   :  { %v1116_v37 = vpop.f32.mrf.mxu0 }
 0x435   :  { %v1102_v18 = vpop.f32.mrf.mxu2 }
 0x437   :  { %v1118_v38 = vpop.f32.mrf.mxu0 }
 0x438   :  { %v1122_v39 = vpack.c.bf16 %v1118_v38, %v1116_v37  ;;  %v4666_v37 = vor.u32 %v5549_v33, %v4665_v31  ;;  %v6225_v38 = vpop.f32.mrf.mxu1  ;;  %v1627_v31 = vld [vmem:[%s7003_s9 + $0x38] sm:$0xff]  ;;  %v1626_v33 = vld [vmem:[%s7003_s9 + $0x30] sm:$0xff] }
 0x43a   :  { %4581 = vmatmul.msk.bf16.vlgmr.msrb.gmra.mxu2 %vm365_vm6, %v1122_v39  ;;  %4582 = vmatmul.msk.bf16.vlgmr.msrb.gmra.mxu0 %vm365_vm6, %v1122_v39 }
 0x43b   :  { %1538 = vmatpush.bf16.msrb.mxu2 %v4682_v4  ;;  %1566 = vmatpush.bf16.msrb.mxu0 %v4686_v6  ;;  %v871_v4 = vadd.f32 %v6195_v62, %v6199_v22 }
 0x43d   :  { %v1104_v40 = vpop.f32.mrf.mxu2  ;;  %v1036_v5 = vadd.f32 %v6203_v30, %v871_v4  ;;  %v1635_v30 = vld [vmem:[%s7003_s9 + $0x78] sm:$0xff] }
 0x43e   :  { %v1121_v41 = vpack.c.bf16 %v1104_v40, %v1102_v18  ;;  %v4667_v18 = vld [vmem:[#allocation2 + $0x2d8] sm:$0xf0]  ;;  %v4609_v40 = vld [vmem:[#allocation2 + $0x260] sm:$0xf] }
 0x43f   :  { %1539 = vmatpush.bf16.msrb.mxu2 %v4674_v19  ;;  %1567 = vmatpush.bf16.msrb.mxu0 %v4678_v21  ;;  %v4670_v39 = vor.u32 %v5548_v34, %v4667_v18  ;;  %v1050_v8 = vadd.f32 %v6205_v32, %v1036_v5  ;;  %v1634_v32 = vld [vmem:[%s7003_s9 + $0x70] sm:$0xff]  ;;  %v6252_v21 = vpop.f32.mrf.mxu3  ;;  %v1625_v34 = vld [vmem:[%s7003_s9 + $0x28] sm:$0xff]  ;;  %v1643_v18 = vld [vmem:[%s7003_s9 + $0xb8] sm:$0xff] }
 0x440   :  { %1279 = vmatmul.bf16.vlgmr.msrb.gmra.mxu1 %v1121_v41  ;;  %1307 = vmatmul.bf16.vlgmr.msra.gmra.mxu3 %v1121_v41  ;;  %v5535_v41 = vld [vmem:[#allocation2 + $0x264] sm:$0xf0]  ;;  %v6227_v0 = vpop.f32.mrf.mxu1 }
 0x441   :  { %v4610_v43 = vor.u32 %v5535_v41, %v4609_v40  ;;  %v1623_v40 = vld [vmem:[%s7003_s9 + $0x18] sm:$0xff]  ;;  %v1642_v41 = vld [vmem:[%s7003_s9 + $0xb0] sm:$0xff] }
 0x443   :  { %1540 = vmatpush.bf16.msrb.mxu2 %v4666_v37  ;;  %1568 = vmatpush.bf16.msrb.mxu0 %v4670_v39  ;;  %v1624_v37 = vld [vmem:[%s7003_s9 + $0x20] sm:$0xff] }
 0x444   :  { %1525 = vmatpush.bf16.msra.mxu1 %v4610_v43  ;;  %v1641_v43 = vld [vmem:[%s7003_s9 + $0xa8] sm:$0xff] }
 0x447   :  { %1541 = vmatpush.bf16.msrb.mxu2 %v4658_v51  ;;  %1569 = vmatpush.bf16.msrb.mxu0 %v4662_v9  ;;  %v6269_v29 = vpop.f32.mrf.mxu3  ;;  %v1638_v51 = vld [vmem:[%s7003_s9 + $0x90] sm:$0xff]  ;;  %v1637_v9 = vld [vmem:[%s7003_s9 + $0x88] sm:$0xff] }
 0x448   :  { %1526 = vmatpush.bf16.msra.mxu1 %v4602_v54  ;;  %v899_v54 = vadd.f32 %v6197_v12, %v6221_v45 }
 0x44a   :  { %4589 = vmatmul.msk.bf16.vlgmr.msra.gmra.mxu2 %vm593_vm11, %v4588_v44  ;;  %4590 = vmatmul.msk.bf16.vlgmr.msra.gmra.mxu0 %vm593_vm11, %v4588_v44  ;;  %v4611_v44 = vld [vmem:[#allocation2 + $0x268] sm:$0xf0]  ;;  %v1064_v55 = vadd.f32 %v6252_v21, %v899_v54  ;;  %vm3083_vm11 = vcmask 211968  }
 0x44b   :  { %v4614_v46 = vor.u32 %v5534_v42, %v4611_v44  ;;  %1647 = vmatpush.msra.mxu2 %v1635_v30  ;;  %1675 = vmatpush.msra.mxu0 %v1643_v18  ;;  %v1622_v42 = vld [vmem:[%s7003_s9 + $0x10] sm:$0xff] }
 0x44c   :  { %1527 = vmatpush.bf16.msra.mxu1 %v4594_v60  ;;  %v901_v60 = vadd.f32 %v6201_v28, %v6223_v61  ;;  %v1078_v4 = vadd.f32 %v6225_v38, %v1064_v55  ;;  %v1756_v55 = vld [vmem:[%s7004_s10 + $0x30] sm:$0xff] }
 0x44d   :  { %1553 = vmatpush.bf16.msrb.mxu3 %v4614_v46  ;;  %1648 = vmatpush.msra.mxu2 %v1634_v32  ;;  %v1621_v46 = vld [vmem:[%s7003_s9 + $0x8] sm:$0xff] }
 0x44e   :  { %1676 = vmatpush.msra.mxu0 %v1642_v41  ;;  %v1066_v5 = vadd.f32 %v6269_v29, %v901_v60  ;;  %v1755_v60 = vld [vmem:[%s7004_s10 + $0x28] sm:$0xff] }
 0x44f   :  { %1649 = vmatpush.msra.mxu2 %v1633_v20 }
 0x450   :  { %1690 = vmatpush.msrb.mxu1 %v1635_v30  ;;  %1677 = vmatpush.msra.mxu0 %v1641_v43  ;;  %v1080_v35 = vadd.f32 %v6227_v0, %v1066_v5 }
 0x451   :  { %1554 = vmatpush.bf16.msrb.mxu3 %v4606_v56  ;;  %1650 = vmatpush.msra.mxu2 %v1632_v23 }
 0x452   :  { %1691 = vmatpush.msrb.mxu1 %v1634_v32  ;;  %1678 = vmatpush.msra.mxu0 %v1640_v47 }
 0x453   :  { %1651 = vmatpush.msra.mxu2 %v1631_v24 }
 0x454   :  { %1692 = vmatpush.msrb.mxu1 %v1633_v20  ;;  %1679 = vmatpush.msra.mxu0 %v1639_v49 }
 0x455   :  { %1555 = vmatpush.bf16.msrb.mxu3 %v4598_v1  ;;  %1652 = vmatpush.msra.mxu2 %v1630_v25 }
 0x456   :  { %1693 = vmatpush.msrb.mxu1 %v1632_v23  ;;  %1680 = vmatpush.msra.mxu0 %v1638_v51 }
 0x457   :  { %1653 = vmatpush.msra.mxu2 %v1629_v26 }
 0x458   :  { %1694 = vmatpush.msrb.mxu1 %v1631_v24  ;;  %1681 = vmatpush.msra.mxu0 %v1637_v9 }
 0x459   :  { %1654 = vmatpush.msra.mxu2 %v1628_v27  ;;  %1718 = vmatpush.msra.mxu3 %v1643_v18 }
 0x45a   :  { %1695 = vmatpush.msrb.mxu1 %v1630_v25  ;;  %1682 = vmatpush.msra.mxu0 %v1636_v50 }
 0x45b   :  { %1655 = vmatpush.msra.mxu2 %v1627_v31  ;;  %1719 = vmatpush.msra.mxu3 %v1642_v41 }
 0x45c   :  { %1696 = vmatpush.msrb.mxu1 %v1629_v26 }
 0x45d   :  { %1656 = vmatpush.msra.mxu2 %v1626_v33  ;;  %1720 = vmatpush.msra.mxu3 %v1641_v43 }
 0x45e   :  { %1697 = vmatpush.msrb.mxu1 %v1628_v27 }
 0x45f   :  { %1657 = vmatpush.msra.mxu2 %v1625_v34  ;;  %1721 = vmatpush.msra.mxu3 %v1640_v47 }
 0x460   :  { %1698 = vmatpush.msrb.mxu1 %v1627_v31 }
 0x461   :  { %1658 = vmatpush.msra.mxu2 %v1624_v37  ;;  %1722 = vmatpush.msra.mxu3 %v1639_v49 }
 0x462   :  { %1699 = vmatpush.msrb.mxu1 %v1626_v33 }
 0x463   :  { %1659 = vmatpush.msra.mxu2 %v1623_v40  ;;  %1723 = vmatpush.msra.mxu3 %v1638_v51 }
 0x464   :  { %1700 = vmatpush.msrb.mxu1 %v1625_v34 }
 0x465   :  { %1660 = vmatpush.msra.mxu2 %v1622_v42  ;;  %1724 = vmatpush.msra.mxu3 %v1637_v9 }
 0x466   :  { %1701 = vmatpush.msrb.mxu1 %v1624_v37 }
 0x467   :  { %1661 = vmatpush.msra.mxu2 %v1621_v46  ;;  %1725 = vmatpush.msra.mxu3 %v1636_v50 }
 0x468   :  { %1702 = vmatpush.msrb.mxu1 %v1623_v40 }
 0x469   :  { %1662 = vmatpush.msra.mxu2 %v1620_v48 }
 0x46a   :  { %1703 = vmatpush.msrb.mxu1 %v1622_v42 }
 0x46c   :  { %1704 = vmatpush.msrb.mxu1 %v1621_v46 }
 0x46e   :  { %1705 = vmatpush.msrb.mxu1 %v1620_v48 }
 0x4b7   :  { %v6229_v2 = vpop.f32.mrf.mxu0 }
 0x4bd   :  { %v1280_v6 = vpop.f32.mrf.mxu1  ;;  %v1294_v7 = vpop.f32.mrf.mxu2 }
 0x4be   :  { %v1295_v10 = vadd.f32 %v1294_v7, %v1280_v6 }
 0x4bf   :  { %v6235_v11 = vpop.f32.mrf.mxu0 }
 0x4c0   :  { %v6237_v13 = vadd.f32 %v1295_v10, %v1050_v8 }
 0x4c3   :  { %v1308_v39 = vpop.f32.mrf.mxu3 }
 0x4c4   :  { %v1323_v1 = vadd.f32 %v6229_v2, %v1308_v39 }
 0x4c5   :  { %v6239_v14 = vpop.f32.mrf.mxu2  ;;  %v1282_v44 = vpop.f32.mrf.mxu1 }
 0x4c6   :  { %v1297_v57 = vadd.f32 %v6239_v14, %v1282_v44  ;;  %v1328_v14 = vadd.f32 %v1323_v1, %v1078_v4  ;;  %v1753_v1 = vld [vmem:[%s7004_s10 + $0x18] sm:$0xff]  ;;  %v1750_v4 = vld [vmem:[%s7004_s10] sm:$0xff] }
 0x4c7   :  { %v1365_v15 = vpop.f32.mrf.mxu0 }
 0x4c8   :  { %v1329_v6 = vadd.f32 %v1297_v57, %v1052_v63  ;;  %v1752_v63 = vld [vmem:[%s7004_s10 + $0x10] sm:$0xff] }
 0x4cb   :  { %v1310_v52 = vpop.f32.mrf.mxu3 }
 0x4cc   :  { %v1325_v28 = vadd.f32 %v6235_v11, %v1310_v52 }
 0x4cd   :  { %v1351_v16 = vpop.f32.mrf.mxu2 }
 0x4cf   :  { %v1367_v17 = vpop.f32.mrf.mxu0 }
 0x4d0   :  { %v1371_v19 = vpack.c.bf16 %v1367_v17, %v1365_v15 }
 0x4d2   :  { %4687 = vmatmul.msk.bf16.vlgmr.msrb.gmra.mxu2 %vm365_vm6, %v1371_v19  ;;  %4688 = vmatmul.msk.bf16.vlgmr.msrb.gmra.mxu0 %vm365_vm6, %v1371_v19  ;;  %v1330_v19 = vadd.f32 %v1325_v28, %v1080_v35 }
 0x4d3   :  { %1774 = vmatpush.msrb.mxu0 %v1756_v55 }
 0x4d5   :  { %v1353_v62 = vpop.f32.mrf.mxu2 }
 0x4d6   :  { %v1370_v22 = vpack.c.bf16 %v1353_v62, %v1351_v16 }
 0x4d8   :  { %1528 = vmatmul.bf16.vlgmr.msra.gmra.mxu1 %v1370_v22  ;;  %1556 = vmatmul.bf16.vlgmr.msrb.gmra.mxu3 %v1370_v22 }
 0x4d9   :  { %1817 = vmatpush.msrb.mxu3 %v1756_v55 }
 0x54f   :  { %v1571_v56 = vpop.f32.mrf.mxu0 }
 0x555   :  { %v1529_v53 = vpop.f32.mrf.mxu1  ;;  %v1543_v3 = vpop.f32.mrf.mxu2 }
 0x556   :  { %v1544_v58 = vadd.f32 %v1543_v3, %v1529_v53 }
 0x558   :  { %v6331_v10 = vadd.f32 %v1544_v58, %v6237_v13  ;;  %v1573_v13 = vpop.f32.mrf.mxu0 }
 0x55a   :  { %v1599_v15 = vmul.f32 %v6331_v10, %v6331_v10 }
 0x55b   :  { %v1557_v59 = vpop.f32.mrf.mxu3 }
 0x55c   :  { %v1572_v7 = vadd.f32 %v1571_v56, %v1557_v59  ;;  %v1757_v56 = vld [vmem:[%s7004_s10 + $0x38] sm:$0xff]  ;;  %v1754_v59 = vld [vmem:[%s7004_s10 + $0x20] sm:$0xff] }
 0x55d   :  { %v1531_v12 = vpop.f32.mrf.mxu1  ;;  %v1545_v45 = vpop.f32.mrf.mxu2  ;;  %1794 = vmatpush.msrb.mxu2 %v1757_v56  ;;  %1775 = vmatpush.msrb.mxu0 %v1754_v59 }
 0x55e   :  { %v1546_v8 = vadd.f32 %v1545_v45, %v1531_v12  ;;  %v6337_v36 = vadd.f32 %v1572_v7, %v1328_v14  ;;  %1818 = vmatpush.msrb.mxu3 %v1754_v59  ;;  %v1751_v45 = vld [vmem:[%s7004_s10 + $0x8] sm:$0xff]  ;;  %v5594_v59 = vld [vmem:[#allocation5 + $0x124] sm:$0xf] }
 0x55f   :  { %1795 = vmatpush.msrb.mxu2 %v1755_v60  ;;  %1776 = vmatpush.msrb.mxu0 %v1752_v63 }
 0x560   :  { %v6334_v61 = vadd.f32 %v1546_v8, %v1329_v6  ;;  %v1600_v0 = vmul.f32 %v6337_v36, %v6337_v36  ;;  %v1589_v23 = vsel %vm365_vm6, %v6337_v36, 0.0  ;;  %1819 = vmatpush.msrb.mxu3 %v1752_v63 }
 0x561   :  { %1796 = vmatpush.msrb.mxu2 %v1753_v1  ;;  %1777 = vmatpush.msrb.mxu0 %v1750_v4 }
 0x562   :  { %v1581_v38 = vsel %vm1580_vm12, %v6334_v61, 0.0  ;;  %v1601_v2 = vmul.f32 %v6334_v61, %v6334_v61  ;;  %v1611_v31 = vsel %vm365_vm6, %v1600_v0, 0.0  ;;  %1820 = vmatpush.msrb.mxu3 %v1750_v4  ;;  %v5593_v4 = vld [vmem:[#allocation5 + $0x114] sm:$0xf0] }
 0x563   :  { %v1582_v16 = vadd.f32 %v1581_v38, %v6331_v10  ;;  %v1559_v17 = vpop.f32.mrf.mxu3  ;;  %1797 = vmatpush.msrb.mxu2 %v1751_v45 }
 0x564   :  { %v1603_v11 = vsel %vm1580_vm12, %v1601_v2, 0.0  ;;  %v1574_v62 = vadd.f32 %v1573_v13, %v1559_v17 }
 0x565   :  { %v1583_v22 = vrot.slane %v1582_v16, 4  ;;  %v1604_v30 = vadd.f32 %v1603_v11, %v1599_v15  ;;  %v1734_v11 = vld [vmem:[%s7005_s11] sm:$0x1] }
 0x566   :  { %v6347_v32 = vadd.f32 %v1574_v62, %v1330_v19 }
 0x567   :  { %v1584_v20 = vadd.f32 %v1583_v22, %v1582_v16  ;;  %v1605_v21 = vrot.slane %v1604_v30, 4 }
 0x568   :  { %v1591_v24 = vsel %vm1590_vm13, %v6347_v32, 0.0  ;;  %v1602_v25 = vmul.f32 %v6347_v32, %v6347_v32 }
 0x569   :  { %v1592_v26 = vadd.f32 %v1591_v24, %v1589_v23  ;;  %v1585_v27 = vrot.slane %v1584_v20, 2  ;;  %v1606_v29 = vadd.f32 %v1605_v21, %v1604_v30  ;;  %v1747_v30 = vld [vmem:[%s7006_s12] sm:$0x1] }
 0x56a   :  { %v1612_v33 = vsel %vm1590_vm13, %v1602_v25, 0.0 }
 0x56b   :  { %v1593_v34 = vrot.slane %v1592_v26, 4  ;;  %v1613_v37 = vadd.f32 %v1612_v33, %v1611_v31  ;;  %v1586_v18 = vadd.f32 %v1585_v27, %v1584_v20  ;;  %v1607_v39 = vrot.slane %v1606_v29, 2 }
 0x56d   :  { %v1594_v40 = vadd.f32 %v1593_v34, %v1592_v26  ;;  %v1614_v41 = vrot.slane %v1613_v37, 4  ;;  %v1587_v42 = vrot.slane %v1586_v18, 1  ;;  %v1608_v43 = vadd.f32 %v1607_v39, %v1606_v29 }
 0x56f   :  { %v1595_v44 = vrot.slane %v1594_v40, 2  ;;  %v1615_v46 = vadd.f32 %v1614_v41, %v1613_v37  ;;  %v1588_v47 = vadd.f32 %v1587_v42, %v1586_v18  ;;  %v1609_v48 = vrot.slane %v1608_v43, 1 }
 0x571   :  { %v1596_v49 = vadd.f32 %v1595_v44, %v1594_v40  ;;  %v1616_v51 = vrot.slane %v1615_v46, 2  ;;  %1663 = vmatmul.f32.vlgmr.msra.gmra.mxu2 %v1588_v47  ;;  %v1610_v52 = vadd.f32 %v1609_v48, %v1608_v43  ;;  %v5597_v47 = vld [vmem:[#allocation5 + $0x134] sm:$0xf0] }
 0x573   :  { %1706 = vmatmul.f32.vlgmr.msrb.gmra.mxu1 %v1610_v52  ;;  %v1597_v9 = vrot.slane %v1596_v49, 1  ;;  %v1617_v50 = vadd.f32 %v1616_v51, %v1615_v46  ;;  %v4781_v46 = vld [vmem:[#allocation5 + $0x130] sm:$0xf]  ;;  %v5596_v51 = vld [vmem:[#allocation5 + $0x134] sm:$0xf] }
 0x575   :  { %v1598_v53 = vadd.f32 %v1597_v9, %v1596_v49  ;;  %v1618_v3 = vrot.slane %v1617_v50, 1  ;;  %v5554_v9 = vld [vmem:[%s7007_s13] sm:$0xff] }
 0x577   :  { %4689 = vmatmul.msk.f32.vlgmr.msra.gmra.mxu0 %vm365_vm6, %v1598_v53  ;;  %v1619_v54 = vadd.f32 %v1618_v3, %v1617_v50  ;;  %v4782_v50 = vor.u32 %v5597_v47, %v4781_v46  ;;  %v4773_v53 = vld [vmem:[#allocation5 + $0x120] sm:$0xf]  ;;  %v5595_v3 = vld [vmem:[#allocation5 + $0x124] sm:$0xf0]  ;;  %v4733_v47 = vld [vmem:[#allocation5 + $0xd0] sm:$0xf] }
 0x578   :  { %1837 = vmatpush.msra.mxu0 %v1757_v56  ;;  %v4813_v56 = vld [vmem:[#allocation5 + $0x170] sm:$0xf]  ;;  %v4774_v63 = vor.u32 %v5595_v3, %v4773_v53  ;;  %v5569_v53 = vld [vmem:[#allocation5 + $0x64] sm:$0xf0] }
 0x579   :  { %4690 = vmatmul.msk.f32.vlgmr.msra.gmra.mxu3 %vm365_vm6, %v1619_v54 }
 0x57a   :  { %1838 = vmatpush.msra.mxu0 %v1755_v60  ;;  %v4775_v60 = vld [vmem:[#allocation5 + $0x128] sm:$0xf0] }
 0x57c   :  { %1839 = vmatpush.msra.mxu0 %v1753_v1  ;;  %v4765_v1 = vld [vmem:[#allocation5 + $0x110] sm:$0xf] }
 0x57e   :  { %1840 = vmatpush.msra.mxu0 %v1751_v45  ;;  %v4805_v45 = vld [vmem:[#allocation5 + $0x160] sm:$0xf] }
 0x5f0   :  { %v1707_v6 = vpop.f32.mrf.mxu1 }
 0x5f4   :  { %v1664_v57 = vpop.f32.mrf.mxu2  ;;  %v1684_v58 = vpop.f32.mrf.mxu0 }
 0x5f5   :  { %v1685_v12 = vadd.f32 %v1684_v58, %v1664_v57  ;;  %v5605_v57 = vld [vmem:[#allocation5 + $0x174] sm:$0xf0] }
 0x5f6   :  { %v4814_v58 = vor.u32 %v5605_v57, %v4813_v56  ;;  %v5567_v56 = vld [vmem:[#allocation5 + $0x54] sm:$0xf0] }
 0x5f7   :  { %v1730_v5 = vmul.f32 0.013888889, %v1685_v12  ;;  %v4778_v12 = vor.u32 %v5594_v59, %v4775_v60  ;;  %v5565_v59 = vld [vmem:[#allocation5 + $0x44] sm:$0xf0] }
 0x5f9   :  { %v1732_v14 = vmul.f32 %v1730_v5, %v1730_v5 }
 0x5fc   :  { %v1727_v7 = vpop.f32.mrf.mxu3 }
 0x5fd   :  { %v1728_v8 = vadd.f32 %v1727_v7, %v1707_v6  ;;  %v5592_v6 = vld [vmem:[#allocation5 + $0x114] sm:$0xf] }
 0x5ff   :  { %v1731_v28 = vmul.f32 0.013888889, %v1728_v8  ;;  %v4767_v8 = vld [vmem:[#allocation5 + $0x118] sm:$0xf0] }
 0x601   :  { %v1733_v35 = vsub.f32 %v1731_v28, %v1732_v14  ;;  %v4766_v14 = vor.u32 %v5593_v4, %v4765_v1  ;;  %v4757_v28 = vld [vmem:[#allocation5 + $0x100] sm:$0xf]  ;;  %v4807_v1 = vld [vmem:[#allocation5 + $0x168] sm:$0xf0]  ;;  %v4849_v4 = vld [vmem:[#allocation5 + $0x30] sm:$0xf] }
 0x603   :  { %v1735_v38 = vadd.f32 1e-05, %v1733_v35  ;;  %v5591_v35 = vld [vmem:[#allocation5 + $0x104] sm:$0xf0] }
 0x605   :  { %5704 = vrsqrt.f32 %v1735_v38  ;;  %vm1742_vm15 = vweird.f32 %v1735_v38 }
 0x60b   :  { %v5705_v2 = vpop.eup %5704 }
 0x60c   :  { %v1737_v15 = vmul.f32 %v5705_v2, %v1735_v38  ;;  %vm1743_vm14 = vweird.f32 %v5705_v2  ;;  %v4770_v38 = vor.u32 %v5592_v6, %v4767_v8  ;;  %v5586_v6 = vld [vmem:[#allocation5 + $0xe4] sm:$0xf]  ;;  %v4905_v8 = vld [vmem:[#allocation5 + $0xa0] sm:$0xf] }
 0x60d   :  { %vm1744_vm0 = vmor %vm1742_vm15, %vm1743_vm14 }
 0x60e   :  { %v1738_v13 = vmul.f32 %v5705_v2, %v1737_v15  ;;  %v5601_v15 = vld [vmem:[#allocation5 + $0x154] sm:$0xf0] }
 0x610   :  { %v1739_v16 = vmul.f32 0.5, %v1738_v13  ;;  %v5590_v13 = vld [vmem:[#allocation5 + $0x104] sm:$0xf] }
 0x612   :  { %v1740_v17 = vsub.f32 1.5, %v1739_v16 }
 0x614   :  { %v1741_v19 = vmul.f32 %v5705_v2, %v1740_v17  ;;  %v4759_v17 = vld [vmem:[#allocation5 + $0x108] sm:$0xf0] }
 0x616   :  { %v1745_v62 = vsel %vm1744_vm0, %v5705_v2, %v1741_v19  ;;  %v4797_v2 = vld [vmem:[#allocation5 + $0x150] sm:$0xf]  ;;  %v5604_v19 = vld [vmem:[#allocation5 + $0x174] sm:$0xf] }
 0x617   :  { %v1746_v22 = vmul.f32 %v1745_v62, %v1734_v11  ;;  %v4798_v16 = vor.u32 %v5601_v15, %v4797_v2  ;;  %v4815_v11 = vld [vmem:[#allocation5 + $0x178] sm:$0xf0]  ;;  %v4717_v62 = vld [vmem:[%s7007_s13 + $0x18] sm:$0xf]  ;;  %v4841_v15 = vld [vmem:[#allocation5 + $0x20] sm:$0xf] }
 0x618   :  { %v4799_v2 = vld [vmem:[#allocation5 + $0x158] sm:$0xf0] }
 0x619   :  { %4691 = vmatmul.msk.f32.vlgmr.msrb.gmra.mxu0 %vm1758_vm1, %v1746_v22  ;;  %4692 = vmatmul.msk.f32.vlgmr.msrb.gmra.mxu2 %vm1758_vm1, %v1746_v22  ;;  %v1748_v0 = vmul.f32 %v1746_v22, %v1730_v5  ;;  %v5603_v5 = vld [vmem:[#allocation5 + $0x164] sm:$0xf0]  ;;  %v5581_v22 = vld [vmem:[%s7007_s13 + $0x18] sm:$0x10] }
 0x61a   :  { %v4806_v7 = vor.u32 %v5603_v5, %v4805_v45  ;;  %v5563_v45 = vld [vmem:[#allocation5 + $0x34] sm:$0xf0] }
 0x61b   :  { %v1749_v20 = vsub.f32 %v1747_v30, %v1748_v0  ;;  %v4701_v30 = vld [vmem:[%s7007_s13 + $0x8] sm:$0xf]  ;;  %v4818_v0 = vor.u32 %v5604_v19, %v4815_v11  ;;  %v4850_v5 = vor.u32 %v5563_v45, %v4849_v4  ;;  %v4735_v19 = vld [vmem:[#allocation5 + $0xd8] sm:$0xf0]  ;;  %v5558_v45 = vld [vmem:[#allocation5 + $0x14] sm:$0xf] }
 0x61d   :  { %4693 = vmatmul.msk.f32.vlgmr.msrb.gmra.mxu3 %vm1758_vm1, %v1749_v20 }
 0x621   :  { %4694 = vmatmul.msk.f32.vlgmr.msra.gmra.mxu0 %vm1758_vm1, %v1749_v20  ;;  %v5555_v20 = vld [vmem:[%s7007_s13 + $0x8] sm:$0x10] }
 0x696   :  { %v1779_v21 = vpop.f32.mrf.mxu0 }
 0x697   :  { %v1845_v23 = vperm.slane %v1779_v21, 0  ;;  %v4758_v21 = vor.u32 %v5591_v35, %v4757_v28  ;;  %v5577_v28 = vld [vmem:[#allocation5 + $0xa4] sm:$0xf0] }
 0x698   :  { %v4906_v35 = vor.u32 %v5577_v28, %v4905_v8  ;;  %v5572_v8 = vld [vmem:[#allocation5 + $0x84] sm:$0xf] }
 0x699   :  { %v1847_v33 = vmul.f32 %v1845_v23, %v6331_v10  ;;  %v1849_v37 = vmul.f32 %v1845_v23, %v6334_v61  ;;  %v5580_v61 = vld [vmem:[%s7007_s13 + $0x10] sm:$0xff] }
 0x69a   :  { %v4749_v23 = vld [vmem:[#allocation5 + $0xf0] sm:$0xf] }
 0x69c   :  { %v1799_v24 = vpop.f32.mrf.mxu2 }
 0x69d   :  { %v1846_v25 = vperm.slane %v1799_v24, 0  ;;  %v5589_v24 = vld [vmem:[#allocation5 + $0xf4] sm:$0xf0] }
 0x69e   :  { %v1842_v26 = vpop.f32.mrf.mxu0 }
 0x69f   :  { %v1848_v27 = vmul.f32 %v1846_v25, %v6337_v36  ;;  %v1850_v29 = vmul.f32 %v1846_v25, %v6347_v32  ;;  %v1852_v31 = vperm.slane %v1842_v26, 0  ;;  %v4783_v32 = vld [vmem:[#allocation5 + $0x138] sm:$0xf0]  ;;  %v4762_v25 = vor.u32 %v5590_v13, %v4759_v17  ;;  %v4789_v26 = vld [vmem:[#allocation5 + $0x140] sm:$0xf] }
 0x6a0   :  { %v1822_v34 = vpop.f32.mrf.mxu3  ;;  %v4786_v54 = vor.u32 %v5596_v51, %v4783_v32  ;;  %v5583_v51 = vld [vmem:[#allocation5 + $0xc4] sm:$0xf0]  ;;  %v4881_v32 = vld [vmem:[#allocation5 + $0x70] sm:$0xf]  ;;  %v5584_v17 = vld [vmem:[#allocation5 + $0xd4] sm:$0xf] }
 0x6a1   :  { %v1854_v18 = vadd.f32 %v1852_v31, %v1848_v27  ;;  %v1856_v39 = vadd.f32 %v1852_v31, %v1850_v29  ;;  %v1851_v40 = vperm.slane %v1822_v34, 0  ;;  %v5599_v27 = vld [vmem:[#allocation5 + $0x144] sm:$0xf0]  ;;  %v5588_v29 = vld [vmem:[#allocation5 + $0xf4] sm:$0xf]  ;;  %v4718_v34 = vor.u32 %v5581_v22, %v4717_v62 }
 0x6a2   :  { %v4790_v31 = vor.u32 %v5599_v27, %v4789_v26  ;;  %v4738_v62 = vor.u32 %v5584_v17, %v4735_v19  ;;  %v4897_v22 = vld [vmem:[#allocation5 + $0x90] sm:$0xf]  ;;  %v5582_v27 = vld [vmem:[#allocation5 + $0xc4] sm:$0xf] }
 0x6a3   :  { %v1858_v41 = vmax.f32 %v1854_v18, 0.0  ;;  %v1860_v42 = vmax.f32 %v1856_v39, 0.0  ;;  %v1853_v43 = vadd.f32 %v1851_v40, %v1847_v33  ;;  %v1855_v44 = vadd.f32 %v1851_v40, %v1849_v37  ;;  %v4751_v33 = vld [vmem:[#allocation5 + $0xf8] sm:$0xf0]  ;;  %v4913_v18 = vld [vmem:[#allocation5 + $0xb0] sm:$0xf] }
 0x6a4   :  { %v4702_v37 = vor.u32 %v5555_v20, %v4701_v30  ;;  %v5579_v39 = vld [vmem:[#allocation5 + $0xb4] sm:$0xf0]  ;;  %v4750_v40 = vor.u32 %v5589_v24, %v4749_v23  ;;  %v5598_v20 = vld [vmem:[#allocation5 + $0x144] sm:$0xf]  ;;  %v4833_v23 = vld [vmem:[#allocation5 + $0x10] sm:$0xf] }
 0x6a5   :  { %v1857_v48 = vmax.f32 %v1853_v43, 0.0  ;;  %v1859_v49 = vmax.f32 %v1855_v44, 0.0  ;;  %v1862_v36 = vpack.c.bf16 %v1860_v42, %v1858_v41  ;;  %v4754_v41 = vor.u32 %v5588_v29, %v4751_v33  ;;  %v4741_v42 = vld [vmem:[#allocation5 + $0xe0] sm:$0xf]  ;;  %v5587_v43 = vld [vmem:[#allocation5 + $0xe4] sm:$0xf0] }
 0x6a6   :  { %v4914_v44 = vor.u32 %v5579_v39, %v4913_v18  ;;  %v4742_v46 = vor.u32 %v5587_v43, %v4741_v42  ;;  %v5575_v30 = vld [vmem:[#allocation5 + $0x94] sm:$0xf0]  ;;  %v4727_v29 = vld [vmem:[#allocation5 + $0xc8] sm:$0xf0]  ;;  %v4825_v18 = vld [vmem:[#allocation5] sm:$0xf] }
 0x6a7   :  { %v1861_v52 = vpack.c.bf16 %v1859_v49, %v1857_v48  ;;  %v6392_v10 = vsel %vm309_vm5, %v1862_v36, 0  ;;  %v5585_v48 = vld [vmem:[#allocation5 + $0xd4] sm:$0xf0]  ;;  %v4725_v36 = vld [vmem:[#allocation5 + $0xc0] sm:$0xf]  ;;  %v4730_v33 = vor.u32 %v5582_v27, %v4727_v29 }
 0x6a8   :  { %1916 = vmatpush.bf16.msra.mxu3 %v6392_v10  ;;  %2003 = vmatpush.bf16.msra.mxu1 %v6392_v10  ;;  %v4734_v49 = vor.u32 %v5585_v48, %v4733_v47  ;;  %v5557_v39 = vld [vmem:[#allocation5 + $0x4] sm:$0xf0]  ;;  %v4883_v42 = vld [vmem:[#allocation5 + $0x78] sm:$0xf0]  ;;  %v5566_v48 = vld [vmem:[#allocation5 + $0x54] sm:$0xf] }
 0x6a9   :  { %v6403_v55 = vsel %vm309_vm5, %v1861_v52, 0  ;;  %v5571_v52 = vld [vmem:[#allocation5 + $0x74] sm:$0xf0]  ;;  %vm2757_vm5 = vcmask 654336  }
 0x6aa   :  { %1897 = vmatpush.bf16.msra.mxu2 %v6403_v55  ;;  %1984 = vmatpush.bf16.msrb.mxu0 %v6403_v55 }
 0x6ab   :  { %4721 = vmatmul.msk.bf16.vlgmr.msra.gmra.mxu1 %vm1877_vm3, %v5580_v61  ;;  %4705 = vmatmul.msk.bf16.vlgmr.msra.gmra.mxu3 %vm1877_vm3, %v5554_v9 }
 0x6ac   :  { %2193 = vmatpush.bf16.msrb.mxu3 %v4814_v58  ;;  %2231 = vmatpush.bf16.msrb.mxu1 %v4818_v0  ;;  %v4857_v58 = vld [vmem:[#allocation5 + $0x40] sm:$0xf]  ;;  %v4898_v0 = vor.u32 %v5575_v30, %v4897_v22 }
 0x6ad   :  { %4719 = vmatmul.msk.bf16.vlgmr.msrb.gmra.mxu0 %vm1877_vm3, %v5580_v61  ;;  %4703 = vmatmul.msk.bf16.vlgmr.msra.gmra.mxu2 %vm1877_vm3, %v5554_v9  ;;  %v4726_v61 = vor.u32 %v5583_v51, %v4725_v36  ;;  %v4882_v9 = vor.u32 %v5571_v52, %v4881_v32  ;;  %v4858_v60 = vor.u32 %v5565_v59, %v4857_v58  ;;  %v5564_v51 = vld [vmem:[#allocation5 + $0x44] sm:$0xf]  ;;  %v4859_v32 = vld [vmem:[#allocation5 + $0x48] sm:$0xf0] }
 0x6ae   :  { %2170 = vmatpush.bf16.msrb.mxu2 %v4782_v50  ;;  %2208 = vmatpush.bf16.msra.mxu0 %v4786_v54  ;;  %v4873_v50 = vld [vmem:[#allocation5 + $0x60] sm:$0xf]  ;;  %v4865_v54 = vld [vmem:[#allocation5 + $0x50] sm:$0xf]  ;;  %v4862_v52 = vor.u32 %v5564_v51, %v4859_v32  ;;  %v5560_v58 = vld [vmem:[#allocation5 + $0x24] sm:$0xf] }
 0x6af   :  { %v4874_v3 = vor.u32 %v5569_v53, %v4873_v50  ;;  %v4866_v57 = vor.u32 %v5567_v56, %v4865_v54  ;;  %v5562_v53 = vld [vmem:[#allocation5 + $0x34] sm:$0xf]  ;;  %v5576_v56 = vld [vmem:[#allocation5 + $0xa4] sm:$0xf] }
 0x6b0   :  { %2194 = vmatpush.bf16.msrb.mxu3 %v4806_v7  ;;  %v4743_v7 = vld [vmem:[#allocation5 + $0xe8] sm:$0xf0] }
 0x6b2   :  { %2171 = vmatpush.bf16.msrb.mxu2 %v4774_v63  ;;  %2209 = vmatpush.bf16.msra.mxu0 %v4778_v12  ;;  %v5602_v63 = vld [vmem:[#allocation5 + $0x164] sm:$0xf] }
 0x6b3   :  { %v4810_v12 = vor.u32 %v5602_v63, %v4807_v1  ;;  %v5574_v63 = vld [vmem:[#allocation5 + $0x94] sm:$0xf]  ;;  %v4899_v1 = vld [vmem:[#allocation5 + $0x98] sm:$0xf0] }
 0x6b4   :  { %2195 = vmatpush.bf16.msrb.mxu3 %v4798_v16  ;;  %v5561_v16 = vld [vmem:[#allocation5 + $0x24] sm:$0xf0] }
 0x6b5   :  { %2232 = vmatpush.bf16.msrb.mxu1 %v4810_v12  ;;  %v4842_v11 = vor.u32 %v5561_v16, %v4841_v15 }
 0x6b6   :  { %2172 = vmatpush.bf16.msrb.mxu2 %v4766_v14  ;;  %2210 = vmatpush.bf16.msra.mxu0 %v4770_v38  ;;  %v4746_v14 = vor.u32 %v5586_v6, %v4743_v7  ;;  %v5600_v38 = vld [vmem:[#allocation5 + $0x154] sm:$0xf]  ;;  %v4902_v6 = vor.u32 %v5574_v63, %v4899_v1  ;;  %v4991_v1 = vld [vmem:[#allocation5 + $0x1e8] sm:$0xf0] }
 0x6b7   :  { %v4802_v13 = vor.u32 %v5600_v38, %v4799_v2  ;;  %v5556_v38 = vld [vmem:[#allocation5 + $0x4] sm:$0xf]  ;;  %v4827_v2 = vld [vmem:[#allocation5 + $0x8] sm:$0xf0] }
 0x6b8   :  { %2196 = vmatpush.bf16.msrb.mxu3 %v4790_v31  ;;  %v4889_v31 = vld [vmem:[#allocation5 + $0x80] sm:$0xf] }
 0x6b9   :  { %2233 = vmatpush.bf16.msrb.mxu1 %v4802_v13  ;;  %v4830_v13 = vor.u32 %v5556_v38, %v4827_v2  ;;  %v5031_v38 = vld [vmem:[#allocation5 + $0x238] sm:$0xf0] }
 0x6ba   :  { %2173 = vmatpush.bf16.msrb.mxu2 %v4758_v21  ;;  %2211 = vmatpush.bf16.msra.mxu0 %v4762_v25  ;;  %v4791_v21 = vld [vmem:[#allocation5 + $0x148] sm:$0xf0]  ;;  %v5559_v25 = vld [vmem:[#allocation5 + $0x14] sm:$0xf0]  ;;  %v4983_v2 = vld [vmem:[#allocation5 + $0x1d8] sm:$0xf0] }
 0x6bb   :  { %4722 = vmatmul.msk.bf16.gmra.mxu1 %vm1877_vm3, %v4718_v34  ;;  %4706 = vmatmul.msk.bf16.gmra.mxu3 %vm1877_vm3, %v4702_v37  ;;  %v4794_v24 = vor.u32 %v5598_v20, %v4791_v21  ;;  %v4834_v26 = vor.u32 %v5559_v25, %v4833_v23 }
 0x6bc   :  { %2395 = vmatpush.bf16.msra.mxu3 %v4914_v44  ;;  %v5568_v44 = vld [vmem:[#allocation5 + $0x64] sm:$0xf] }
 0x6bd   :  { %4720 = vmatmul.msk.bf16.gmra.mxu0 %vm1877_vm3, %v4718_v34  ;;  %4704 = vmatmul.msk.bf16.gmra.mxu2 %vm1877_vm3, %v4702_v37  ;;  %v5573_v34 = vld [vmem:[#allocation5 + $0x84] sm:$0xf0] }
 0x6be   :  { %2174 = vmatpush.bf16.msrb.mxu2 %v4750_v40  ;;  %2212 = vmatpush.bf16.msra.mxu0 %v4754_v41  ;;  %v4890_v37 = vor.u32 %v5573_v34, %v4889_v31  ;;  %v4826_v40 = vor.u32 %v5557_v39, %v4825_v18  ;;  %v5570_v41 = vld [vmem:[#allocation5 + $0x74] sm:$0xf]  ;;  %v4933_v18 = vld [vmem:[%s7007_s13 + $0x28] sm:$0xf]  ;;  %v5607_v39 = vld [vmem:[%s7007_s13 + $0x28] sm:$0x10] }
 0x6bf   :  { %2234 = vmatpush.bf16.msrb.mxu1 %v4794_v24  ;;  %v4886_v43 = vor.u32 %v5570_v41, %v4883_v42 }
 0x6c0   :  { %2396 = vmatpush.bf16.msra.mxu3 %v4906_v35 }
 0x6c2   :  { %2175 = vmatpush.bf16.msrb.mxu2 %v4742_v46  ;;  %2213 = vmatpush.bf16.msra.mxu0 %v4746_v14  ;;  %v4875_v46 = vld [vmem:[#allocation5 + $0x68] sm:$0xf0] }
 0x6c3   :  { %v4878_v47 = vor.u32 %v5568_v44, %v4875_v46  ;;  %v4891_v14 = vld [vmem:[#allocation5 + $0x88] sm:$0xf0] }
 0x6c4   :  { %2397 = vmatpush.bf16.msra.mxu3 %v4898_v0  ;;  %v4894_v35 = vor.u32 %v5572_v8, %v4891_v14  ;;  %v5631_v8 = vld [vmem:[#allocation5 + $0x234] sm:$0xf0]  ;;  %v5630_v14 = vld [vmem:[#allocation5 + $0x234] sm:$0xf] }
 0x6c6   :  { %2176 = vmatpush.bf16.msrb.mxu2 %v4734_v49  ;;  %2214 = vmatpush.bf16.msra.mxu0 %v4738_v62  ;;  %v4867_v49 = vld [vmem:[#allocation5 + $0x58] sm:$0xf0] }
 0x6c7   :  { %v4870_v36 = vor.u32 %v5566_v48, %v4867_v49 }
 0x6c8   :  { %2398 = vmatpush.bf16.msra.mxu3 %v4890_v37  ;;  %v5606_v37 = vld [vmem:[%s7007_s13 + $0x20] sm:$0xff] }
 0x6ca   :  { %2177 = vmatpush.bf16.msrb.mxu2 %v4726_v61  ;;  %2215 = vmatpush.bf16.msra.mxu0 %v4730_v33  ;;  %v5578_v61 = vld [vmem:[#allocation5 + $0xb4] sm:$0xf] }
 0x6ce   :  { %2372 = vmatpush.bf16.msra.mxu2 %v4882_v9  ;;  %2410 = vmatpush.bf16.msrb.mxu0 %v4886_v43  ;;  %v4915_v9 = vld [vmem:[#allocation5 + $0xb8] sm:$0xf0] }
 0x6cf   :  { %v4918_v50 = vor.u32 %v5578_v61, %v4915_v9  ;;  %v4997_v61 = vld [vmem:[#allocation5 + $0x1f0] sm:$0xf]  ;;  %v5623_v9 = vld [vmem:[#allocation5 + $0x1f4] sm:$0xf0] }
 0x6d1   :  { %2433 = vmatpush.bf16.msra.mxu1 %v4918_v50  ;;  %v5622_v50 = vld [vmem:[#allocation5 + $0x1f4] sm:$0xf] }
 0x6d2   :  { %2373 = vmatpush.bf16.msra.mxu2 %v4874_v3  ;;  %2411 = vmatpush.bf16.msrb.mxu0 %v4878_v47  ;;  %v4851_v3 = vld [vmem:[#allocation5 + $0x38] sm:$0xf0] }
 0x6d3   :  { %v4854_v54 = vor.u32 %v5562_v53, %v4851_v3  ;;  %v4998_v3 = vor.u32 %v5623_v9, %v4997_v61  ;;  %v5626_v61 = vld [vmem:[#allocation5 + $0x214] sm:$0xf] }
 0x6d6   :  { %2374 = vmatpush.bf16.msra.mxu2 %v4866_v57  ;;  %2412 = vmatpush.bf16.msrb.mxu0 %v4870_v36  ;;  %v4907_v57 = vld [vmem:[#allocation5 + $0xa8] sm:$0xf0] }
 0x6d7   :  { %v4910_v59 = vor.u32 %v5576_v56, %v4907_v57 }
 0x6d9   :  { %2434 = vmatpush.bf16.msra.mxu1 %v4910_v59  ;;  %v5621_v59 = vld [vmem:[#allocation5 + $0x1e4] sm:$0xf0] }
 0x6da   :  { %2375 = vmatpush.bf16.msra.mxu2 %v4858_v60  ;;  %2413 = vmatpush.bf16.msrb.mxu0 %v4862_v52  ;;  %v4843_v60 = vld [vmem:[#allocation5 + $0x28] sm:$0xf0] }
 0x6db   :  { %v4846_v4 = vor.u32 %v5560_v58, %v4843_v60  ;;  %v4989_v58 = vld [vmem:[#allocation5 + $0x1e0] sm:$0xf]  ;;  %v5620_v60 = vld [vmem:[#allocation5 + $0x1e4] sm:$0xf] }
 0x6dc   :  { %v4990_v63 = vor.u32 %v5621_v59, %v4989_v58  ;;  %v5610_v59 = vld [vmem:[#allocation5 + $0x194] sm:$0xf] }
 0x6dd   :  { %2435 = vmatpush.bf16.msra.mxu1 %v4902_v6  ;;  %v5618_v6 = vld [vmem:[#allocation5 + $0x1d4] sm:$0xf] }
 0x6de   :  { %2376 = vmatpush.bf16.msra.mxu2 %v4850_v5  ;;  %2414 = vmatpush.bf16.msrb.mxu0 %v4854_v54  ;;  %v4835_v5 = vld [vmem:[#allocation5 + $0x18] sm:$0xf0] }
 0x6df   :  { %v4838_v28 = vor.u32 %v5558_v45, %v4835_v5  ;;  %v4999_v54 = vld [vmem:[#allocation5 + $0x1f8] sm:$0xf0]  ;;  %v4981_v45 = vld [vmem:[#allocation5 + $0x1d0] sm:$0xf]  ;;  %v5619_v5 = vld [vmem:[#allocation5 + $0x1d4] sm:$0xf0] }
 0x6e0   :  { %v5002_v56 = vor.u32 %v5622_v50, %v4999_v54  ;;  %v5015_v50 = vld [vmem:[#allocation5 + $0x218] sm:$0xf0]  ;;  %v5611_v54 = vld [vmem:[#allocation5 + $0x194] sm:$0xf0] }
 0x6e1   :  { %2436 = vmatpush.bf16.msra.mxu1 %v4894_v35 }
 0x6e2   :  { %2377 = vmatpush.bf16.msra.mxu2 %v4842_v11  ;;  %2415 = vmatpush.bf16.msrb.mxu0 %v4846_v4 }
 0x6e6   :  { %2378 = vmatpush.bf16.msra.mxu2 %v4834_v26  ;;  %2416 = vmatpush.bf16.msrb.mxu0 %v4838_v28  ;;  %v4982_v28 = vor.u32 %v5619_v5, %v4981_v45  ;;  %v5624_v45 = vld [vmem:[#allocation5 + $0x204] sm:$0xf] }
 0x6ea   :  { %2379 = vmatpush.bf16.msra.mxu2 %v4826_v40  ;;  %2417 = vmatpush.bf16.msrb.mxu0 %v4830_v13  ;;  %v4934_v40 = vor.u32 %v5607_v39, %v4933_v18  ;;  %v4986_v13 = vor.u32 %v5618_v6, %v4983_v2  ;;  %v4957_v18 = vld [vmem:[#allocation5 + $0x1a0] sm:$0xf]  ;;  %v5613_v39 = vld [vmem:[#allocation5 + $0x1a4] sm:$0xf0]  ;;  %v5007_v6 = vld [vmem:[#allocation5 + $0x208] sm:$0xf0] }
 0x6eb   :  { %v4943_v2 = vld [vmem:[#allocation5 + $0x188] sm:$0xf0] }
 0x728   :  { %v2005_v12 = vpop.f32.mrf.mxu1 }
 0x72a   :  { %v1986_v7 = vpop.f32.mrf.mxu0 }
 0x72e   :  { %v1918_v30 = vpop.f32.mrf.mxu3 }
 0x730   :  { %v2007_v15 = vpop.f32.mrf.mxu1  ;;  %v1899_v21 = vpop.f32.mrf.mxu2 }
 0x731   :  { %v2016_v16 = vpack.c.bf16 %v2007_v15, %v2005_v12  ;;  %v4994_v12 = vor.u32 %v5620_v60, %v4991_v1  ;;  %v5034_v15 = vor.u32 %v5630_v14, %v5031_v38  ;;  %v4951_v60 = vld [vmem:[#allocation5 + $0x198] sm:$0xf0]  ;;  %v5005_v1 = vld [vmem:[#allocation5 + $0x200] sm:$0xf] }
 0x732   :  { %v1988_v17 = vpop.f32.mrf.mxu0  ;;  %v4941_v14 = vld [vmem:[#allocation5 + $0x180] sm:$0xf] }
 0x733   :  { %v2015_v19 = vpack.c.bf16 %v1988_v17, %v1986_v7  ;;  %4819 = vmatmul.msk.bf16.vlgmr.msrb.gmra.mxu3 %vm365_vm6, %v2016_v16  ;;  %4821 = vmatmul.msk.bf16.vlgmr.msrb.gmra.mxu1 %vm365_vm6, %v2016_v16  ;;  %v5029_v7 = vld [vmem:[#allocation5 + $0x230] sm:$0xf]  ;;  %v4973_v17 = vld [vmem:[#allocation5 + $0x1c0] sm:$0xf] }
 0x734   :  { %2495 = vmatpush.bf16.msrb.mxu3 %v6392_v10  ;;  %v5030_v35 = vor.u32 %v5631_v8, %v5029_v7  ;;  %v5010_v8 = vor.u32 %v5624_v45, %v5007_v6  ;;  %v2806_v45 = vld [vmem:[%s7009_s15 + $0x18] sm:$0xff] }
 0x735   :  { %2178 = vmatmul.bf16.vlgmr.msrb.gmra.mxu2 %v2015_v19  ;;  %2216 = vmatmul.bf16.vlgmr.msra.gmra.mxu0 %v2015_v19  ;;  %v5617_v19 = vld [vmem:[#allocation5 + $0x1c4] sm:$0xf0] }
 0x736   :  { %2476 = vmatpush.bf16.msrb.mxu2 %v6403_v55  ;;  %v1920_v10 = vpop.f32.mrf.mxu3  ;;  %2662 = vmatpush.bf16.msra.mxu0 %v4998_v3  ;;  %v4949_v3 = vld [vmem:[#allocation5 + $0x190] sm:$0xf] }
 0x737   :  { %v1929_v25 = vpack.c.bf16 %v1920_v10, %v1918_v30  ;;  %2685 = vmatpush.bf16.msrb.mxu1 %v5030_v35  ;;  %v5614_v10 = vld [vmem:[#allocation5 + $0x1b4] sm:$0xf]  ;;  %v4950_v58 = vor.u32 %v5611_v54, %v4949_v3  ;;  %v5608_v35 = vld [vmem:[#allocation5 + $0x184] sm:$0xf]  ;;  %v2812_v54 = vld [vmem:[%s7009_s15 + $0x48] sm:$0xff] }
 0x738   :  { %v2010_v11 = vpop.f32.mrf.mxu1  ;;  %v1901_v24 = vpop.f32.mrf.mxu2 }
 0x739   :  { %v1928_v26 = vpack.c.bf16 %v1901_v24, %v1899_v21  ;;  %v4965_v21 = vld [vmem:[#allocation5 + $0x1b0] sm:$0xf]  ;;  %v5021_v24 = vld [vmem:[#allocation5 + $0x220] sm:$0xf] }
 0x73a   :  { %v1991_v62 = vpop.f32.mrf.mxu0  ;;  %2663 = vmatpush.bf16.msra.mxu0 %v4990_v63  ;;  %v4954_v63 = vor.u32 %v5610_v59, %v4951_v60  ;;  %v2809_v59 = vld [vmem:[%s7009_s15 + $0x30] sm:$0xff] }
 0x73e   :  { %v1923_v55 = vpop.f32.mrf.mxu3  ;;  %2664 = vmatpush.bf16.msra.mxu0 %v4982_v28  ;;  %v5609_v28 = vld [vmem:[#allocation5 + $0x184] sm:$0xf0] }
 0x73f   :  { %v4942_v38 = vor.u32 %v5609_v28, %v4941_v14  ;;  %v2803_v28 = vld [vmem:[%s7009_s15] sm:$0xff] }
 0x740   :  { %v2012_v22 = vpop.f32.mrf.mxu1  ;;  %v1904_v27 = vpop.f32.mrf.mxu2 }
 0x741   :  { %v2018_v0 = vpack.c.bf16 %v2012_v22, %v2010_v11  ;;  %v5616_v11 = vld [vmem:[#allocation5 + $0x1c4] sm:$0xf]  ;;  %v4975_v22 = vld [vmem:[#allocation5 + $0x1c8] sm:$0xf0] }
 0x742   :  { %v1993_v20 = vpop.f32.mrf.mxu0 }
 0x743   :  { %v2017_v23 = vpack.c.bf16 %v1993_v20, %v1991_v62  ;;  %4820 = vmatmul.msk.bf16.gmra.mxu3 %vm365_vm6, %v2018_v0  ;;  %4822 = vmatmul.msk.bf16.gmra.mxu1 %vm365_vm6, %v2018_v0  ;;  %v4974_v62 = vor.u32 %v5617_v19, %v4973_v17  ;;  %v4978_v0 = vor.u32 %v5616_v11, %v4975_v22 }
 0x745   :  { %2183 = vmatmul.bf16.gmra.mxu2 %v2017_v23  ;;  %2221 = vmatmul.bf16.gmra.mxu0 %v2017_v23  ;;  %v5615_v23 = vld [vmem:[#allocation5 + $0x1b4] sm:$0xf0] }
 0x746   :  { %v1925_v29 = vpop.f32.mrf.mxu3  ;;  %2665 = vmatpush.bf16.msra.mxu0 %v4974_v62 }
 0x747   :  { %v1931_v33 = vpack.c.bf16 %v1925_v29, %v1923_v55  ;;  %v4966_v55 = vor.u32 %v5615_v23, %v4965_v21  ;;  %v5023_v29 = vld [vmem:[#allocation5 + $0x228] sm:$0xf0] }
 0x748   :  { %v1906_v31 = vpop.f32.mrf.mxu2 }
 0x749   :  { %v1930_v34 = vpack.c.bf16 %v1906_v31, %v1904_v27  ;;  %v4967_v31 = vld [vmem:[#allocation5 + $0x1b8] sm:$0xf0] }
 0x74a   :  { %2666 = vmatpush.bf16.msra.mxu0 %v4966_v55 }
 0x753   :  { %4919 = vmatmul.msk.bf16.vlgmr.msra.gmra.mxu3 %vm365_vm6, %v1929_v25  ;;  %4921 = vmatmul.msk.bf16.vlgmr.msra.gmra.mxu1 %vm365_vm6, %v1929_v25  ;;  %v5629_v25 = vld [vmem:[#allocation5 + $0x224] sm:$0xf0] }
 0x754   :  { %2723 = vmatpush.bf16.msra.mxu3 %v5034_v15  ;;  %v5022_v27 = vor.u32 %v5629_v25, %v5021_v24 }
 0x755   :  { %2380 = vmatmul.bf16.vlgmr.msra.gmra.mxu2 %v1928_v26  ;;  %2418 = vmatmul.bf16.vlgmr.msrb.gmra.mxu0 %v1928_v26  ;;  %v5628_v26 = vld [vmem:[#allocation5 + $0x224] sm:$0xf] }
 0x756   :  { %2700 = vmatpush.bf16.msra.mxu2 %v5002_v56  ;;  %2686 = vmatpush.bf16.msrb.mxu1 %v5022_v27  ;;  %v5018_v56 = vor.u32 %v5626_v61, %v5015_v50  ;;  %v2814_v61 = vld [vmem:[%s7009_s15 + $0x58] sm:$0xff]  ;;  %v2813_v50 = vld [vmem:[%s7009_s15 + $0x50] sm:$0xff] }
 0x75a   :  { %2701 = vmatpush.bf16.msra.mxu2 %v4994_v12  ;;  %v5625_v12 = vld [vmem:[#allocation5 + $0x204] sm:$0xf0] }
 0x75b   :  { %v5006_v5 = vor.u32 %v5625_v12, %v5005_v1  ;;  %v2807_v12 = vld [vmem:[%s7009_s15 + $0x20] sm:$0xff] }
 0x75e   :  { %2702 = vmatpush.bf16.msra.mxu2 %v4986_v13  ;;  %v4946_v13 = vor.u32 %v5608_v35, %v4943_v2  ;;  %v2827_v35 = vld [vmem:[%s7009_s15 + $0xc0] sm:$0xff] }
 0x762   :  { %2703 = vmatpush.bf16.msra.mxu2 %v4978_v0 }
 0x763   :  { %4920 = vmatmul.msk.bf16.gmra.mxu3 %vm365_vm6, %v1931_v33  ;;  %4922 = vmatmul.msk.bf16.gmra.mxu1 %vm365_vm6, %v1931_v33  ;;  %v5026_v33 = vor.u32 %v5628_v26, %v5023_v29 }
 0x765   :  { %2385 = vmatmul.bf16.gmra.mxu2 %v1930_v34  ;;  %2423 = vmatmul.bf16.gmra.mxu0 %v1930_v34  ;;  %v4970_v34 = vor.u32 %v5614_v10, %v4967_v31 }
 0x766   :  { %2724 = vmatpush.bf16.msra.mxu3 %v5026_v33 }
 0x767   :  { %2704 = vmatpush.bf16.msra.mxu2 %v4970_v34 }
 0x76a   :  { %2725 = vmatpush.bf16.msra.mxu3 %v5018_v56  ;;  %v2811_v56 = vld [vmem:[%s7009_s15 + $0x40] sm:$0xff] }
 0x76e   :  { %2726 = vmatpush.bf16.msra.mxu3 %v5010_v8  ;;  %v2804_v8 = vld [vmem:[%s7009_s15 + $0x8] sm:$0xff] }
 0x773   :  { %4937 = vmatmul.msk.bf16.vlgmr.msrb.gmra.mxu3 %vm1877_vm3, %v5606_v37 }
 0x775   :  { %4935 = vmatmul.msk.bf16.vlgmr.msrb.gmra.mxu2 %vm1877_vm3, %v5606_v37 }
 0x783   :  { %4938 = vmatmul.msk.bf16.gmra.mxu3 %vm1877_vm3, %v4934_v40 }
 0x785   :  { %4936 = vmatmul.msk.bf16.gmra.mxu2 %vm1877_vm3, %v4934_v40  ;;  %v5612_v40 = vld [vmem:[#allocation5 + $0x1a4] sm:$0xf] }
 0x7b0   :  { %v2236_v41 = vpop.f32.mrf.mxu1 }
 0x7b2   :  { %v2217_v42 = vpop.f32.mrf.mxu0 }
 0x7b3   :  { %v6450_v43 = vadd.f32 %v2236_v41, %v2217_v42  ;;  %v4958_v41 = vor.u32 %v5613_v39, %v4957_v18  ;;  %v4959_v42 = vld [vmem:[#allocation5 + $0x1a8] sm:$0xf0] }
 0x7b5   :  { %2667 = vmatpush.bf16.msra.mxu0 %v4958_v41  ;;  %v2818_v41 = vld [vmem:[%s7009_s15 + $0x78] sm:$0xff] }
 0x7b6   :  { %v6452_v44 = vpop.f32.mrf.mxu3 }
 0x7b8   :  { %v6454_v46 = vpop.f32.mrf.mxu2  ;;  %v6456_v47 = vpop.f32.mrf.mxu1 }
 0x7b9   :  { %2668 = vmatpush.bf16.msra.mxu0 %v4950_v58  ;;  %v2810_v58 = vld [vmem:[%s7009_s15 + $0x38] sm:$0xff] }
 0x7ba   :  { %v6458_v48 = vpop.f32.mrf.mxu0 }
 0x7bd   :  { %2669 = vmatpush.bf16.msra.mxu0 %v4942_v38  ;;  %v2826_v38 = vld [vmem:[%s7009_s15 + $0xb8] sm:$0xff] }
 0x7be   :  { %v2200_v49 = vpop.f32.mrf.mxu3 }
 0x7c0   :  { %v2181_v36 = vpop.f32.mrf.mxu2  ;;  %v2241_v32 = vpop.f32.mrf.mxu1 }
 0x7c1   :  { %v6460_v51 = vadd.f32 %v2200_v49, %v2181_v36  ;;  %v5013_v36 = vld [vmem:[#allocation5 + $0x210] sm:$0xf]  ;;  %2832 = vmatpush.msrb.mxu0 %v2818_v41 }
 0x7c2   :  { %v2222_v52 = vpop.f32.mrf.mxu0 }
 0x7c3   :  { %v6462_v53 = vadd.f32 %v2241_v32, %v2222_v52  ;;  %v5627_v32 = vld [vmem:[#allocation5 + $0x214] sm:$0xf0]  ;;  %v4962_v52 = vor.u32 %v5612_v40, %v4959_v42 }
 0x7c4   :  { %v5014_v9 = vor.u32 %v5627_v32, %v5013_v36  ;;  %v2817_v36 = vld [vmem:[%s7009_s15 + $0x70] sm:$0xff]  ;;  %v2816_v32 = vld [vmem:[%s7009_s15 + $0x68] sm:$0xff] }
 0x7c5   :  { %2705 = vmatpush.bf16.msra.mxu2 %v4962_v52  ;;  %2833 = vmatpush.msrb.mxu0 %v2817_v36  ;;  %v2815_v52 = vld [vmem:[%s7009_s15 + $0x60] sm:$0xff] }
 0x7c6   :  { %v6464_v57 = vpop.f32.mrf.mxu3  ;;  %2687 = vmatpush.bf16.msrb.mxu1 %v5014_v9 }
 0x7c7   :  { %2834 = vmatpush.msrb.mxu0 %v2816_v32 }
 0x7c8   :  { %v6466_v4 = vpop.f32.mrf.mxu2  ;;  %v6488_v33 = vpop.f32.mrf.mxu1 }
 0x7c9   :  { %2706 = vmatpush.bf16.msra.mxu2 %v4954_v63  ;;  %2835 = vmatpush.msrb.mxu0 %v2815_v52  ;;  %v2808_v63 = vld [vmem:[%s7009_s15 + $0x28] sm:$0xff] }
 0x7ca   :  { %2688 = vmatpush.bf16.msrb.mxu1 %v5006_v5  ;;  %v6490_v34 = vpop.f32.mrf.mxu0  ;;  %v2805_v5 = vld [vmem:[%s7009_s15 + $0x10] sm:$0xff] }
 0x7cb   :  { %2836 = vmatpush.msrb.mxu0 %v2814_v61 }
 0x7cd   :  { %2707 = vmatpush.bf16.msra.mxu2 %v4946_v13  ;;  %2837 = vmatpush.msrb.mxu0 %v2813_v50 }
 0x7ce   :  { %v2205_v16 = vpop.f32.mrf.mxu3 }
 0x7cf   :  { %2838 = vmatpush.msrb.mxu0 %v2812_v54 }
 0x7d0   :  { %v2186_v30 = vpop.f32.mrf.mxu2  ;;  %v6492_v18 = vpop.f32.mrf.mxu1 }
 0x7d1   :  { %v6468_v20 = vadd.f32 %v2205_v16, %v2186_v30  ;;  %2875 = vmatpush.msrb.mxu2 %v2818_v41  ;;  %2839 = vmatpush.msrb.mxu0 %v2811_v56 }
 0x7d2   :  { %v6494_v39 = vpop.f32.mrf.mxu0 }
 0x7d3   :  { %2876 = vmatpush.msrb.mxu2 %v2817_v36  ;;  %2840 = vmatpush.msrb.mxu0 %v2810_v58 }
 0x7d5   :  { %2877 = vmatpush.msrb.mxu2 %v2816_v32  ;;  %2841 = vmatpush.msrb.mxu0 %v2809_v59 }
 0x7d6   :  { %v6470_v37 = vpop.f32.mrf.mxu3 }
 0x7d7   :  { %2878 = vmatpush.msrb.mxu2 %v2815_v52  ;;  %2842 = vmatpush.msrb.mxu0 %v2808_v63 }
 0x7d8   :  { %v6472_v49 = vpop.f32.mrf.mxu2  ;;  %v6496_v40 = vpop.f32.mrf.mxu1 }
 0x7d9   :  { %2879 = vmatpush.msrb.mxu2 %v2814_v61  ;;  %2843 = vmatpush.msrb.mxu0 %v2807_v12 }
 0x7da   :  { %v6501_v42 = vpop.f32.mrf.mxu0 }
 0x7db   :  { %2880 = vmatpush.msrb.mxu2 %v2813_v50  ;;  %2844 = vmatpush.msrb.mxu0 %v2806_v45 }
 0x7dd   :  { %2881 = vmatpush.msrb.mxu2 %v2812_v54  ;;  %2845 = vmatpush.msrb.mxu0 %v2805_v5 }
 0x7de   :  { %v2402_v7 = vpop.f32.mrf.mxu3 }
 0x7df   :  { %2882 = vmatpush.msrb.mxu2 %v2811_v56  ;;  %2846 = vmatpush.msrb.mxu0 %v2804_v8 }
 0x7e0   :  { %v2383_v15 = vpop.f32.mrf.mxu2  ;;  %v6515_v9 = vpop.f32.mrf.mxu1 }
 0x7e1   :  { %v2384_v16 = vadd.f32 %v2383_v15, %v6460_v51  ;;  %2883 = vmatpush.msrb.mxu2 %v2810_v58  ;;  %2847 = vmatpush.msrb.mxu0 %v2803_v28  ;;  %v2825_v15 = vld [vmem:[%s7009_s15 + $0xb0] sm:$0xff] }
 0x7e2   :  { %v6520_v3 = vpop.f32.mrf.mxu0 }
 0x7e3   :  { %v6475_v17 = vadd.f32 %v2402_v7, %v2384_v16  ;;  %2884 = vmatpush.msrb.mxu2 %v2809_v59  ;;  %v2828_v7 = vld [vmem:[%s7009_s15 + $0xc8] sm:$0xff] }
 0x7e4   :  { %2858 = vmatpush.msra.mxu1 %v2828_v7 }
 0x7e5   :  { %2885 = vmatpush.msrb.mxu2 %v2808_v63 }
 0x7e6   :  { %v6477_v19 = vpop.f32.mrf.mxu3  ;;  %2859 = vmatpush.msra.mxu1 %v2827_v35 }
 0x7e7   :  { %2886 = vmatpush.msrb.mxu2 %v2807_v12 }
 0x7e8   :  { %v6479_v11 = vpop.f32.mrf.mxu2  ;;  %v6534_v60 = vpop.f32.mrf.mxu1  ;;  %2860 = vmatpush.msra.mxu1 %v2826_v38 }
 0x7e9   :  { %2887 = vmatpush.msrb.mxu2 %v2806_v45 }
 0x7ea   :  { %v6539_v1 = vpop.f32.mrf.mxu0  ;;  %2861 = vmatpush.msra.mxu1 %v2825_v15 }
 0x7eb   :  { %2888 = vmatpush.msrb.mxu2 %v2805_v5 }
 0x7ed   :  { %2889 = vmatpush.msrb.mxu2 %v2804_v8 }
 0x7ee   :  { %v2407_v62 = vpop.f32.mrf.mxu3 }
 0x7ef   :  { %2890 = vmatpush.msrb.mxu2 %v2803_v28 }
 0x7f0   :  { %v2388_v22 = vpop.f32.mrf.mxu2 }
 0x7f1   :  { %v2389_v30 = vadd.f32 %v2388_v22, %v6468_v20 }
 0x7f3   :  { %v6482_v0 = vadd.f32 %v2407_v62, %v2389_v30  ;;  %v2824_v62 = vld [vmem:[%s7009_s15 + $0xa8] sm:$0xff]  ;;  %v2823_v30 = vld [vmem:[%s7009_s15 + $0xa0] sm:$0xff] }
 0x7f4   :  { %2862 = vmatpush.msra.mxu1 %v2824_v62 }
 0x7f6   :  { %v2497_v21 = vpop.f32.mrf.mxu3  ;;  %2863 = vmatpush.msra.mxu1 %v2823_v30 }
 0x7f8   :  { %v2478_v23 = vpop.f32.mrf.mxu2 }
 0x7fe   :  { %v2499_v10 = vpop.f32.mrf.mxu3 }
 0x7ff   :  { %v2508_v24 = vpack.c.bf16 %v2499_v10, %v2497_v21  ;;  %v2822_v21 = vld [vmem:[%s7009_s15 + $0x98] sm:$0xff]  ;;  %v2821_v10 = vld [vmem:[%s7009_s15 + $0x90] sm:$0xff] }
 0x800   :  { %v2480_v25 = vpop.f32.mrf.mxu2  ;;  %2864 = vmatpush.msra.mxu1 %v2822_v21 }
 0x801   :  { %v2507_v51 = vpack.c.bf16 %v2480_v25, %v2478_v23  ;;  %5035 = vmatmul.msk.bf16.vlgmr.msrb.gmra.mxu1 %vm365_vm6, %v2508_v24  ;;  %5037 = vmatmul.msk.bf16.vlgmr.msra.gmra.mxu3 %vm365_vm6, %v2508_v24  ;;  %v2199_v24 = vadd.f32 %v6452_v44, %v6454_v46  ;;  %v2204_v25 = vadd.f32 %v6464_v57, %v6466_v4  ;;  %v2819_v57 = vld [vmem:[%s7009_s15 + $0x80] sm:$0xff] }
 0x802   :  { %2865 = vmatpush.msra.mxu1 %v2821_v10 }
 0x803   :  { %2670 = vmatmul.bf16.vlgmr.msra.gmra.mxu0 %v2507_v51  ;;  %2708 = vmatmul.bf16.vlgmr.msra.gmra.mxu2 %v2507_v51 }
 0x804   :  { %2901 = vmatpush.msra.mxu0 %v2828_v7 }
 0x806   :  { %v2502_v26 = vpop.f32.mrf.mxu3  ;;  %2902 = vmatpush.msra.mxu0 %v2827_v35 }
 0x808   :  { %v2483_v55 = vpop.f32.mrf.mxu2  ;;  %2903 = vmatpush.msra.mxu0 %v2826_v38 }
 0x80a   :  { %2904 = vmatpush.msra.mxu0 %v2825_v15 }
 0x80c   :  { %2905 = vmatpush.msra.mxu0 %v2824_v62 }
 0x80e   :  { %v2504_v27 = vpop.f32.mrf.mxu3  ;;  %2906 = vmatpush.msra.mxu0 %v2823_v30 }
 0x80f   :  { %v2510_v29 = vpack.c.bf16 %v2504_v27, %v2502_v26  ;;  %v2820_v27 = vld [vmem:[%s7009_s15 + $0x88] sm:$0xff]  ;;  %s4208_s15 = sshll.u32 %s7016_s22, 4  ;;  %s4209_s15 = int_to_ptr.hbm [resolvable:$true] %s4208_s15 }
 0x810   :  { %v2485_v31 = vpop.f32.mrf.mxu2  ;;  %2907 = vmatpush.msra.mxu0 %v2822_v21  ;;  %2866 = vmatpush.msra.mxu1 %v2820_v27 }
 0x811   :  { %v2509_v20 = vpack.c.bf16 %v2485_v31, %v2483_v55  ;;  %5036 = vmatmul.msk.bf16.gmra.mxu1 %vm365_vm6, %v2510_v29  ;;  %5038 = vmatmul.msk.bf16.gmra.mxu3 %vm365_vm6, %v2510_v29  ;;  %v2239_v55 = vadd.f32 %v6456_v47, %v6458_v48  ;;  %v2382_v29 = vadd.f32 %v6472_v49, %v2199_v24  ;;  %vm2763_vm6 = vcmask 648192  }
 0x812   :  { %v2387_v31 = vadd.f32 %v6479_v11, %v2204_v25  ;;  %2908 = vmatpush.msra.mxu0 %v2821_v10  ;;  %v2420_v47 = vadd.f32 %v6494_v39, %v6450_v43  ;;  %2867 = vmatpush.msra.mxu1 %v2819_v57  ;;  %v2425_v49 = vadd.f32 %v6520_v3, %v6462_v53 }
 0x813   :  { %2675 = vmatmul.bf16.gmra.mxu0 %v2509_v20  ;;  %2713 = vmatmul.bf16.gmra.mxu2 %v2509_v20  ;;  %v2422_v46 = vadd.f32 %v6501_v42, %v2239_v55  ;;  %v2401_v41 = vadd.f32 %v6470_v37, %v2382_v29  ;;  %v2244_v37 = vadd.f32 %v6488_v33, %v6490_v34 }
 0x814   :  { %2909 = vmatpush.msra.mxu0 %v2820_v27  ;;  %v2406_v36 = vadd.f32 %v6477_v19, %v2387_v31  ;;  %v2439_v39 = vadd.f32 %v6492_v18, %v2420_v47  ;;  %v2444_v19 = vadd.f32 %v6515_v9, %v2425_v49 }
 0x815   :  { %v2441_v43 = vadd.f32 %v6496_v40, %v2422_v46  ;;  %v2427_v58 = vadd.f32 %v6539_v1, %v2244_v37 }
 0x816   :  { %2910 = vmatpush.msra.mxu0 %v2819_v57 }
 0x87e   :  { %v2690_v6 = vpop.f32.mrf.mxu1 }
 0x880   :  { %v2671_v14 = vpop.f32.mrf.mxu0 }
 0x881   :  { %v2691_v48 = vadd.f32 %v2690_v6, %v2671_v14 }
 0x883   :  { %v6606_v61 = vadd.f32 %v2691_v48, %v2401_v41 }
 0x884   :  { %v2728_v2 = vpop.f32.mrf.mxu3 }
 0x885   :  { %v2772_v33 = vmul.f32 %v6606_v61, %v6606_v61 }
 0x886   :  { %v2692_v13 = vpop.f32.mrf.mxu1  ;;  %v2709_v16 = vpop.f32.mrf.mxu2 }
 0x887   :  { %v2729_v42 = vadd.f32 %v2728_v2, %v2709_v16 }
 0x888   :  { %v2673_v22 = vpop.f32.mrf.mxu0 }
 0x889   :  { %v2693_v20 = vadd.f32 %v2692_v13, %v2673_v22  ;;  %v6615_v54 = vadd.f32 %v2729_v42, %v2439_v39 }
 0x88b   :  { %v6602_v32 = vadd.f32 %v2693_v20, %v6475_v17  ;;  %v2773_v1 = vmul.f32 %v6615_v54, %v6615_v54  ;;  %v2758_v35 = vsel %vm2757_vm5, %v6615_v54, 0.0 }
 0x88c   :  { %v2730_v23 = vpop.f32.mrf.mxu3 }
 0x88d   :  { %v2774_v40 = vmul.f32 %v6602_v32, %v6602_v32  ;;  %v2746_v34 = vadd.f32 %v6602_v32, %v6606_v61 }
 0x88e   :  { %v2695_v51 = vpop.f32.mrf.mxu1  ;;  %v2711_v26 = vpop.f32.mrf.mxu2 }
 0x88f   :  { %v2731_v11 = vadd.f32 %v2730_v23, %v2711_v26  ;;  %v2780_v5 = vadd.f32 %v2774_v40, %v2772_v33 }
 0x890   :  { %v2676_v44 = vpop.f32.mrf.mxu0 }
 0x891   :  { %v2696_v4 = vadd.f32 %v2695_v51, %v2676_v44  ;;  %v6613_v3 = vadd.f32 %v2731_v11, %v2441_v43 }
 0x893   :  { %v6608_v50 = vadd.f32 %v2696_v4, %v2406_v36  ;;  %v2775_v12 = vmul.f32 %v6613_v3, %v6613_v3  ;;  %v2759_v7 = vsel %vm2757_vm5, %v6613_v3, 0.0 }
 0x894   :  { %v2733_v52 = vpop.f32.mrf.mxu3  ;;  %v2760_v21 = vadd.f32 %v2759_v7, %v2758_v35 }
 0x895   :  { %v2776_v9 = vmul.f32 %v6608_v50, %v6608_v50  ;;  %v2747_v6 = vadd.f32 %v2746_v34, %v6608_v50  ;;  %v2791_v16 = vsel %vm2757_vm5, %v2775_v12, 0.0  ;;  %v2935_v12 = vld [vmem:[%s7010_s16] sm:$0xff] }
 0x896   :  { %v2714_v53 = vpop.f32.mrf.mxu2  ;;  %v2697_v56 = vpop.f32.mrf.mxu1 }
 0x897   :  { %v2734_v17 = vadd.f32 %v2733_v52, %v2714_v53  ;;  %v2781_v38 = vadd.f32 %v2780_v5, %v2776_v9  ;;  %v2937_v9 = vld [vmem:[%s7010_s16 + $0x10] sm:$0xff]  ;;  %v2936_v5 = vld [vmem:[%s7010_s16 + $0x8] sm:$0xff] }
 0x898   :  { %v2678_v18 = vpop.f32.mrf.mxu0  ;;  %2957 = vmatpush.msrb.mxu1 %v2937_v9 }
 0x899   :  { %v6620_v59 = vadd.f32 %v2734_v17, %v2444_v19  ;;  %v2698_v63 = vadd.f32 %v2697_v56, %v2678_v18 }
 0x89a   :  { %2958 = vmatpush.msrb.mxu1 %v2935_v12 }
 0x89b   :  { %v6631_v45 = vadd.f32 %v2698_v63, %v6482_v0  ;;  %v2777_v8 = vmul.f32 %v6620_v59, %v6620_v59  ;;  %v2446_v0 = vadd.f32 %v6534_v60, %v2427_v58  ;;  %v2761_v62 = vsel %vm2757_vm5, %v6620_v59, 0.0 }
 0x89c   :  { %v2735_v15 = vpop.f32.mrf.mxu3  ;;  %v2790_v60 = vsel %vm2757_vm5, %v2773_v1, 0.0  ;;  %v2762_v26 = vadd.f32 %v2761_v62, %v2760_v21  ;;  %v2938_v1 = vld [vmem:[%s7010_s16 + $0x18] sm:$0xff]  ;;  %v2919_v21 = vld [vmem:[%s7011_s17] sm:$0x1] }
 0x89d   :  { %v2749_v14 = vsel %vm2748_vm4, %v6631_v45, 0.0  ;;  %v2778_v28 = vmul.f32 %v6631_v45, %v6631_v45  ;;  %v2793_v24 = vsel %vm2757_vm5, %v2777_v8, 0.0  ;;  %v2792_v51 = vadd.f32 %v2791_v16, %v2790_v60  ;;  %3020 = vmatpush.msrb.mxu3 %v2938_v1 }
 0x89e   :  { %v2750_v2 = vadd.f32 %v2749_v14, %v2747_v6  ;;  %v2716_v13 = vpop.f32.mrf.mxu2 }
 0x89f   :  { %v2782_v22 = vsel %vm2748_vm4, %v2778_v28, 0.0  ;;  %v2736_v30 = vadd.f32 %v2735_v15, %v2716_v13  ;;  %v2794_v20 = vadd.f32 %v2793_v24, %v2792_v51  ;;  %3021 = vmatpush.msrb.mxu3 %v2936_v5  ;;  %v2932_v24 = vld [vmem:[%s7012_s18] sm:$0x1] }
 0x8a0   :  { %v2751_v23 = vrot.slane %v2750_v2, 4  ;;  %v2783_v10 = vadd.f32 %v2782_v22, %v2781_v38 }
 0x8a1   :  { %v6653_v25 = vadd.f32 %v2736_v30, %v2446_v0 }
 0x8a2   :  { %v2752_v55 = vadd.f32 %v2751_v23, %v2750_v2  ;;  %v2784_v27 = vrot.slane %v2783_v10, 4 }
 0x8a3   :  { %v2764_v29 = vsel %vm2763_vm6, %v6653_v25, 0.0  ;;  %v2779_v31 = vmul.f32 %v6653_v25, %v6653_v25 }
 0x8a4   :  { %v2753_v44 = vrot.slane %v2752_v55, 2  ;;  %v2785_v46 = vadd.f32 %v2784_v27, %v2783_v10  ;;  %v2765_v57 = vadd.f32 %v2764_v29, %v2762_v26 }
 0x8a5   :  { %v2795_v47 = vsel %vm2763_vm6, %v2779_v31, 0.0 }
 0x8a6   :  { %v2754_v48 = vadd.f32 %v2753_v44, %v2752_v55  ;;  %v2786_v4 = vrot.slane %v2785_v46, 2  ;;  %v2766_v49 = vrot.slane %v2765_v57, 4  ;;  %v2796_v11 = vadd.f32 %v2795_v47, %v2794_v20 }
 0x8a8   :  { %v2767_v41 = vadd.f32 %v2766_v49, %v2765_v57  ;;  %v2797_v36 = vrot.slane %v2796_v11, 4  ;;  %v2755_v42 = vrot.slane %v2754_v48, 1  ;;  %v2787_v52 = vadd.f32 %v2786_v4, %v2785_v46 }
 0x8aa   :  { %v2768_v43 = vrot.slane %v2767_v41, 2  ;;  %v2798_v39 = vadd.f32 %v2797_v36, %v2796_v11  ;;  %v2756_v53 = vadd.f32 %v2755_v42, %v2754_v48  ;;  %v2788_v37 = vrot.slane %v2787_v52, 1 }
 0x8ac   :  { %v2769_v19 = vadd.f32 %v2768_v43, %v2767_v41  ;;  %v2799_v17 = vrot.slane %v2798_v39, 2  ;;  %2848 = vmatmul.f32.vlgmr.msrb.gmra.mxu0 %v2756_v53  ;;  %v2789_v40 = vadd.f32 %v2788_v37, %v2787_v52 }
 0x8ae   :  { %v2770_v56 = vrot.slane %v2769_v19, 1  ;;  %v2800_v18 = vadd.f32 %v2799_v17, %v2798_v39  ;;  %2891 = vmatmul.f32.vlgmr.msrb.gmra.mxu2 %v2789_v40 }
 0x8b0   :  { %v2771_v58 = vadd.f32 %v2770_v56, %v2769_v19  ;;  %v2801_v63 = vrot.slane %v2800_v18, 1 }
 0x8b2   :  { %v2802_v33 = vadd.f32 %v2801_v63, %v2800_v18  ;;  %5039 = vmatmul.msk.f32.vlgmr.msra.gmra.mxu1 %vm2757_vm5, %v2771_v58  ;;  %v5648_v63 = vld [vmem:[%s7013_s19 + $0x1c] sm:$0xff] }
 0x8b3   :  { %2977 = vmatpush.msra.mxu1 %v2938_v1  ;;  %v5632_v1 = vld [vmem:[%s7013_s19] sm:$0xff] }
 0x8b4   :  { %5040 = vmatmul.msk.f32.vlgmr.msra.gmra.mxu0 %vm2757_vm5, %v2802_v33 }
 0x8b5   :  { %2978 = vmatpush.msra.mxu1 %v2936_v5  ;;  %v5658_v5 = vld [vmem:[%s7014_s20 + $0xa0] sm:$0xff] }
 0x929   :  { %v2849_v34 = vpop.f32.mrf.mxu0 }
 0x92f   :  { %v2869_v6 = vpop.f32.mrf.mxu1 }
 0x930   :  { %v2870_v7 = vadd.f32 %v2869_v6, %v2849_v34 }
 0x931   :  { %v2892_v8 = vpop.f32.mrf.mxu2  ;;  %v2912_v14 = vpop.f32.mrf.mxu0 }
 0x932   :  { %v2915_v28 = vmul.f32 0.00295858, %v2870_v7  ;;  %v2913_v0 = vadd.f32 %v2912_v14, %v2892_v8  ;;  %v5661_v7 = vld [vmem:[%s7014_s20 + $0xb8] sm:$0xff]  ;;  %v5660_v14 = vld [vmem:[%s7014_s20 + $0xb0] sm:$0xff] }
 0x933   :  { %v5657_v8 = vld [vmem:[%s7014_s20 + $0x98] sm:$0xff] }
 0x934   :  { %v2917_v35 = vmul.f32 %v2915_v28, %v2915_v28  ;;  %v2916_v38 = vmul.f32 0.00295858, %v2913_v0  ;;  %v5659_v0 = vld [vmem:[%s7014_s20 + $0xa8] sm:$0xff] }
 0x936   :  { %v2918_v2 = vsub.f32 %v2916_v38, %v2917_v35  ;;  %v5655_v35 = vld [vmem:[%s7014_s20 + $0x88] sm:$0xff] }
 0x937   :  { %v5649_v38 = vld [vmem:[%s7013_s19 + $0x24] sm:$0xff] }
 0x938   :  { %v2920_v15 = vadd.f32 1e-05, %v2918_v2  ;;  %v5633_v2 = vld [vmem:[%s7013_s19 + $0x8] sm:$0xff] }
 0x93a   :  { %5706 = vrsqrt.f32 %v2920_v15  ;;  %vm2927_vm8 = vweird.f32 %v2920_v15 }
 0x940   :  { %v5707_v13 = vpop.eup %5706 }
 0x941   :  { %v2922_v16 = vmul.f32 %v5707_v13, %v2920_v15  ;;  %vm2928_vm7 = vweird.f32 %v5707_v13  ;;  %v5654_v15 = vld [vmem:[%s7014_s20 + $0x80] sm:$0xff] }
 0x942   :  { %vm2929_vm9 = vmor %vm2927_vm8, %vm2928_vm7 }
 0x943   :  { %v2923_v62 = vmul.f32 %v5707_v13, %v2922_v16  ;;  %v5642_v16 = vld [vmem:[%s7014_s20 + $0x38] sm:$0xff] }
 0x945   :  { %v2924_v22 = vmul.f32 0.5, %v2923_v62  ;;  %v5652_v62 = vld [vmem:[%s7014_s20 + $0x70] sm:$0xff] }
 0x947   :  { %v2925_v30 = vsub.f32 1.5, %v2924_v22  ;;  %v5647_v22 = vld [vmem:[%s7014_s20 + $0x60] sm:$0xff] }
 0x949   :  { %v2926_v23 = vmul.f32 %v5707_v13, %v2925_v30  ;;  %v5641_v30 = vld [vmem:[%s7014_s20 + $0x30] sm:$0xff] }
 0x94b   :  { %v2930_v10 = vsel %vm2929_vm9, %v5707_v13, %v2926_v23  ;;  %v5653_v13 = vld [vmem:[%s7014_s20 + $0x78] sm:$0xff]  ;;  %v5650_v23 = vld [vmem:[%s7013_s19 + $0x2c] sm:$0xff] }
 0x94c   :  { %v2931_v60 = vmul.f32 %v2930_v10, %v2919_v21  ;;  %v5651_v21 = vld [vmem:[%s7014_s20 + $0x68] sm:$0xff] }
 0x94d   :  { %v5640_v10 = vld [vmem:[%s7014_s20 + $0x28] sm:$0xff] }
 0x94e   :  { %v2933_v51 = vmul.f32 %v2931_v60, %v2915_v28  ;;  %5041 = vmatmul.msk.f32.vlgmr.msrb.gmra.mxu1 %vm2939_vm10, %v2931_v60  ;;  %v5656_v28 = vld [vmem:[%s7014_s20 + $0x90] sm:$0xff] }
 0x94f   :  { %3000 = vmatpush.msrb.mxu1 %v2937_v9 }
 0x950   :  { %v2934_v26 = vsub.f32 %v2932_v24, %v2933_v51  ;;  %v5639_v24 = vld [vmem:[%s7014_s20 + $0x20] sm:$0xff]  ;;  %v5071_v51 = vld [vmem:[%s7013_s19 + $0x34] sm:$0xf] }
 0x951   :  { %3001 = vmatpush.msrb.mxu1 %v2935_v12  ;;  %v5662_v12 = vld [vmem:[%s7014_s20 + $0xc0] sm:$0xff] }
 0x952   :  { %5044 = vmatmul.msk.f32.vlgmr.msrb.gmra.mxu3 %vm2939_vm10, %v2934_v26 }
 0x956   :  { %5042 = vmatmul.msk.f32.vlgmr.msra.gmra.mxu1 %vm2939_vm10, %v2931_v60  ;;  %v5634_v60 = vld [vmem:[%s7013_s19 + $0x10] sm:$0xff] }
 0x95e   :  { %5043 = vmatmul.msk.f32.vlgmr.msrb.gmra.mxu1 %vm2939_vm10, %v2934_v26  ;;  %v5638_v26 = vld [vmem:[%s7014_s20 + $0x18] sm:$0xff] }
 0x9cb   :  { %v2960_v55 = vpop.f32.mrf.mxu1 }
 0x9cc   :  { %v3026_v48 = vperm.slane %v2960_v55, 0  ;;  %v3213_v55 = vunpack.c.l.b16 %v5071_v51  ;;  %v5666_v51 = vld [vmem:[%s7013_s19 + $0x48] sm:$0xff] }
 0x9ce   :  { %v3032_v43 = vmul.f32 %v3026_v48, %v6608_v50  ;;  %v3034_v39 = vmul.f32 %v3026_v48, %v6631_v45 }
 0x9d3   :  { %v2980_v27 = vpop.f32.mrf.mxu1 }
 0x9d4   :  { %v3027_v29 = vperm.slane %v2980_v27, 0  ;;  %v3064_v27 = vld [vmem:[%s7013_s19 + $0x18] sm:$0xf] }
 0x9d5   :  { %v3023_v31 = vpop.f32.mrf.mxu3 }
 0x9d6   :  { %v3029_v20 = vmul.f32 %v3027_v29, %v6615_v54  ;;  %v3031_v44 = vmul.f32 %v3027_v29, %v6613_v3  ;;  %v3033_v46 = vmul.f32 %v3027_v29, %v6620_v59  ;;  %v3035_v57 = vmul.f32 %v3027_v29, %v6653_v25 }
 0x9d7   :  { %v3037_v47 = vperm.slane %v3023_v31, 0  ;;  %v3028_v3 = vmul.f32 %v3026_v48, %v6606_v61  ;;  %v3030_v59 = vmul.f32 %v3026_v48, %v6602_v32  ;;  %v5663_v32 = vld [vmem:[%s7014_s20 + $0xc8] sm:$0xff]  ;;  %v3078_v29 = vunpack.c.l.b16 %v3064_v27 }
 0x9d8   :  { %v3217_v31 = vpack.c.b16 %v3213_v55, %v3213_v55  ;;  %v5644_v48 = vld [vmem:[%s7014_s20 + $0x48] sm:$0xff] }
 0x9d9   :  { %v3043_v4 = vadd.f32 %v3037_v47, %v3033_v46  ;;  %v3045_v49 = vadd.f32 %v3037_v47, %v3035_v57  ;;  %v3039_v11 = vadd.f32 %v3037_v47, %v3029_v20  ;;  %v3041_v41 = vadd.f32 %v3037_v47, %v3031_v44  ;;  %v5646_v44 = vld [vmem:[%s7014_s20 + $0x58] sm:$0xff]  ;;  %v5637_v46 = vld [vmem:[%s7014_s20 + $0x10] sm:$0xff]  ;;  %v5636_v47 = vld [vmem:[%s7014_s20 + $0x8] sm:$0xff] }
 0x9da   :  { %v3082_v20 = vpack.c.b16 %v3078_v29, %v3078_v29  ;;  %v5645_v57 = vld [vmem:[%s7014_s20 + $0x50] sm:$0xff]  ;;  %v5674_v29 = vld [vmem:[%s7014_s20 + $0x108] sm:$0xff] }
 0x9db   :  { %v3003_v36 = vpop.f32.mrf.mxu1  ;;  %v3051_v42 = vmax.f32 %v3043_v4, 0.0  ;;  %v3053_v52 = vmax.f32 %v3045_v49, 0.0  ;;  %v3047_v25 = vmax.f32 %v3039_v11, 0.0  ;;  %v3049_v37 = vmax.f32 %v3041_v41, 0.0  ;;  %v5635_v4 = vld [vmem:[%s7014_s20] sm:$0xff] }
 0x9dc   :  { %v3036_v54 = vperm.slane %v3003_v36, 0  ;;  %v5643_v49 = vld [vmem:[%s7014_s20 + $0x40] sm:$0xff] }
 0x9dd   :  { %v3057_v53 = vpack.c.bf16 %v3053_v52, %v3051_v42  ;;  %v6694_v61 = vpack.c.bf16 %v3049_v37, %v3047_v25 }
 0x9de   :  { %v3042_v19 = vadd.f32 %v3036_v54, %v3032_v43  ;;  %v3044_v17 = vadd.f32 %v3036_v54, %v3034_v39  ;;  %v3038_v40 = vadd.f32 %v3036_v54, %v3028_v3  ;;  %v3040_v56 = vadd.f32 %v3036_v54, %v3030_v59 }
 0x9df   :  { %v6687_v18 = vsel %vm166_vm2, %v3057_v53, 0 }
 0x9e0   :  { %3136 = vmatpush.bf16.msra.mxu1 %v6687_v18  ;;  %3264 = vmatpush.bf16.msra.mxu3 %v6687_v18  ;;  %v3050_v50 = vmax.f32 %v3042_v19, 0.0  ;;  %v3052_v45 = vmax.f32 %v3044_v17, 0.0  ;;  %v3046_v33 = vmax.f32 %v3038_v40, 0.0  ;;  %v3048_v34 = vmax.f32 %v3040_v56, 0.0 }
 0x9e2   :  { %v3056_v58 = vpack.c.bf16 %v3052_v45, %v3050_v50  ;;  %v6716_v6 = vpack.c.bf16 %v3048_v34, %v3046_v33 }
 0x9e4   :  { %3137 = vmatpush.bf16.msra.mxu1 %v6694_v61  ;;  %3265 = vmatpush.bf16.msra.mxu3 %v6694_v61  ;;  %v6702_v9 = vsel %vm166_vm2, %v3056_v58, 0 }
 0x9e5   :  { %3108 = vmatpush.bf16.msrb.mxu0 %v6702_v9  ;;  %3236 = vmatpush.bf16.msra.mxu2 %v6702_v9 }
 0x9e7   :  { %5088 = vmatmul.msk.bf16.vlgmr.msra.gmra.mxu3 %vm3083_vm11, %v5648_v63  ;;  %5061 = vmatmul.msk.bf16.vlgmr.msra.gmra.mxu1 %vm3083_vm11, %v5632_v1 }
 0x9e8   :  { %3442 = vmatpush.bf16.msrb.mxu1 %v5663_v32  ;;  %3588 = vmatpush.bf16.msrb.mxu3 %v5647_v22 }
 0x9e9   :  { %3109 = vmatpush.bf16.msrb.mxu0 %v6716_v6  ;;  %3237 = vmatpush.bf16.msra.mxu2 %v6716_v6 }
 0x9ec   :  { %3443 = vmatpush.bf16.msrb.mxu1 %v5662_v12  ;;  %5057 = vmatmul.msk.bf16.vlgmr.msrb.gmra.mxu0 %vm3083_vm11, %v5632_v1 }
 0x9ed   :  { %3411 = vmatpush.bf16.msra.mxu0 %v5658_v5  ;;  %5084 = vmatmul.msk.bf16.vlgmr.msra.gmra.mxu2 %vm3083_vm11, %v5648_v63 }
 0x9ee   :  { %3557 = vmatpush.bf16.msrb.mxu2 %v5642_v16  ;;  %3589 = vmatpush.bf16.msrb.mxu3 %v5646_v44  ;;  %v5673_v44 = vld [vmem:[%s7014_s20 + $0x100] sm:$0xff] }
 0x9f0   :  { %3444 = vmatpush.bf16.msrb.mxu1 %v5661_v7 }
 0x9f1   :  { %3412 = vmatpush.bf16.msra.mxu0 %v5657_v8 }
 0x9f2   :  { %3558 = vmatpush.bf16.msrb.mxu2 %v5641_v30  ;;  %3590 = vmatpush.bf16.msrb.mxu3 %v5645_v57 }
 0x9f4   :  { %3445 = vmatpush.bf16.msrb.mxu1 %v5660_v14 }
 0x9f5   :  { %3413 = vmatpush.bf16.msra.mxu0 %v5656_v28 }
 0x9f6   :  { %3559 = vmatpush.bf16.msrb.mxu2 %v5640_v10  ;;  %3591 = vmatpush.bf16.msrb.mxu3 %v5644_v48 }
 0x9f7   :  { %5089 = vmatmul.msk.bf16.gmra.mxu3 %vm3083_vm11, %v5649_v38  ;;  %5062 = vmatmul.msk.bf16.gmra.mxu1 %vm3083_vm11, %v5633_v2 }
 0x9f8   :  { %3446 = vmatpush.bf16.msrb.mxu1 %v5659_v0 }
 0x9f9   :  { %3414 = vmatpush.bf16.msra.mxu0 %v5655_v35 }
 0x9fa   :  { %3560 = vmatpush.bf16.msrb.mxu2 %v5639_v24  ;;  %3592 = vmatpush.bf16.msrb.mxu3 %v5643_v49  ;;  %v5665_v24 = vld [vmem:[%s7013_s19 + $0x40] sm:$0xff] }
 0x9fc   :  { %3685 = vmatpush.bf16.msra.mxu1 %v6687_v18  ;;  %5058 = vmatmul.msk.bf16.gmra.mxu0 %vm3083_vm11, %v5633_v2 }
 0x9fd   :  { %3415 = vmatpush.bf16.msra.mxu0 %v5654_v15  ;;  %5085 = vmatmul.msk.bf16.gmra.mxu2 %vm3083_vm11, %v5649_v38 }
 0x9fe   :  { %3561 = vmatpush.bf16.msrb.mxu2 %v5638_v26  ;;  %v5236_v26 = vld [vmem:[%s7013_s19 + $0x50] sm:$0xf] }
 0x9ff   :  { %v3634_v55 = vunpack.c.l.b16 %v5236_v26 }
 0xa00   :  { %3686 = vmatpush.bf16.msra.mxu1 %v6694_v61 }
 0xa01   :  { %3416 = vmatpush.bf16.msra.mxu0 %v5653_v13  ;;  %v3638_v27 = vpack.c.b16 %v3634_v55, %v3634_v55 }
 0xa02   :  { %3562 = vmatpush.bf16.msrb.mxu2 %v5637_v46 }
 0xa05   :  { %3417 = vmatpush.bf16.msra.mxu0 %v5652_v62 }
 0xa06   :  { %3563 = vmatpush.bf16.msrb.mxu2 %v5636_v47  ;;  %v5678_v47 = vld [vmem:[%s7014_s20 + $0x128] sm:$0xff] }
 0xa07   :  { %5090 = vmatmul.msk.bf16.gmra.mxu3 %vm3083_vm11, %v5650_v23  ;;  %5063 = vmatmul.msk.bf16.gmra.mxu1 %vm3083_vm11, %v5634_v60 }
 0xa09   :  { %3418 = vmatpush.bf16.msra.mxu0 %v5651_v21 }
 0xa0a   :  { %3564 = vmatpush.bf16.msrb.mxu2 %v5635_v4 }
 0xa0c   :  { %5059 = vmatmul.msk.bf16.gmra.mxu0 %vm3083_vm11, %v5634_v60  ;;  %v5664_v60 = vld [vmem:[%s7013_s19 + $0x38] sm:$0xff] }
 0xa0d   :  { %3657 = vmatpush.bf16.msrb.mxu0 %v6702_v9  ;;  %5086 = vmatmul.msk.bf16.gmra.mxu2 %vm3083_vm11, %v5650_v23 }
 0xa0e   :  { %3832 = vmatpush.bf16.msra.mxu2 %v5674_v29 }
 0xa11   :  { %3658 = vmatpush.bf16.msrb.mxu0 %v6716_v6 }
 0xa12   :  { %3833 = vmatpush.bf16.msra.mxu2 %v5673_v44 }
 0xa17   :  { %5091 = vmatmul.msk.bf16.gmra.mxu3 %vm3083_vm11, %v3217_v31  ;;  %5064 = vmatmul.msk.bf16.gmra.mxu1 %vm3083_vm11, %v3082_v20 }
 0xa1c   :  { %5060 = vmatmul.msk.bf16.gmra.mxu0 %vm3083_vm11, %v3082_v20  ;;  %v5680_v20 = vld [vmem:[%s7013_s19 + $0x54] sm:$0xff] }
 0xa1d   :  { %5087 = vmatmul.msk.bf16.gmra.mxu2 %vm3083_vm11, %v3217_v31  ;;  %v5679_v31 = vld [vmem:[%s7014_s20 + $0x130] sm:$0xff] }
 0xa1e   :  { %3863 = vmatpush.bf16.msra.mxu3 %v5679_v31  ;;  %v5690_v31 = vld [vmem:[%s7014_s20 + $0x170] sm:$0xff] }
 0xa22   :  { %3864 = vmatpush.bf16.msra.mxu3 %v5678_v47 }
 0xa64   :  { %v3139_v11 = vpop.f32.mrf.mxu1 }
 0xa69   :  { %v3111_v41 = vpop.f32.mrf.mxu0 }
 0xa6a   :  { %v3267_v36 = vpop.f32.mrf.mxu3 }
 0xa6c   :  { %v3141_v42 = vpop.f32.mrf.mxu1 }
 0xa6d   :  { %v3159_v52 = vpack.c.bf16 %v3141_v42, %v3139_v11  ;;  %v5672_v11 = vld [vmem:[%s7014_s20 + $0xf8] sm:$0xff] }
 0xa6e   :  { %3834 = vmatpush.bf16.msra.mxu2 %v5672_v11  ;;  %v5689_v11 = vld [vmem:[%s7014_s20 + $0x168] sm:$0xff] }
 0xa6f   :  { %5226 = vmatmul.msk.bf16.vlgmr.msrb.gmra.mxu3 %vm2757_vm5, %v3159_v52 }
 0xa70   :  { %v3239_v43 = vpop.f32.mrf.mxu2 }
 0xa71   :  { %v3113_v39 = vpop.f32.mrf.mxu0 }
 0xa72   :  { %v3269_v54 = vpop.f32.mrf.mxu3  ;;  %v3158_v3 = vpack.c.bf16 %v3113_v39, %v3111_v41 }
 0xa73   :  { %v3287_v59 = vpack.c.bf16 %v3269_v54, %v3267_v36 }
 0xa74   :  { %3565 = vmatmul.bf16.vlgmr.msrb.gmra.mxu2 %v3158_v3  ;;  %v3144_v53 = vpop.f32.mrf.mxu1  ;;  %v5681_v3 = vld [vmem:[%s7013_s19 + $0x5c] sm:$0xff] }
 0xa75   :  { %5170 = vmatmul.msk.bf16.vlgmr.msrb.gmra.mxu1 %vm2757_vm5, %v3287_v59  ;;  %v5671_v59 = vld [vmem:[%s7014_s20 + $0xf0] sm:$0xff] }
 0xa76   :  { %3967 = vmatpush.bf16.msrb.mxu1 %v6687_v18  ;;  %3835 = vmatpush.bf16.msra.mxu2 %v5671_v59 }
 0xa78   :  { %v3241_v25 = vpop.f32.mrf.mxu2 }
 0xa79   :  { %v3286_v37 = vpack.c.bf16 %v3241_v25, %v3239_v43  ;;  %v3116_v19 = vpop.f32.mrf.mxu0 }
 0xa7a   :  { %3968 = vmatpush.bf16.msrb.mxu1 %v6694_v61  ;;  %v3272_v17 = vpop.f32.mrf.mxu3 }
 0xa7b   :  { %3419 = vmatmul.bf16.vlgmr.msra.gmra.mxu0 %v3286_v37 }
 0xa7c   :  { %3939 = vmatpush.bf16.msra.mxu0 %v6702_v9  ;;  %v3146_v40 = vpop.f32.mrf.mxu1 }
 0xa7d   :  { %v3161_v56 = vpack.c.bf16 %v3146_v40, %v3144_v53 }
 0xa7f   :  { %5227 = vmatmul.msk.bf16.gmra.mxu3 %vm2757_vm5, %v3161_v56 }
 0xa80   :  { %3940 = vmatpush.bf16.msra.mxu0 %v6716_v6  ;;  %v3244_v50 = vpop.f32.mrf.mxu2 }
 0xa81   :  { %v3118_v45 = vpop.f32.mrf.mxu0 }
 0xa82   :  { %v3274_v32 = vpop.f32.mrf.mxu3  ;;  %v3160_v58 = vpack.c.bf16 %v3118_v45, %v3116_v19  ;;  %v5677_v19 = vld [vmem:[%s7014_s20 + $0x120] sm:$0xff]  ;;  %v5670_v45 = vld [vmem:[%s7014_s20 + $0xe8] sm:$0xff] }
 0xa83   :  { %v3289_v18 = vpack.c.bf16 %v3274_v32, %v3272_v17  ;;  %3865 = vmatpush.bf16.msra.mxu3 %v5677_v19  ;;  %3836 = vmatpush.bf16.msra.mxu2 %v5670_v45  ;;  %v5692_v45 = vld [vmem:[%s7014_s20 + $0x180] sm:$0xff] }
 0xa84   :  { %3570 = vmatmul.bf16.gmra.mxu2 %v3160_v58  ;;  %v3149_v63 = vpop.f32.mrf.mxu1 }
 0xa85   :  { %5171 = vmatmul.msk.bf16.gmra.mxu1 %vm2757_vm5, %v3289_v18 }
 0xa88   :  { %v3246_v61 = vpop.f32.mrf.mxu2 }
 0xa89   :  { %v3288_v33 = vpack.c.bf16 %v3246_v61, %v3244_v50  ;;  %v3121_v34 = vpop.f32.mrf.mxu0 }
 0xa8a   :  { %v3277_v12 = vpop.f32.mrf.mxu3 }
 0xa8b   :  { %3424 = vmatmul.bf16.gmra.mxu0 %v3288_v33 }
 0xa8c   :  { %v3151_v9 = vpop.f32.mrf.mxu1 }
 0xa8d   :  { %v3163_v1 = vpack.c.bf16 %v3151_v9, %v3149_v63  ;;  %v5676_v63 = vld [vmem:[%s7014_s20 + $0x118] sm:$0xff] }
 0xa8e   :  { %3866 = vmatpush.bf16.msra.mxu3 %v5676_v63 }
 0xa8f   :  { %5228 = vmatmul.msk.bf16.gmra.mxu3 %vm2757_vm5, %v3163_v1  ;;  %v5682_v1 = vld [vmem:[%s7013_s19 + $0x64] sm:$0xff] }
 0xa90   :  { %v3249_v5 = vpop.f32.mrf.mxu2 }
 0xa91   :  { %v3123_v6 = vpop.f32.mrf.mxu0 }
 0xa92   :  { %v3279_v7 = vpop.f32.mrf.mxu3  ;;  %v3162_v8 = vpack.c.bf16 %v3123_v6, %v3121_v34 }
 0xa93   :  { %v3291_v14 = vpack.c.bf16 %v3279_v7, %v3277_v12  ;;  %v5669_v12 = vld [vmem:[%s7014_s20 + $0xe0] sm:$0xff] }
 0xa94   :  { %3575 = vmatmul.bf16.gmra.mxu2 %v3162_v8  ;;  %v3154_v28 = vpop.f32.mrf.mxu1 }
 0xa95   :  { %5172 = vmatmul.msk.bf16.gmra.mxu1 %vm2757_vm5, %v3291_v14  ;;  %v3165_v15 = vpack.c.bf16 %v3154_v28, %v3154_v28  ;;  %3837 = vmatpush.bf16.msra.mxu2 %v5669_v12  ;;  %v5691_v12 = vld [vmem:[%s7014_s20 + $0x178] sm:$0xff] }
 0xa98   :  { %v3251_v0 = vpop.f32.mrf.mxu2 }
 0xa99   :  { %v3290_v35 = vpack.c.bf16 %v3251_v0, %v3249_v5  ;;  %v3126_v38 = vpop.f32.mrf.mxu0  ;;  %v5668_v0 = vld [vmem:[%s7014_s20 + $0xd8] sm:$0xff] }
 0xa9a   :  { %v3282_v2 = vpop.f32.mrf.mxu3  ;;  %v3164_v62 = vpack.c.bf16 %v3126_v38, %v3126_v38  ;;  %v5675_v38 = vld [vmem:[%s7014_s20 + $0x110] sm:$0xff]  ;;  %3838 = vmatpush.bf16.msra.mxu2 %v5668_v0 }
 0xa9b   :  { %3429 = vmatmul.bf16.gmra.mxu0 %v3290_v35  ;;  %v3293_v22 = vpack.c.bf16 %v3282_v2, %v3282_v2  ;;  %3867 = vmatpush.bf16.msra.mxu3 %v5675_v38 }
 0xa9c   :  { %v3156_v13 = vpop.f32.mrf.mxu1 }
 0xa9f   :  { %5229 = vmatmul.msk.bf16.gmra.mxu3 %vm2757_vm5, %v3165_v15  ;;  %v5345_v15 = vld [vmem:[%s7013_s19 + $0x6c] sm:$0xf] }
 0xaa0   :  { %v3254_v16 = vpop.f32.mrf.mxu2 }
 0xaa1   :  { %v3128_v30 = vpop.f32.mrf.mxu0  ;;  %v3292_v23 = vpack.c.bf16 %v3254_v16, %v3254_v16 }
 0xaa2   :  { %v3284_v21 = vpop.f32.mrf.mxu3 }
 0xaa3   :  { %v5667_v21 = vld [vmem:[%s7014_s20 + $0xd0] sm:$0xff] }
 0xaa4   :  { %3580 = vmatmul.bf16.gmra.mxu2 %v3164_v62 }
 0xaa5   :  { %5173 = vmatmul.msk.bf16.gmra.mxu1 %vm2757_vm5, %v3293_v22  ;;  %v3916_v22 = vunpack.c.l.b16 %v5345_v15  ;;  %3839 = vmatpush.bf16.msra.mxu2 %v5667_v21 }
 0xaa8   :  { %v3256_v10 = vpop.f32.mrf.mxu2 }
 0xaa9   :  { %4114 = vmatpush.bf16.msrb.mxu2 %v5690_v31 }
 0xaab   :  { %3434 = vmatmul.bf16.gmra.mxu0 %v3292_v23 }
 0xaad   :  { %4115 = vmatpush.bf16.msrb.mxu2 %v5689_v11 }
 0xab5   :  { %5253 = vmatmul.msk.bf16.vlgmr.msra.gmra.mxu1 %vm3083_vm11, %v5664_v60 }
 0xabb   :  { %5249 = vmatmul.msk.bf16.vlgmr.msrb.gmra.mxu0 %vm3083_vm11, %v5664_v60  ;;  %v3920_v60 = vpack.c.b16 %v3916_v22, %v3916_v22 }
 0xac5   :  { %5254 = vmatmul.msk.bf16.gmra.mxu1 %vm3083_vm11, %v5665_v24 }
 0xacb   :  { %5250 = vmatmul.msk.bf16.gmra.mxu0 %vm3083_vm11, %v5665_v24 }
 0xad5   :  { %5255 = vmatmul.msk.bf16.gmra.mxu1 %vm3083_vm11, %v5666_v51 }
 0xadb   :  { %5251 = vmatmul.msk.bf16.gmra.mxu0 %vm3083_vm11, %v5666_v51 }
 0xae5   :  { %5256 = vmatmul.msk.bf16.gmra.mxu1 %vm3083_vm11, %v3638_v27 }
 0xaeb   :  { %5252 = vmatmul.msk.bf16.gmra.mxu0 %vm3083_vm11, %v3638_v27 }
 0xaf2   :  { %v3448_v46 = vpop.f32.mrf.mxu1  ;;  %v3594_v57 = vpop.f32.mrf.mxu3 }
 0xaf5   :  { %5362 = vmatmul.msk.bf16.vlgmr.msrb.gmra.mxu1 %vm3083_vm11, %v5680_v20 }
 0xaf7   :  { %v3566_v48 = vpop.f32.mrf.mxu2 }
 0xaf8   :  { %v3420_v4 = vpop.f32.mrf.mxu0 }
 0xaf9   :  { %v3449_v49 = vadd.f32 %v3448_v46, %v3420_v4 }
 0xafa   :  { %v3450_v41 = vpop.f32.mrf.mxu1  ;;  %v3596_v36 = vpop.f32.mrf.mxu3 }
 0xafb   :  { %v3567_v42 = vadd.f32 %v3566_v48, %v3449_v49  ;;  %5358 = vmatmul.msk.bf16.vlgmr.msra.gmra.mxu0 %vm3083_vm11, %v5680_v20  ;;  %v5695_v20 = vld [vmem:[%s7014_s20 + $0x198] sm:$0xff] }
 0xafc   :  { %4145 = vmatpush.bf16.msrb.mxu3 %v5695_v20 }
 0xafd   :  { %v6878_v52 = vadd.f32 %v3594_v57, %v3567_v42 }
 0xaff   :  { %v3568_v43 = vpop.f32.mrf.mxu2 }
 0xb00   :  { %v3422_v39 = vpop.f32.mrf.mxu0 }
 0xb01   :  { %v3451_v54 = vadd.f32 %v3450_v41, %v3422_v39 }
 0xb02   :  { %v3453_v53 = vpop.f32.mrf.mxu1  ;;  %v3599_v25 = vpop.f32.mrf.mxu3 }
 0xb03   :  { %v3569_v37 = vadd.f32 %v3568_v43, %v3451_v54  ;;  %v5688_v43 = vld [vmem:[%s7014_s20 + $0x160] sm:$0xff] }
 0xb04   :  { %4116 = vmatpush.bf16.msrb.mxu2 %v5688_v43 }
 0xb05   :  { %v6889_v17 = vadd.f32 %v3596_v36, %v3569_v37  ;;  %5363 = vmatmul.msk.bf16.gmra.mxu1 %vm3083_vm11, %v5681_v3  ;;  %v5694_v36 = vld [vmem:[%s7014_s20 + $0x190] sm:$0xff]  ;;  %v5693_v37 = vld [vmem:[%s7014_s20 + $0x188] sm:$0xff] }
 0xb06   :  { %4146 = vmatpush.bf16.msrb.mxu3 %v5694_v36 }
 0xb07   :  { %v3571_v40 = vpop.f32.mrf.mxu2 }
 0xb08   :  { %v3425_v56 = vpop.f32.mrf.mxu0 }
 0xb09   :  { %v3454_v50 = vadd.f32 %v3453_v53, %v3425_v56  ;;  %v5687_v53 = vld [vmem:[%s7014_s20 + $0x158] sm:$0xff] }
 0xb0a   :  { %v3455_v32 = vpop.f32.mrf.mxu1  ;;  %v3601_v58 = vpop.f32.mrf.mxu3  ;;  %4117 = vmatpush.bf16.msrb.mxu2 %v5687_v53  ;;  %4147 = vmatpush.bf16.msrb.mxu3 %v5693_v37 }
 0xb0b   :  { %v3572_v18 = vadd.f32 %v3571_v40, %v3454_v50  ;;  %5359 = vmatmul.msk.bf16.gmra.mxu0 %vm3083_vm11, %v5681_v3  ;;  %v5686_v40 = vld [vmem:[%s7014_s20 + $0x150] sm:$0xff] }
 0xb0d   :  { %v6899_v61 = vadd.f32 %v3599_v25, %v3572_v18 }
 0xb0e   :  { %4118 = vmatpush.bf16.msrb.mxu2 %v5686_v40  ;;  %4148 = vmatpush.bf16.msrb.mxu3 %v5692_v45 }
 0xb0f   :  { %v3573_v33 = vpop.f32.mrf.mxu2 }
 0xb10   :  { %v3427_v34 = vpop.f32.mrf.mxu0 }
 0xb11   :  { %v3456_v9 = vadd.f32 %v3455_v32, %v3427_v34  ;;  %v5684_v34 = vld [vmem:[%s7014_s20 + $0x140] sm:$0xff] }
 0xb12   :  { %v3458_v5 = vpop.f32.mrf.mxu1  ;;  %v3604_v7 = vpop.f32.mrf.mxu3  ;;  %4149 = vmatpush.bf16.msrb.mxu3 %v5691_v12 }
 0xb13   :  { %v3574_v6 = vadd.f32 %v3573_v33, %v3456_v9 }
 0xb15   :  { %v6907_v8 = vadd.f32 %v3601_v58, %v3574_v6  ;;  %5364 = vmatmul.msk.bf16.gmra.mxu1 %vm3083_vm11, %v5682_v1  ;;  %v5685_v58 = vld [vmem:[%s7014_s20 + $0x148] sm:$0xff] }
 0xb16   :  { %4119 = vmatpush.bf16.msrb.mxu2 %v5685_v58 }
 0xb17   :  { %v3576_v14 = vpop.f32.mrf.mxu2 }
 0xb18   :  { %v3430_v28 = vpop.f32.mrf.mxu0 }
 0xb19   :  { %v3459_v35 = vadd.f32 %v3458_v5, %v3430_v28  ;;  %v5683_v5 = vld [vmem:[%s7014_s20 + $0x138] sm:$0xff] }
 0xb1a   :  { %v3460_v2 = vpop.f32.mrf.mxu1  ;;  %v3606_v16 = vpop.f32.mrf.mxu3  ;;  %4120 = vmatpush.bf16.msrb.mxu2 %v5684_v34 }
 0xb1b   :  { %v3577_v13 = vadd.f32 %v3576_v14, %v3459_v35  ;;  %5360 = vmatmul.msk.bf16.gmra.mxu0 %vm3083_vm11, %v5682_v1 }
 0xb1d   :  { %v6920_v62 = vadd.f32 %v3604_v7, %v3577_v13 }
 0xb1e   :  { %4121 = vmatpush.bf16.msrb.mxu2 %v5683_v5 }
 0xb1f   :  { %v3578_v30 = vpop.f32.mrf.mxu2 }
 0xb20   :  { %v3432_v23 = vpop.f32.mrf.mxu0 }
 0xb21   :  { %v3461_v10 = vadd.f32 %v3460_v2, %v3432_v23 }
 0xb22   :  { %v3463_v24 = vpop.f32.mrf.mxu1  ;;  %v3609_v26 = vpop.f32.mrf.mxu3 }
 0xb23   :  { %v3579_v51 = vadd.f32 %v3578_v30, %v3461_v10 }
 0xb25   :  { %v6925_v55 = vadd.f32 %v3606_v16, %v3579_v51  ;;  %5365 = vmatmul.msk.bf16.gmra.mxu1 %vm3083_vm11, %v3920_v60 }
 0xb27   :  { %v3581_v27 = vpop.f32.mrf.mxu2 }
 0xb28   :  { %v3435_v29 = vpop.f32.mrf.mxu0 }
 0xb29   :  { %v3464_v44 = vadd.f32 %v3463_v24, %v3435_v29 }
 0xb2a   :  { %v3465_v46 = vpop.f32.mrf.mxu1  ;;  %v3611_v47 = vpop.f32.mrf.mxu3 }
 0xb2b   :  { %v3582_v57 = vadd.f32 %v3581_v27, %v3464_v44  ;;  %5361 = vmatmul.msk.bf16.gmra.mxu0 %vm3083_vm11, %v3920_v60 }
 0xb2d   :  { %v6935_v48 = vadd.f32 %v3609_v26, %v3582_v57 }
 0xb2f   :  { %v3583_v4 = vpop.f32.mrf.mxu2 }
 0xb30   :  { %v3437_v49 = vpop.f32.mrf.mxu0 }
 0xb32   :  { %v3688_v41 = vpop.f32.mrf.mxu1 }
 0xb38   :  { %v3660_v42 = vpop.f32.mrf.mxu0 }
 0xb3a   :  { %v3690_v39 = vpop.f32.mrf.mxu1 }
 0xb3b   :  { %v3708_v54 = vpack.c.bf16 %v3690_v39, %v3688_v41 }
 0xb3d   :  { %5335 = vmatmul.msk.bf16.vlgmr.msra.gmra.mxu3 %vm2757_vm5, %v3708_v54 }
 0xb40   :  { %v3662_v3 = vpop.f32.mrf.mxu0 }
 0xb41   :  { %v3707_v59 = vpack.c.bf16 %v3662_v3, %v3660_v42 }
 0xb42   :  { %v3693_v25 = vpop.f32.mrf.mxu1 }
 0xb43   :  { %3840 = vmatmul.bf16.vlgmr.msra.gmra.mxu2 %v3707_v59 }
 0xb48   :  { %v3665_v19 = vpop.f32.mrf.mxu0 }
 0xb4a   :  { %v3695_v56 = vpop.f32.mrf.mxu1 }
 0xb4b   :  { %v3710_v50 = vpack.c.bf16 %v3695_v56, %v3693_v25 }
 0xb4d   :  { %5336 = vmatmul.msk.bf16.gmra.mxu3 %vm2757_vm5, %v3710_v50 }
 0xb50   :  { %v3667_v32 = vpop.f32.mrf.mxu0 }
 0xb51   :  { %v3709_v18 = vpack.c.bf16 %v3667_v32, %v3665_v19 }
 0xb52   :  { %v3698_v63 = vpop.f32.mrf.mxu1 }
 0xb53   :  { %3845 = vmatmul.bf16.gmra.mxu2 %v3709_v18 }
 0xb58   :  { %v3670_v33 = vpop.f32.mrf.mxu0 }
 0xb5a   :  { %v3700_v9 = vpop.f32.mrf.mxu1 }
 0xb5b   :  { %v3712_v1 = vpack.c.bf16 %v3700_v9, %v3698_v63 }
 0xb5d   :  { %5337 = vmatmul.msk.bf16.gmra.mxu3 %vm2757_vm5, %v3712_v1 }
 0xb60   :  { %v3672_v6 = vpop.f32.mrf.mxu0 }
 0xb61   :  { %v3711_v7 = vpack.c.bf16 %v3672_v6, %v3670_v33 }
 0xb62   :  { %v3703_v14 = vpop.f32.mrf.mxu1 }
 0xb63   :  { %3850 = vmatmul.bf16.gmra.mxu2 %v3711_v7  ;;  %v3714_v35 = vpack.c.bf16 %v3703_v14, %v3703_v14 }
 0xb68   :  { %v3675_v28 = vpop.f32.mrf.mxu0 }
 0xb69   :  { %v3713_v2 = vpack.c.bf16 %v3675_v28, %v3675_v28 }
 0xb6a   :  { %v3705_v0 = vpop.f32.mrf.mxu1 }
 0xb6d   :  { %5338 = vmatmul.msk.bf16.gmra.mxu3 %vm2757_vm5, %v3714_v35 }
 0xb70   :  { %v3677_v38 = vpop.f32.mrf.mxu0 }
 0xb72   :  { %v3970_v15 = vpop.f32.mrf.mxu1 }
 0xb73   :  { %3855 = vmatmul.bf16.gmra.mxu2 %v3713_v2 }
 0xb78   :  { %v3942_v13 = vpop.f32.mrf.mxu0 }
 0xb7a   :  { %v3972_v16 = vpop.f32.mrf.mxu1 }
 0xb7b   :  { %v3990_v22 = vpack.c.bf16 %v3972_v16, %v3970_v15 }
 0xb7d   :  { %5444 = vmatmul.msk.bf16.vlgmr.msrb.gmra.mxu3 %vm2757_vm5, %v3990_v22 }
 0xb80   :  { %v3944_v30 = vpop.f32.mrf.mxu0 }
 0xb81   :  { %v3989_v21 = vpack.c.bf16 %v3944_v30, %v3942_v13 }
 0xb82   :  { %v3975_v23 = vpop.f32.mrf.mxu1 }
 0xb83   :  { %4122 = vmatmul.bf16.vlgmr.msrb.gmra.mxu2 %v3989_v21 }
 0xb88   :  { %v3947_v10 = vpop.f32.mrf.mxu0 }
 0xb8a   :  { %v3977_v60 = vpop.f32.mrf.mxu1 }
 0xb8b   :  { %v3992_v24 = vpack.c.bf16 %v3977_v60, %v3975_v23 }
 0xb8d   :  { %5445 = vmatmul.msk.bf16.gmra.mxu3 %vm2757_vm5, %v3992_v24 }
 0xb90   :  { %v3949_v51 = vpop.f32.mrf.mxu0 }
 0xb91   :  { %v3991_v26 = vpack.c.bf16 %v3949_v51, %v3947_v10 }
 0xb92   :  { %v3980_v27 = vpop.f32.mrf.mxu1 }
 0xb93   :  { %4127 = vmatmul.bf16.gmra.mxu2 %v3991_v26 }
 0xb98   :  { %v3952_v29 = vpop.f32.mrf.mxu0 }
 0xb9a   :  { %v3982_v31 = vpop.f32.mrf.mxu1 }
 0xb9b   :  { %v3994_v20 = vpack.c.bf16 %v3982_v31, %v3980_v27 }
 0xb9d   :  { %5446 = vmatmul.msk.bf16.gmra.mxu3 %vm2757_vm5, %v3994_v20 }
 0xba0   :  { %v3954_v44 = vpop.f32.mrf.mxu0 }
 0xba1   :  { %v3993_v46 = vpack.c.bf16 %v3954_v44, %v3952_v29 }
 0xba2   :  { %v3985_v57 = vpop.f32.mrf.mxu1 }
 0xba3   :  { %4132 = vmatmul.bf16.gmra.mxu2 %v3993_v46  ;;  %v3996_v4 = vpack.c.bf16 %v3985_v57, %v3985_v57 }
 0xba8   :  { %v3957_v47 = vpop.f32.mrf.mxu0 }
 0xba9   :  { %v3995_v11 = vpack.c.bf16 %v3957_v47, %v3957_v47 }
 0xbaa   :  { %v3987_v49 = vpop.f32.mrf.mxu1 }
 0xbad   :  { %5447 = vmatmul.msk.bf16.gmra.mxu3 %vm2757_vm5, %v3996_v4 }
 0xbb0   :  { %v3959_v41 = vpop.f32.mrf.mxu0 }
 0xbb3   :  { %4137 = vmatmul.bf16.gmra.mxu2 %v3995_v11 }
 0xbc0   :  { %v3869_v36 = vpop.f32.mrf.mxu3 }
 0xbc6   :  { %v3841_v42 = vpop.f32.mrf.mxu2 }
 0xbc7   :  { %v3870_v43 = vadd.f32 %v3869_v36, %v3841_v42 }
 0xbc8   :  { %v3871_v39 = vpop.f32.mrf.mxu3 }
 0xbc9   :  { %v3888_v54 = vadd.f32 %v3870_v43, %v6878_v52 }
 0xbce   :  { %v3843_v3 = vpop.f32.mrf.mxu2 }
 0xbcf   :  { %v3872_v59 = vadd.f32 %v3871_v39, %v3843_v3 }
 0xbd0   :  { %v3874_v53 = vpop.f32.mrf.mxu3 }
 0xbd1   :  { %v3889_v25 = vadd.f32 %v3872_v59, %v6889_v17 }
 0xbd6   :  { %v3846_v37 = vpop.f32.mrf.mxu2 }
 0xbd7   :  { %v3875_v19 = vadd.f32 %v3874_v53, %v3846_v37 }
 0xbd8   :  { %v3876_v40 = vpop.f32.mrf.mxu3 }
 0xbd9   :  { %v3890_v56 = vadd.f32 %v3875_v19, %v6899_v61 }
 0xbde   :  { %v3848_v50 = vpop.f32.mrf.mxu2 }
 0xbdf   :  { %v3877_v45 = vadd.f32 %v3876_v40, %v3848_v50 }
 0xbe0   :  { %v3879_v32 = vpop.f32.mrf.mxu3 }
 0xbe1   :  { %v3891_v58 = vadd.f32 %v3877_v45, %v6907_v8  ;;  %v5701_v8 = vld [vmem:[%s7015_s21] ss:$0 sm:$0xff]  ;;  %s5804_s21 = smov [#allocation7]  }
 0xbe2   :  { %s4206_s6 = sshll.u32 %s5804_s21, 4  ;;  %s4207_s6 = int_to_ptr.vmem [resolvable:$true] %s4206_s6 }
 0xbe6   :  { %v3851_v18 = vpop.f32.mrf.mxu2 }
 0xbe7   :  { %v3880_v63 = vadd.f32 %v3879_v32, %v3851_v18 }
 0xbe8   :  { %v3881_v33 = vpop.f32.mrf.mxu3 }
 0xbe9   :  { %v3892_v52 = vadd.f32 %v3880_v63, %v6920_v62 }
 0xbee   :  { %v3853_v34 = vpop.f32.mrf.mxu2 }
 0xbef   :  { %v3882_v12 = vadd.f32 %v3881_v33, %v3853_v34 }
 0xbf0   :  { %v3884_v9 = vpop.f32.mrf.mxu3 }
 0xbf1   :  { %v3893_v17 = vadd.f32 %v3882_v12, %v6925_v55 }
 0xbf6   :  { %v3856_v1 = vpop.f32.mrf.mxu2 }
 0xbf7   :  { %v3885_v5 = vadd.f32 %v3884_v9, %v3856_v1 }
 0xbf8   :  { %v3886_v6 = vpop.f32.mrf.mxu3 }
 0xbf9   :  { %v3894_v61 = vadd.f32 %v3885_v5, %v6935_v48 }
 0xbfe   :  { %v3858_v7 = vpop.f32.mrf.mxu2 }
 0xc00   :  { %v4151_v14 = vpop.f32.mrf.mxu3 }
 0xc06   :  { %v4123_v28 = vpop.f32.mrf.mxu2 }
 0xc07   :  { %v4152_v0 = vadd.f32 %v4151_v14, %v4123_v28 }
 0xc08   :  { %v4153_v35 = vpop.f32.mrf.mxu3 }
 0xc09   :  { %v4170_v62 = vadd.f32 %v4152_v0, %v3888_v54 }
 0xc0b   :  { %v4181_v38 = vadd.f32 %v5701_v8, %v4170_v62 }
 0xc0d   :  { %5708 = vtanh.f32 %v4181_v38 }
 0xc0e   :  { %v4125_v2 = vpop.f32.mrf.mxu2 }
 0xc0f   :  { %v4154_v15 = vadd.f32 %v4153_v35, %v4125_v2 }
 0xc10   :  { %v4156_v55 = vpop.f32.mrf.mxu3 }
 0xc11   :  { %v4171_v13 = vadd.f32 %v4154_v15, %v3889_v25 }
 0xc13   :  { %v5709_v16 = vpop.eup %5708  ;;  %v4182_v22 = vadd.f32 %v5701_v8, %v4171_v13 }
 0xc14   :  { %4195 = vst [vmem:[#allocation7] sm:$0xff] %v5709_v16 }
 0xc15   :  { %5710 = vtanh.f32 %v4182_v22 }
 0xc16   :  { %v4128_v48 = vpop.f32.mrf.mxu2 }
 0xc17   :  { %v4157_v30 = vadd.f32 %v4156_v55, %v4128_v48 }
 0xc18   :  { %v4158_v21 = vpop.f32.mrf.mxu3 }
 0xc19   :  { %v4172_v23 = vadd.f32 %v4157_v30, %v3890_v56 }
 0xc1b   :  { %v5711_v10 = vpop.eup %5710  ;;  %v4183_v60 = vadd.f32 %v5701_v8, %v4172_v23 }
 0xc1c   :  { %4196 = vst [vmem:[#allocation7 + $0x8] sm:$0xff] %v5711_v10 }
 0xc1d   :  { %5712 = vtanh.f32 %v4183_v60 }
 0xc1e   :  { %v4130_v24 = vpop.f32.mrf.mxu2 }
 0xc1f   :  { %v4159_v51 = vadd.f32 %v4158_v21, %v4130_v24 }
 0xc20   :  { %v4161_v26 = vpop.f32.mrf.mxu3 }
 0xc21   :  { %v4173_v27 = vadd.f32 %v4159_v51, %v3891_v58 }
 0xc23   :  { %v5713_v29 = vpop.eup %5712  ;;  %v4184_v31 = vadd.f32 %v5701_v8, %v4173_v27 }
 0xc24   :  { %4197 = vst [vmem:[#allocation7 + $0x10] sm:$0xff] %v5713_v29 }
 0xc25   :  { %5714 = vtanh.f32 %v4184_v31 }
 0xc26   :  { %v4133_v20 = vpop.f32.mrf.mxu2 }
 0xc27   :  { %v4162_v44 = vadd.f32 %v4161_v26, %v4133_v20 }
 0xc28   :  { %v4163_v46 = vpop.f32.mrf.mxu3 }
 0xc29   :  { %v4174_v57 = vadd.f32 %v4162_v44, %v3892_v52 }
 0xc2b   :  { %v5715_v47 = vpop.eup %5714  ;;  %v4185_v4 = vadd.f32 %v5701_v8, %v4174_v57 }
 0xc2c   :  { %4198 = vst [vmem:[#allocation7 + $0x18] sm:$0xff] %v5715_v47 }
 0xc2d   :  { %5716 = vtanh.f32 %v4185_v4 }
 0xc2e   :  { %v4135_v49 = vpop.f32.mrf.mxu2 }
 0xc2f   :  { %v4164_v11 = vadd.f32 %v4163_v46, %v4135_v49 }
 0xc30   :  { %v4166_v41 = vpop.f32.mrf.mxu3 }
 0xc31   :  { %v4175_v36 = vadd.f32 %v4164_v11, %v3893_v17 }
 0xc33   :  { %v5717_v42 = vpop.eup %5716  ;;  %v4186_v43 = vadd.f32 %v5701_v8, %v4175_v36 }
 0xc34   :  { %4199 = vst [vmem:[#allocation7 + $0x20] sm:$0xff] %v5717_v42 }
 0xc35   :  { %5718 = vtanh.f32 %v4186_v43 }
 0xc36   :  { %v4138_v39 = vpop.f32.mrf.mxu2 }
 0xc37   :  { %v4167_v54 = vadd.f32 %v4166_v41, %v4138_v39 }
 0xc38   :  { %v4168_v3 = vpop.f32.mrf.mxu3 }
 0xc39   :  { %v4176_v59 = vadd.f32 %v4167_v54, %v3894_v61 }
 0xc3b   :  { %v5719_v53 = vpop.eup %5718  ;;  %v4187_v25 = vadd.f32 %v5701_v8, %v4176_v59 }
 0xc3c   :  { %4200 = vst [vmem:[#allocation7 + $0x28] sm:$0xff] %v5719_v53 }
 0xc3d   :  { %5720 = vtanh.f32 %v4187_v25 }
 0xc3e   :  { %v4140_v37 = vpop.f32.mrf.mxu2 }
 0xc43   :  { %v5721_v19 = vpop.eup %5720 }
 0xc44   :  { %4201 = vst [vmem:[#allocation7 + $0x30] sm:$0xff] %v5721_v19 }
 0xc45   :  { %4214 = dma.vmem_to_hbm [thread:$0]  %s4207_s6, 896, %s4209_s15, [#allocation4], %s5801_s5, %s5801_s5, %s5802_s24  }
 0xc46   :  { %5798 = dma.done.wait [#allocation4], 896  }
 0xc47   :  { %5799 = vsyncadd [#allocation4], 4294966400 }
 0xc48   :  { %4219 = vsyncpa [#allocation3], 1 }
 0xc49   :  { %4220 = vsyncpa [#allocation6], 1 }
 0xc4a   :  { %4221 = vsyncpa [#allocation4], 1 }

</bundles_post_ra>
